<compile_context>
chip_gen: v7x
topology: tpu7x:2x2x1
jax: 0.10.0
libtpu: 0.0.40
codegen_flags: <defaults>
</compile_context>

<pallas_src>
import numpy as np
import jax
import jax.numpy as jnp
from jax import lax
from jax.experimental import pallas as pl
from jax.experimental.pallas import tpu as pltpu

# ----------------------------- module constants -----------------------------
DT = 0.5           # RCNNCell dt (default)
DX = 0.01          # RCNNCell dx (default)
KSIZE = 5          # input_kernel_size (default)
PAD = KSIZE // 2
STEPS = 1          # RCNN steps (default)
K_COEF = 0.1       # deterministic value for the learnable scalar self.k

lap_2d_op = {
    5: [[[[0, 0, -1 / 12, 0, 0],
          [0, 0, 4 / 3, 0, 0],
          [-1 / 12, 4 / 3, -5, 4 / 3, -1 / 12],
          [0, 0, 4 / 3, 0, 0],
          [0, 0, -1 / 12, 0, 0]]]],
    3: [[[[0, 1, 0], [1, -4, 1], [0, 1, 0]]]],
    7: [[[[0, 0, 0, 2 / 180, 0, 0, 0],
          [0, 0, 0, -27 / 180, 0, 0, 0],
          [0, 0, 0, 270 / 180, 0, 0, 0],
          [2 / 180, -27 / 180, 270 / 180, -980 / 180, 270 / 180, -27 / 180, 2 / 180],
          [0, 0, 0, 270 / 180, 0, 0, 0],
          [0, 0, 0, -27 / 180, 0, 0, 0],
          [0, 0, 0, 2 / 180, 0, 0, 0]]]],
}

# full 2-D stencil (for the numpy reference)
LAP2D_NP = np.array(lap_2d_op[KSIZE][0][0], dtype=np.float64) / DX ** 2
# separable 1-D stencil: middle row of the 2-D operator with the center halved
# (the cross-shaped 2-D op = 1-D applied along rows + 1-D applied along cols)
_S1D = np.array(lap_2d_op[KSIZE][0][0][PAD], dtype=np.float64)
_S1D[PAD] = _S1D[PAD] / 2.0
S1D = _S1D / DX ** 2


def _round_up(x, m):
    return ((x + m - 1) // m) * m


def _replicate_index(i, n):
    # padMethod source index: row/col 0 <- 1, n-1 <- n-2, interior unchanged
    if i == 0:
        return 1
    if i == n - 1:
        return n - 2
    return i


def _operator_mats(n, n_pad):
    """Left-multiplication band (1-D Laplacian, zero-pad 'same') and pad
    (replicate boundary) matrices of size (n_pad, n_pad) acting on the first
    n rows only; zero elsewhere so an embedded zero region stays zero."""
    band = np.zeros((n_pad, n_pad), np.float64)
    for i in range(n):
        for d in range(-PAD, PAD + 1):
            j = i + d
            if 0 <= j < n:
                band[i, j] = S1D[d + PAD]
    padm = np.zeros((n_pad, n_pad), np.float64)
    for i in range(n):
        padm[i, _replicate_index(i, n)] = 1.0
    return band, padm


def _pick_tb(batch, hp, wp, budget_bytes=24 << 20):
    """Largest divisor of `batch` whose block footprint (with Pallas double
    buffering) fits a conservative VMEM budget (safe for all generations)."""
    img = hp * wp * 4
    const_bytes = 2 * 2 * (hp * hp + wp * wp) * 4     # A, C_h, B, C_w, 2 bufs
    tb = 1
    for cand in range(1, batch + 1):
        if batch % cand == 0 and 7 * cand * img + const_bytes <= budget_bytes:
            tb = cand
    return tb


# ------------------------------- Pallas kernel ------------------------------
def _rcnn_rk4_kernel(k_ref, u_ref, a_ref, b_ref, ch_ref, cw_ref,
                     pads_ref, final_ref, state_ref):
    """One (batch-block, step) grid point of the fused multi-step RK4 rollout.

      k_ref     : (1,) f32 SMEM (scalar prefetch)  -- learnable scalar k
      u_ref     : (TB, HP, WP) VMEM in   -- initial state (read at step 0)
      a_ref     : (HP, HP) VMEM in       -- vertical 1-D Laplacian band
      b_ref     : (WP, WP) VMEM in       -- horizontal 1-D Laplacian band
      ch_ref    : (HP, HP) VMEM in       -- replicate-pad rows (left mult)
      cw_ref    : (WP, WP) VMEM in       -- replicate-pad cols (right mult)
      pads_ref  : (TB, HP, WP) VMEM out  -- padMethod(state) of this step
      final_ref : (TB, HP, WP) VMEM out  -- state after the last step
      state_ref : (TB, HP, WP) VMEM scratch -- state carried across steps
    """
    tb, hp, wp = u_ref.shape
    s = pl.program_id(1)
    last = pl.num_programs(1) - 1
    k = k_ref[0]

    @pl.when(s == 0)
    def _init():
        state_ref[...] = u_ref[...]

    # Hoisted once per grid point (reused by all 4 RK4 stages).
    a_b = jnp.broadcast_to(a_ref[...], (tb, hp, hp))
    ch_b = jnp.broadcast_to(ch_ref[...], (tb, hp, hp))
    b_m = b_ref[...]
    cw_m = cw_ref[...]

    def lmul(m_b, v):
        # per-image (hp,hp) @ (hp,wp) as one batched MXU matmul (no transpose)
        return jnp.einsum('bij,bjw->biw', m_b, v,
                          preferred_element_type=jnp.float32,
                          precision=lax.Precision.HIGHEST)

    def rmul(v, m):
        # (tb*hp, wp) @ (wp, wp): single large MXU matmul, M = tb*hp
        return jnp.dot(v.reshape(tb * hp, wp), m,
                       preferred_element_type=jnp.float32,
                       precision=lax.Precision.HIGHEST).reshape(tb, hp, wp)

    def pad(v):
        # replicate-boundary padMethod (torch in-place order) as 0/1 matmuls
        return rmul(lmul(ch_b, v), cw_m)

    def lap(v):
        # zero-pad 'same' 4th-order Laplacian, separable: A @ v + v @ B
        return lmul(a_b, v) + rmul(v, b_m)

    # u0 = padMethod(state); torch stores this mutated tensor in `outputs`.
    v0 = pad(state_ref[...])
    pads_ref[...] = v0

    c6 = k * (DT / 6.0)
    c3 = k * (DT / 3.0)

    r1 = c6 * lap(v0)                    # (dt/6) k1
    r2 = c3 * lap(pad(v0 + 3.0 * r1))    # (dt/3) k2 ; u1 = u0 + (dt/2) k1
    r3 = c3 * lap(pad(v0 + 1.5 * r2))    # (dt/3) k3 ; u2 = u0 + (dt/2) k2
    r4 = c6 * lap(pad(v0 + 3.0 * r3))    # (dt/6) k4 ; u3 = u0 +  dt    k3

    u_next = v0 + (r1 + r2 + r3 + r4)    # u0 + dt (k1 + 2k2 + 2k3 + k4) / 6

    @pl.when(s < last)
    def _carry():
        state_ref[...] = u_next

    @pl.when(s == last)
    def _finalize():
        final_ref[...] = u_next


# --------------------------------- wrapper -----------------------------------
def rcnn_forward(init_state_low, k=K_COEF, steps=STEPS):
    """RCNN.forward(init_state_low, method='rk4').

    init_state_low: (B, 1, H, W) -> output ((steps+1)*B, 1, H, W)
    """
    # TODO(synk): upscalerHeat() class definition is not provided in the source
    #             module; it is treated as an identity map here.
    x = init_state_low.astype(jnp.float32)
    B, _, H, W = x.shape
    u = x[:, 0, :, :]                                   # single channel (B,H,W)

    # zero-embed to an (8,128)-aligned, lane-dense canvas
    HP = _round_up(H, 8)
    WP = _round_up(W, 128)
    if (HP, WP) != (H, W):
        u = jnp.pad(u, ((0, 0), (0, HP - H), (0, WP - W)))

    a_np, ch_np = _operator_mats(H, HP)                 # act on H (left mult)
    bw_np, cw_np = _operator_mats(W, WP)                # act on W
    a_m = jnp.asarray(a_np, jnp.float32)
    ch_m = jnp.asarray(ch_np, jnp.float32)
    b_m = jnp.asarray(bw_np.T, jnp.float32)             # right-mult convention
    cw_m = jnp.asarray(cw_np.T, jnp.float32)            # right-mult convention

    tb = _pick_tb(B, HP, WP)
    nb = B // tb
    k_arr = jnp.full((1,), k, dtype=jnp.float32)

    pads, final = pl.pallas_call(
        _rcnn_rk4_kernel,
        out_shape=(jax.ShapeDtypeStruct((steps, B, HP, WP), jnp.float32),
                   jax.ShapeDtypeStruct((B, HP, WP), jnp.float32)),
        grid_spec=pltpu.PrefetchScalarGridSpec(
            num_scalar_prefetch=1,
            # NOTE: steps must stay the innermost ("arbitrary") axis -- the
            # state scratch / final-output carry depends on it.
            grid=(nb, steps),
            in_specs=[
                pl.BlockSpec((tb, HP, WP), lambda bb, s, k_ref: (bb, 0, 0)),
                pl.BlockSpec((HP, HP), lambda bb, s, k_ref: (0, 0)),
                pl.BlockSpec((WP, WP), lambda bb, s, k_ref: (0, 0)),
                pl.BlockSpec((HP, HP), lambda bb, s, k_ref: (0, 0)),
                pl.BlockSpec((WP, WP), lambda bb, s, k_ref: (0, 0)),
            ],
            out_specs=(
                pl.BlockSpec((None, tb, HP, WP),
                             lambda bb, s, k_ref: (s, bb, 0, 0)),
                pl.BlockSpec((tb, HP, WP), lambda bb, s, k_ref: (bb, 0, 0)),
            ),
            scratch_shapes=[pltpu.VMEM((tb, HP, WP), jnp.float32)]),
        compiler_params=pltpu.CompilerParams(
            dimension_semantics=("parallel", "arbitrary")),
    )(k_arr, u, a_m, b_m, ch_m, cw_m)

    pads = pads.reshape(steps * B, HP, WP)[:, :H, :W]
    final = final[:, :H, :W]
    # torch: cat([pad(h0), ..., pad(h_{steps-1}), h_steps], dim=0)
    out = jnp.concatenate([pads, final], axis=0)
    return out[:, None, :, :]


# --------------------------- pure numpy reference ---------------------------
def _ref_forward(x, k, steps):
    lap = LAP2D_NP
    p = PAD

    def pad_method(u):
        u = u.copy()
        u[:, :, :, -1] = u[:, :, :, -2]
        u[:, :, :, 0] = u[:, :, :, 1]
        u[:, :, 0, :] = u[:, :, 1, :]
        u[:, :, -1, :] = u[:, :, -2, :]
        return u

    def conv(u):
        B, C, H, W = u.shape
        up = np.zeros((B, C, H + 2 * p, W + 2 * p), dtype=np.float64)
        up[:, :, p:p + H, p:p + W] = u
        out = np.zeros_like(u)
        for i in range(KSIZE):
            for j in range(KSIZE):
                if lap[i, j] != 0.0:
                    out += lap[i, j] * up[:, :, i:i + H, j:j + W]
        return out

    def f_rhs(u):
        return k * conv(pad_method(u))

    h = x.astype(np.float64)
    outs = []
    for _ in range(steps):
        u0 = pad_method(h)
        k1 = k * conv(u0)
        u1 = u0 + k1 * DT / 2.0
        k2 = f_rhs(u1)
        u2 = u0 + k2 * DT / 2.0
        k3 = f_rhs(u2)
        u3 = u0 + k3 * DT
        k4 = f_rhs(u3)
        outs.append(u0)
        h = u0 + DT * (k1 + 2 * k2 + 2 * k3 + k4) / 6.0
    outs.append(h)
    return np.concatenate(outs, axis=0)


# ------------------------------------ main -----------------------------------
if __name__ == "__main__":
    key = jax.random.PRNGKey(0)
    key_a, key_b = jax.random.split(key)

    # 1) lane-dense demo shape (W multiple of 128), default steps=1
    B, H, W = 2, 32, 128
    x = jax.random.uniform(key_a, (B, 1, H, W), dtype=jnp.float32)
    out = jax.block_until_ready(rcnn_forward(x, k=K_COEF, steps=1))
    assert out.shape == (2 * B, 1, H, W), out.shape
    ref = _ref_forward(np.asarray(x, dtype=np.float64), K_COEF, 1)
    out_np = np.asarray(out, dtype=np.float64)
    assert np.all(np.isfinite(out_np))
    rel = np.max(np.abs(out_np - ref)) / (np.max(np.abs(ref)) + 1e-30)
    assert rel < 1e-3, f"relative error too large: {rel}"

    # 2) small non-lane-aligned shape (embedded to 128 lanes), 2-step rollout
    B2, H2, W2 = 2, 16, 16
    x2 = jax.random.uniform(key_b, (B2, 1, H2, W2), dtype=jnp.float32)
    out2 = jax.block_until_ready(rcnn_forward(x2, k=K_COEF, steps=2))
    assert out2.shape == (3 * B2, 1, H2, W2), out2.shape
    ref2 = _ref_forward(np.asarray(x2, dtype=np.float64), K_COEF, 2)
    out2_np = np.asarray(out2, dtype=np.float64)
    assert np.all(np.isfinite(out2_np))
    rel2 = np.max(np.abs(out2_np - ref2)) / (np.max(np.abs(ref2)) + 1e-30)
    assert rel2 < 1e-3, f"relative error too large: {rel2}"

    print("KERNEL_OK")
</pallas_src>

<mosaic_0001>
module attributes {stable_mosaic.version = 11 : i64} {
  func.func @_rcnn_rk4_kernel(%arg0: i32, %arg1: i32, %arg2: memref<1xf32, #tpu.memory_space<smem>>, %arg3: memref<2x32x128xf32, #tpu.memory_space<vmem>>, %arg4: memref<32x32xf32, #tpu.memory_space<vmem>>, %arg5: memref<128x128xf32, #tpu.memory_space<vmem>>, %arg6: memref<32x32xf32, #tpu.memory_space<vmem>>, %arg7: memref<128x128xf32, #tpu.memory_space<vmem>>, %arg8: memref<1x2x32x128xf32, #tpu.memory_space<vmem>>, %arg9: memref<2x32x128xf32, #tpu.memory_space<vmem>>, %arg10: memref<2x32x128xf32, #tpu.memory_space<vmem>>) attributes {dimension_semantics = [#tpu.dimension_semantics<parallel>, #tpu.dimension_semantics<arbitrary>], iteration_bounds = array<i64: 1, 1>, scalar_prefetch = 1 : i64, scratch_operands = 1 : i64, tpu.core_type = #tpu.core_type<tc>, window_params = [{transform_indices = @transform_0, window_bounds = array<i64: 2, 32, 128>}, {pipeline_mode = #tpu.pipeline_mode<synchronous>, transform_indices = @transform_1, window_bounds = array<i64: 32, 32>}, {pipeline_mode = #tpu.pipeline_mode<synchronous>, transform_indices = @transform_2, window_bounds = array<i64: 128, 128>}, {pipeline_mode = #tpu.pipeline_mode<synchronous>, transform_indices = @transform_3, window_bounds = array<i64: 32, 32>}, {pipeline_mode = #tpu.pipeline_mode<synchronous>, transform_indices = @transform_4, window_bounds = array<i64: 128, 128>}, {transform_indices = @transform_5, window_bounds = array<i64: 1, 2, 32, 128>}, {transform_indices = @transform_6, window_bounds = array<i64: 2, 32, 128>}]} {
    %c0 = arith.constant 0 : index
    %0 = memref.load %arg2[%c0] : memref<1xf32, #tpu.memory_space<smem>>
    %c0_i32 = arith.constant 0 : i32
    %1 = arith.cmpi eq, %arg1, %c0_i32 : i32
    %2 = arith.extui %1 : i1 to i32
    %c0_i32_0 = arith.constant 0 : i32
    %3 = arith.cmpi ne, %2, %c0_i32_0 : i32
    scf.if %3 {
      %c0_40 = arith.constant 0 : index
      %c0_41 = arith.constant 0 : index
      %c0_42 = arith.constant 0 : index
      %81 = vector.load %arg3[%c0_40, %c0_41, %c0_42] : memref<2x32x128xf32, #tpu.memory_space<vmem>>, vector<2x32x128xf32>
      %c0_43 = arith.constant 0 : index
      %c0_44 = arith.constant 0 : index
      %c0_45 = arith.constant 0 : index
      %82 = vector.load %arg10[%c0_43, %c0_44, %c0_45] : memref<2x32x128xf32, #tpu.memory_space<vmem>>, vector<2x32x128xf32>
      tpu.vector_store %arg10[%c0_43, %c0_44, %c0_45], %81 {strides = array<i32>} : memref<2x32x128xf32, #tpu.memory_space<vmem>>, vector<2x32x128xf32>,
    } else {
    }
    %c0_1 = arith.constant 0 : index
    %c0_2 = arith.constant 0 : index
    %4 = vector.load %arg4[%c0_1, %c0_2] : memref<32x32xf32, #tpu.memory_space<vmem>>, vector<32x32xf32>
    %5 = vector.shape_cast %4 : vector<32x32xf32> to vector<1x32x32xf32>
    %6 = vector.broadcast %5 : vector<1x32x32xf32> to vector<2x32x32xf32>
    %c0_3 = arith.constant 0 : index
    %c0_4 = arith.constant 0 : index
    %7 = vector.load %arg6[%c0_3, %c0_4] : memref<32x32xf32, #tpu.memory_space<vmem>>, vector<32x32xf32>
    %8 = vector.shape_cast %7 : vector<32x32xf32> to vector<1x32x32xf32>
    %9 = vector.broadcast %8 : vector<1x32x32xf32> to vector<2x32x32xf32>
    %c0_5 = arith.constant 0 : index
    %c0_6 = arith.constant 0 : index
    %10 = vector.load %arg5[%c0_5, %c0_6] : memref<128x128xf32, #tpu.memory_space<vmem>>, vector<128x128xf32>
    %c0_7 = arith.constant 0 : index
    %c0_8 = arith.constant 0 : index
    %11 = vector.load %arg7[%c0_7, %c0_8] : memref<128x128xf32, #tpu.memory_space<vmem>>, vector<128x128xf32>
    %c0_9 = arith.constant 0 : index
    %c0_10 = arith.constant 0 : index
    %c0_11 = arith.constant 0 : index
    %12 = vector.load %arg10[%c0_9, %c0_10, %c0_11] : memref<2x32x128xf32, #tpu.memory_space<vmem>>, vector<2x32x128xf32>
    "tpu.trace_start"() <{level = 10 : i32, message = "bij,bjw->biw"}> : () -> ()
    %cst = arith.constant dense<0.000000e+00> : vector<2x32x128xf32>
    %13 = tpu.matmul %9, %12, %cst {dimension_numbers = #tpu.dot_dimension_numbers<[2], [1], [1], [2], [0, 0, 0, 1, 1, 2], [0], [0]>, precision = #tpu.contract_precision<fp32>} : vector<2x32x32xf32>, vector<2x32x128xf32>, vector<2x32x128xf32> -> vector<2x32x128xf32>
    "tpu.trace_stop"() : () -> ()
    %14 = vector.shape_cast %13 : vector<2x32x128xf32> to vector<64x128xf32>
    %cst_12 = arith.constant dense<0.000000e+00> : vector<64x128xf32>
    %15 = tpu.matmul %14, %11, %cst_12 {dimension_numbers = #tpu.dot_dimension_numbers<[1], [0], [0], [1], [0, 0, 1, 1], [], []>, precision = #tpu.contract_precision<fp32>} : vector<64x128xf32>, vector<128x128xf32>, vector<64x128xf32> -> vector<64x128xf32>
    %16 = vector.shape_cast %15 : vector<64x128xf32> to vector<2x32x128xf32>
    %c0_13 = arith.constant 0 : index
    %c0_14 = arith.constant 0 : index
    %c0_15 = arith.constant 0 : index
    %c0_16 = arith.constant 0 : index
    %17 = vector.load %arg8[%c0_13, %c0_14, %c0_15, %c0_16] : memref<1x2x32x128xf32, #tpu.memory_space<vmem>>, vector<1x2x32x128xf32>
    %18 = vector.shape_cast %17 : vector<1x2x32x128xf32> to vector<2x32x128xf32>
    %19 = vector.shape_cast %16 : vector<2x32x128xf32> to vector<1x2x32x128xf32>
    tpu.vector_store %arg8[%c0_13, %c0_14, %c0_15, %c0_16], %19 {strides = array<i32>} : memref<1x2x32x128xf32, #tpu.memory_space<vmem>>, vector<1x2x32x128xf32>,
    %cst_17 = arith.constant 0.0833333358 : f32
    %20 = arith.mulf %0, %cst_17 : f32
    %cst_18 = arith.constant 0.166666672 : f32
    %21 = arith.mulf %0, %cst_18 : f32
    "tpu.trace_start"() <{level = 10 : i32, message = "bij,bjw->biw"}> : () -> ()
    %cst_19 = arith.constant dense<0.000000e+00> : vector<2x32x128xf32>
    %22 = tpu.matmul %6, %16, %cst_19 {dimension_numbers = #tpu.dot_dimension_numbers<[2], [1], [1], [2], [0, 0, 0, 1, 1, 2], [0], [0]>, precision = #tpu.contract_precision<fp32>} : vector<2x32x32xf32>, vector<2x32x128xf32>, vector<2x32x128xf32> -> vector<2x32x128xf32>
    "tpu.trace_stop"() : () -> ()
    %23 = vector.shape_cast %16 : vector<2x32x128xf32> to vector<64x128xf32>
    %cst_20 = arith.constant dense<0.000000e+00> : vector<64x128xf32>
    %24 = tpu.matmul %23, %10, %cst_20 {dimension_numbers = #tpu.dot_dimension_numbers<[1], [0], [0], [1], [0, 0, 1, 1], [], []>, precision = #tpu.contract_precision<fp32>} : vector<64x128xf32>, vector<128x128xf32>, vector<64x128xf32> -> vector<64x128xf32>
    %25 = vector.shape_cast %24 : vector<64x128xf32> to vector<2x32x128xf32>
    %26 = arith.addf %22, %25 : vector<2x32x128xf32>
    %27 = vector.broadcast %20 : f32 to vector<2x32x128xf32>
    %28 = arith.mulf %27, %26 : vector<2x32x128xf32>
    %cst_21 = arith.constant 3.000000e+00 : f32
    %29 = vector.broadcast %cst_21 : f32 to vector<2x32x128xf32>
    %30 = arith.mulf %29, %28 : vector<2x32x128xf32>
    %31 = arith.addf %16, %30 : vector<2x32x128xf32>
    "tpu.trace_start"() <{level = 10 : i32, message = "bij,bjw->biw"}> : () -> ()
    %cst_22 = arith.constant dense<0.000000e+00> : vector<2x32x128xf32>
    %32 = tpu.matmul %9, %31, %cst_22 {dimension_numbers = #tpu.dot_dimension_numbers<[2], [1], [1], [2], [0, 0, 0, 1, 1, 2], [0], [0]>, precision = #tpu.contract_precision<fp32>} : vector<2x32x32xf32>, vector<2x32x128xf32>, vector<2x32x128xf32> -> vector<2x32x128xf32>
    "tpu.trace_stop"() : () -> ()
    %33 = vector.shape_cast %32 : vector<2x32x128xf32> to vector<64x128xf32>
    %cst_23 = arith.constant dense<0.000000e+00> : vector<64x128xf32>
    %34 = tpu.matmul %33, %11, %cst_23 {dimension_numbers = #tpu.dot_dimension_numbers<[1], [0], [0], [1], [0, 0, 1, 1], [], []>, precision = #tpu.contract_precision<fp32>} : vector<64x128xf32>, vector<128x128xf32>, vector<64x128xf32> -> vector<64x128xf32>
    %35 = vector.shape_cast %34 : vector<64x128xf32> to vector<2x32x128xf32>
    "tpu.trace_start"() <{level = 10 : i32, message = "bij,bjw->biw"}> : () -> ()
    %cst_24 = arith.constant dense<0.000000e+00> : vector<2x32x128xf32>
    %36 = tpu.matmul %6, %35, %cst_24 {dimension_numbers = #tpu.dot_dimension_numbers<[2], [1], [1], [2], [0, 0, 0, 1, 1, 2], [0], [0]>, precision = #tpu.contract_precision<fp32>} : vector<2x32x32xf32>, vector<2x32x128xf32>, vector<2x32x128xf32> -> vector<2x32x128xf32>
    "tpu.trace_stop"() : () -> ()
    %37 = vector.shape_cast %35 : vector<2x32x128xf32> to vector<64x128xf32>
    %cst_25 = arith.constant dense<0.000000e+00> : vector<64x128xf32>
    %38 = tpu.matmul %37, %10, %cst_25 {dimension_numbers = #tpu.dot_dimension_numbers<[1], [0], [0], [1], [0, 0, 1, 1], [], []>, precision = #tpu.contract_precision<fp32>} : vector<64x128xf32>, vector<128x128xf32>, vector<64x128xf32> -> vector<64x128xf32>
    %39 = vector.shape_cast %38 : vector<64x128xf32> to vector<2x32x128xf32>
    %40 = arith.addf %36, %39 : vector<2x32x128xf32>
    %41 = vector.broadcast %21 : f32 to vector<2x32x128xf32>
    %42 = arith.mulf %41, %40 : vector<2x32x128xf32>
    %cst_26 = arith.constant 1.500000e+00 : f32
    %43 = vector.broadcast %cst_26 : f32 to vector<2x32x128xf32>
    %44 = arith.mulf %43, %42 : vector<2x32x128xf32>
    %45 = arith.addf %16, %44 : vector<2x32x128xf32>
    "tpu.trace_start"() <{level = 10 : i32, message = "bij,bjw->biw"}> : () -> ()
    %cst_27 = arith.constant dense<0.000000e+00> : vector<2x32x128xf32>
    %46 = tpu.matmul %9, %45, %cst_27 {dimension_numbers = #tpu.dot_dimension_numbers<[2], [1], [1], [2], [0, 0, 0, 1, 1, 2], [0], [0]>, precision = #tpu.contract_precision<fp32>} : vector<2x32x32xf32>, vector<2x32x128xf32>, vector<2x32x128xf32> -> vector<2x32x128xf32>
    "tpu.trace_stop"() : () -> ()
    %47 = vector.shape_cast %46 : vector<2x32x128xf32> to vector<64x128xf32>
    %cst_28 = arith.constant dense<0.000000e+00> : vector<64x128xf32>
    %48 = tpu.matmul %47, %11, %cst_28 {dimension_numbers = #tpu.dot_dimension_numbers<[1], [0], [0], [1], [0, 0, 1, 1], [], []>, precision = #tpu.contract_precision<fp32>} : vector<64x128xf32>, vector<128x128xf32>, vector<64x128xf32> -> vector<64x128xf32>
    %49 = vector.shape_cast %48 : vector<64x128xf32> to vector<2x32x128xf32>
    "tpu.trace_start"() <{level = 10 : i32, message = "bij,bjw->biw"}> : () -> ()
    %cst_29 = arith.constant dense<0.000000e+00> : vector<2x32x128xf32>
    %50 = tpu.matmul %6, %49, %cst_29 {dimension_numbers = #tpu.dot_dimension_numbers<[2], [1], [1], [2], [0, 0, 0, 1, 1, 2], [0], [0]>, precision = #tpu.contract_precision<fp32>} : vector<2x32x32xf32>, vector<2x32x128xf32>, vector<2x32x128xf32> -> vector<2x32x128xf32>
    "tpu.trace_stop"() : () -> ()
    %51 = vector.shape_cast %49 : vector<2x32x128xf32> to vector<64x128xf32>
    %cst_30 = arith.constant dense<0.000000e+00> : vector<64x128xf32>
    %52 = tpu.matmul %51, %10, %cst_30 {dimension_numbers = #tpu.dot_dimension_numbers<[1], [0], [0], [1], [0, 0, 1, 1], [], []>, precision = #tpu.contract_precision<fp32>} : vector<64x128xf32>, vector<128x128xf32>, vector<64x128xf32> -> vector<64x128xf32>
    %53 = vector.shape_cast %52 : vector<64x128xf32> to vector<2x32x128xf32>
    %54 = arith.addf %50, %53 : vector<2x32x128xf32>
    %55 = vector.broadcast %21 : f32 to vector<2x32x128xf32>
    %56 = arith.mulf %55, %54 : vector<2x32x128xf32>
    %cst_31 = arith.constant 3.000000e+00 : f32
    %57 = vector.broadcast %cst_31 : f32 to vector<2x32x128xf32>
    %58 = arith.mulf %57, %56 : vector<2x32x128xf32>
    %59 = arith.addf %16, %58 : vector<2x32x128xf32>
    "tpu.trace_start"() <{level = 10 : i32, message = "bij,bjw->biw"}> : () -> ()
    %cst_32 = arith.constant dense<0.000000e+00> : vector<2x32x128xf32>
    %60 = tpu.matmul %9, %59, %cst_32 {dimension_numbers = #tpu.dot_dimension_numbers<[2], [1], [1], [2], [0, 0, 0, 1, 1, 2], [0], [0]>, precision = #tpu.contract_precision<fp32>} : vector<2x32x32xf32>, vector<2x32x128xf32>, vector<2x32x128xf32> -> vector<2x32x128xf32>
    "tpu.trace_stop"() : () -> ()
    %61 = vector.shape_cast %60 : vector<2x32x128xf32> to vector<64x128xf32>
    %cst_33 = arith.constant dense<0.000000e+00> : vector<64x128xf32>
    %62 = tpu.matmul %61, %11, %cst_33 {dimension_numbers = #tpu.dot_dimension_numbers<[1], [0], [0], [1], [0, 0, 1, 1], [], []>, precision = #tpu.contract_precision<fp32>} : vector<64x128xf32>, vector<128x128xf32>, vector<64x128xf32> -> vector<64x128xf32>
    %63 = vector.shape_cast %62 : vector<64x128xf32> to vector<2x32x128xf32>
    "tpu.trace_start"() <{level = 10 : i32, message = "bij,bjw->biw"}> : () -> ()
    %cst_34 = arith.constant dense<0.000000e+00> : vector<2x32x128xf32>
    %64 = tpu.matmul %6, %63, %cst_34 {dimension_numbers = #tpu.dot_dimension_numbers<[2], [1], [1], [2], [0, 0, 0, 1, 1, 2], [0], [0]>, precision = #tpu.contract_precision<fp32>} : vector<2x32x32xf32>, vector<2x32x128xf32>, vector<2x32x128xf32> -> vector<2x32x128xf32>
    "tpu.trace_stop"() : () -> ()
    %65 = vector.shape_cast %63 : vector<2x32x128xf32> to vector<64x128xf32>
    %cst_35 = arith.constant dense<0.000000e+00> : vector<64x128xf32>
    %66 = tpu.matmul %65, %10, %cst_35 {dimension_numbers = #tpu.dot_dimension_numbers<[1], [0], [0], [1], [0, 0, 1, 1], [], []>, precision = #tpu.contract_precision<fp32>} : vector<64x128xf32>, vector<128x128xf32>, vector<64x128xf32> -> vector<64x128xf32>
    %67 = vector.shape_cast %66 : vector<64x128xf32> to vector<2x32x128xf32>
    %68 = arith.addf %64, %67 : vector<2x32x128xf32>
    %69 = vector.broadcast %20 : f32 to vector<2x32x128xf32>
    %70 = arith.mulf %69, %68 : vector<2x32x128xf32>
    %71 = arith.addf %28, %42 : vector<2x32x128xf32>
    %72 = arith.addf %71, %56 : vector<2x32x128xf32>
    %73 = arith.addf %72, %70 : vector<2x32x128xf32>
    %74 = arith.addf %16, %73 : vector<2x32x128xf32>
    %c0_i32_36 = arith.constant 0 : i32
    %75 = arith.cmpi slt, %arg1, %c0_i32_36 : i32
    %76 = arith.extui %75 : i1 to i32
    %c0_i32_37 = arith.constant 0 : i32
    %77 = arith.cmpi ne, %76, %c0_i32_37 : i32
    scf.if %77 {
      %c0_40 = arith.constant 0 : index
      %c0_41 = arith.constant 0 : index
      %c0_42 = arith.constant 0 : index
      %81 = vector.load %arg10[%c0_40, %c0_41, %c0_42] : memref<2x32x128xf32, #tpu.memory_space<vmem>>, vector<2x32x128xf32>
      tpu.vector_store %arg10[%c0_40, %c0_41, %c0_42], %74 {strides = array<i32>} : memref<2x32x128xf32, #tpu.memory_space<vmem>>, vector<2x32x128xf32>,
    } else {
    }
    %c0_i32_38 = arith.constant 0 : i32
    %78 = arith.cmpi eq, %arg1, %c0_i32_38 : i32
    %79 = arith.extui %78 : i1 to i32
    %c0_i32_39 = arith.constant 0 : i32
    %80 = arith.cmpi ne, %79, %c0_i32_39 : i32
    scf.if %80 {
      %c0_40 = arith.constant 0 : index
      %c0_41 = arith.constant 0 : index
      %c0_42 = arith.constant 0 : index
      %81 = vector.load %arg9[%c0_40, %c0_41, %c0_42] : memref<2x32x128xf32, #tpu.memory_space<vmem>>, vector<2x32x128xf32>
      tpu.vector_store %arg9[%c0_40, %c0_41, %c0_42], %74 {strides = array<i32>} : memref<2x32x128xf32, #tpu.memory_space<vmem>>, vector<2x32x128xf32>,
    } else {
    }
    return
  }
  func.func @transform_0(%arg0: i32, %arg1: i32, %arg2: memref<1xf32, #tpu.memory_space<smem>>) -> (i32, i32, i32) {
    %c0_i32 = arith.constant 0 : i32
    %c0_i32_0 = arith.constant 0 : i32
    %c0_i32_1 = arith.constant 0 : i32
    return %arg0, %c0_i32, %c0_i32_0 : i32, i32, i32
  }
  func.func @transform_1(%arg0: i32, %arg1: i32, %arg2: memref<1xf32, #tpu.memory_space<smem>>) -> (i32, i32) {
    %c0_i32 = arith.constant 0 : i32
    %c0_i32_0 = arith.constant 0 : i32
    %c0_i32_1 = arith.constant 0 : i32
    return %c0_i32, %c0_i32_0 : i32, i32
  }
  func.func @transform_2(%arg0: i32, %arg1: i32, %arg2: memref<1xf32, #tpu.memory_space<smem>>) -> (i32, i32) {
    %c0_i32 = arith.constant 0 : i32
    %c0_i32_0 = arith.constant 0 : i32
    %c0_i32_1 = arith.constant 0 : i32
    return %c0_i32, %c0_i32_0 : i32, i32
  }
  func.func @transform_3(%arg0: i32, %arg1: i32, %arg2: memref<1xf32, #tpu.memory_space<smem>>) -> (i32, i32) {
    %c0_i32 = arith.constant 0 : i32
    %c0_i32_0 = arith.constant 0 : i32
    %c0_i32_1 = arith.constant 0 : i32
    return %c0_i32, %c0_i32_0 : i32, i32
  }
  func.func @transform_4(%arg0: i32, %arg1: i32, %arg2: memref<1xf32, #tpu.memory_space<smem>>) -> (i32, i32) {
    %c0_i32 = arith.constant 0 : i32
    %c0_i32_0 = arith.constant 0 : i32
    %c0_i32_1 = arith.constant 0 : i32
    return %c0_i32, %c0_i32_0 : i32, i32
  }
  func.func @transform_5(%arg0: i32, %arg1: i32, %arg2: memref<1xf32, #tpu.memory_space<smem>>) -> (i32, i32, i32, i32) {
    %c0_i32 = arith.constant 0 : i32
    %c0_i32_0 = arith.constant 0 : i32
    %c0_i32_1 = arith.constant 0 : i32
    return %arg1, %arg0, %c0_i32, %c0_i32_0 : i32, i32, i32, i32
  }
  func.func @transform_6(%arg0: i32, %arg1: i32, %arg2: memref<1xf32, #tpu.memory_space<smem>>) -> (i32, i32, i32) {
    %c0_i32 = arith.constant 0 : i32
    %c0_i32_0 = arith.constant 0 : i32
    %c0_i32_1 = arith.constant 0 : i32
    return %arg0, %c0_i32, %c0_i32_0 : i32, i32, i32
  }
}

</mosaic_0001>

<bundles_post_ra>
// kernel: tpu_custom_call.1
= control target key start
LH: loop header
LB: loop body
LE: loop exit
PB: predicated region body
PF: predicated region fallthrough
CT: control target
= control target key end

     0   :  { %14 = vsyncpa [#allocation6], 0  ;;  %s29713_s0 = inlined_call_operand.<no memory space> [shape: f32[1], index: 0, kind: input, shape index: {}]   ;;  %s29714_s1 = inlined_call_operand.hbm [shape: f32[2,32,128], index: 1, kind: input, shape index: {}]   ;;  %s29715_s2 = inlined_call_operand.hbm [shape: f32[32,32], index: 2, kind: input, shape index: {}]   ;;  %s29716_s3 = inlined_call_operand.hbm [shape: f32[128,128], index: 3, kind: input, shape index: {}]   ;;  %s29717_s4 = inlined_call_operand.hbm [shape: f32[32,32], index: 4, kind: input, shape index: {}]   ;;  %s29718_s5 = inlined_call_operand.hbm [shape: f32[128,128], index: 5, kind: input, shape index: {}]   ;;  %s29719_s6 = inlined_call_operand.hbm [shape: f32[1,2,32,128], index: 6, kind: output, shape index: {0}]   ;;  %s29720_s7 = inlined_call_operand.hbm [shape: f32[2,32,128], index: 7, kind: output, shape index: {1}]  }
   0x1   :  { %15 = vsyncpa [#allocation9], 0 }
   0x2   :  { %16 = vsyncpa [#allocation12], 0 }
   0x3   :  { %17 = vsyncpa [#allocation7], 0 }
   0x4   :  { %18 = vsyncpa [#allocation16], 0  ;;  %s26271_s24 = smov [#allocation8]   ;;  %s26272_s26 = smov [#allocation11]  }
   0x5   :  { %s36_s25 = sshll.u32 %s26271_s24, 4  ;;  %s60_s27 = sshll.u32 %s26272_s26, 4  ;;  %s37_s25 = int_to_ptr.vmem [resolvable:$true] %s36_s25  ;;  %s26320_s27 = int_to_ptr.vmem [resolvable:$true] %s60_s27 }
   0x6   :  { %s26107_s30 = scalar_lea.hbm %s29715_s2, 512 }
   0x7   :  { %p26108_p0 = scmp.ne.s32.totalorder %s29715_s2, %s26107_s30  ;;  %p26111_p1 = scmp.lt.u32.totalorder %s26107_s30, %s29715_s2 }
   0x9   :  { %p26113_p2 = pnand %p26111_p1, %p26108_p0 }
   0xb   :  { %26116 = shalt.err (!%p26113_p2)
}
   0xc   :  { %s26117_s12 = scalar_lea.vmem %s37_s25, 512  ;;  %p26122_p4 = scmp.lt.s32.totalorder %s37_s25, %s37_s25 }
   0xd   :  { %p26118_p3 = scmp.ne.s32.totalorder %s37_s25, %s26117_s12  ;;  %p26123_p5 = scmp.lt.s32.totalorder %s26117_s12, %s26117_s12 }
   0xf   :  { %p26124_p6 = por %p26123_p5, %p26122_p4 }
  0x11   :  { %p26125_p7 = pnand %p26124_p6, %p26118_p3 }
  0x13   :  { %26128 = shalt.err (!%p26125_p7)
}
  0x14   :  { %s26273_s13 = smov 128   ;;  %s26274_s14 = smov 8  }
  0x15   :  { %42 = dma.hbm_to_vmem [thread:$0]  %s29715_s2, 512, %s37_s25, [#allocation9], %s26273_s13, %s26273_s13, %s26274_s14  }
  0x16   :  { %s26129_s19 = scalar_lea.hbm %s29717_s4, 512 }
  0x17   :  { %p26130_p8 = scmp.ne.s32.totalorder %s29717_s4, %s26129_s19  ;;  %p26133_p9 = scmp.lt.u32.totalorder %s26129_s19, %s29717_s4 }
  0x19   :  { %p26135_p10 = pnand %p26133_p9, %p26130_p8 }
  0x1b   :  { %26138 = shalt.err (!%p26135_p10)
}
  0x1c   :  { %s26139_s24 = scalar_lea.vmem %s26320_s27, 512  ;;  %p26144_p12 = scmp.lt.s32.totalorder %s26320_s27, %s26320_s27 }
  0x1d   :  { %p26140_p11 = scmp.ne.s32.totalorder %s26320_s27, %s26139_s24  ;;  %p26145_p13 = scmp.lt.s32.totalorder %s26139_s24, %s26139_s24 }
  0x1f   :  { %p26146_p0 = por %p26145_p13, %p26144_p12 }
  0x21   :  { %p26147_p1 = pnand %p26146_p0, %p26140_p11 }
  0x23   :  { %26150 = shalt.err (!%p26147_p1)
}
  0x24   :  { %66 = dma.hbm_to_vmem [thread:$0]  %s29717_s4, 512, %s26320_s27, [#allocation12], %s26273_s13, %s26273_s13, %s26274_s14  }
  0x25   :  { %s26275_s26 = smov [#allocation5]   ;;  %s26276_s29 = smov [#allocation10]  }
  0x26   :  { %s24_s28 = sshll.u32 %s26275_s26, 4  ;;  %s48_s30 = sshll.u32 %s26276_s29, 4  ;;  %s25_s28 = int_to_ptr.vmem [resolvable:$true] %s24_s28  ;;  %s26357_s30 = int_to_ptr.vmem [resolvable:$true] %s48_s30 }
  0x27   :  { %s26151_s10 = scalar_lea.hbm %s29714_s1, 1024 }
  0x28   :  { %p26152_p2 = scmp.ne.s32.totalorder %s29714_s1, %s26151_s10  ;;  %p26155_p3 = scmp.lt.u32.totalorder %s26151_s10, %s29714_s1 }
  0x2a   :  { %p26157_p4 = pnand %p26155_p3, %p26152_p2 }
  0x2c   :  { %26160 = shalt.err (!%p26157_p4)
}
  0x2d   :  { %s26161_s4 = scalar_lea.vmem %s25_s28, 1024  ;;  %p26166_p6 = scmp.lt.s32.totalorder %s25_s28, %s25_s28 }
  0x2e   :  { %p26162_p5 = scmp.ne.s32.totalorder %s25_s28, %s26161_s4  ;;  %p26167_p7 = scmp.lt.s32.totalorder %s26161_s4, %s26161_s4 }
  0x30   :  { %p26168_p8 = por %p26167_p7, %p26166_p6 }
  0x32   :  { %p26169_p9 = pnand %p26168_p8, %p26162_p5 }
  0x34   :  { %26172 = shalt.err (!%p26169_p9)
}
  0x35   :  { %30 = dma.hbm_to_vmem [thread:$0]  %s29714_s1, 1024, %s25_s28, [#allocation6], %s26273_s13, %s26273_s13, %s26274_s14  }
  0x36   :  { %s26173_s20 = scalar_lea.hbm %s29716_s3, 2048 }
  0x37   :  { %p26174_p10 = scmp.ne.s32.totalorder %s29716_s3, %s26173_s20  ;;  %p26177_p11 = scmp.lt.u32.totalorder %s26173_s20, %s29716_s3 }
  0x39   :  { %p26179_p12 = pnand %p26177_p11, %p26174_p10 }
  0x3b   :  { %26182 = shalt.err (!%p26179_p12)
}
  0x3c   :  { %s26183_s2 = scalar_lea.vmem %s26357_s30, 2048  ;;  %p26188_p0 = scmp.lt.s32.totalorder %s26357_s30, %s26357_s30 }
  0x3d   :  { %p26184_p13 = scmp.ne.s32.totalorder %s26357_s30, %s26183_s2  ;;  %p26189_p1 = scmp.lt.s32.totalorder %s26183_s2, %s26183_s2 }
  0x3f   :  { %p26190_p2 = por %p26189_p1, %p26188_p0 }
  0x41   :  { %p26191_p3 = pnand %p26190_p2, %p26184_p13 }
  0x43   :  { %26194 = shalt.err (!%p26191_p3)
}
  0x44   :  { %54 = dma.hbm_to_vmem [thread:$0]  %s29716_s3, 2048, %s26357_s30, [#allocation9], %s26273_s13, %s26273_s13, %s26274_s14  }
  0x45   :  { %s26277_s26 = smov [#allocation13]   ;;  %s26195_s9 = scalar_lea.hbm %s29718_s5, 2048 }
  0x46   :  { %s72_s28 = sshll.u32 %s26277_s26, 4  ;;  %p26196_p4 = scmp.ne.s32.totalorder %s29718_s5, %s26195_s9  ;;  %s73_s28 = int_to_ptr.vmem [resolvable:$true] %s72_s28 }
  0x47   :  { %p26199_p5 = scmp.lt.u32.totalorder %s26195_s9, %s29718_s5 }
  0x49   :  { %p26201_p6 = pnand %p26199_p5, %p26196_p4 }
  0x4b   :  { %26204 = shalt.err (!%p26201_p6)
}
  0x4c   :  { %s26205_s16 = scalar_lea.vmem %s73_s28, 2048  ;;  %p26210_p8 = scmp.lt.s32.totalorder %s73_s28, %s73_s28 }
  0x4d   :  { %p26206_p7 = scmp.ne.s32.totalorder %s73_s28, %s26205_s16  ;;  %p26211_p9 = scmp.lt.s32.totalorder %s26205_s16, %s26205_s16 }
  0x4f   :  { %p26212_p10 = por %p26211_p9, %p26210_p8 }
  0x51   :  { %p26213_p11 = pnand %p26212_p10, %p26206_p7 }
  0x53   :  { %26216 = shalt.err (!%p26213_p11)
}
  0x54   :  { %78 = dma.hbm_to_vmem [thread:$0]  %s29718_s5, 2048, %s73_s28, [#allocation12], %s26273_s13, %s26273_s13, %s26274_s14  }
  0x55   :  { %26261 = dma.done.wait [#allocation6], 1024  }
  0x56   :  { %26262 = vsyncadd [#allocation6], 4294966272 }
  0x57   :  { %26263 = dma.done.wait [#allocation9], 2560  }
  0x58   :  { %26264 = vsyncadd [#allocation9], 4294964736 }
  0x59   :  { %26265 = dma.done.wait [#allocation12], 2560  }
  0x5a   :  { %26266 = vsyncadd [#allocation12], 4294964736  ;;  %vm163_vm0 = vcmask 261120   ;;  %v99_v0 = vld [vmem:[#allocation5] sm:$0xff]  ;;  %v100_v1 = vld [vmem:[#allocation5 + $0x8] sm:$0xff] }
  0x5b   :  { %v101_v2 = vld [vmem:[#allocation5 + $0x10] sm:$0xff]  ;;  %v177_v3 = vand.u32 4294901760, %v99_v0  ;;  %v180_v4 = vand.u32 4294901760, %v100_v1  ;;  %v102_v5 = vld [vmem:[#allocation5 + $0x18] sm:$0xff]  ;;  %v119_v7 = vld [vmem:[#allocation11] sm:$0xff] }
  0x5c   :  { %v183_v6 = vand.u32 4294901760, %v101_v2  ;;  %v120_v8 = vld [vmem:[#allocation11 + $0x8] sm:$0xff]  ;;  %v186_v9 = vand.u32 4294901760, %v102_v5  ;;  %v165_v10 = vsel %vm163_vm0, %v119_v7, 0  ;;  %v121_v12 = vld [vmem:[#allocation11 + $0x10] sm:$0xff]  ;;  %v122_v13 = vld [vmem:[#allocation11 + $0x18] sm:$0xff] }
  0x5d   :  { %v168_v11 = vsel %vm163_vm0, %v120_v8, 0  ;;  %v26411_v14 = vpack.c.bf16 %v180_v4, %v177_v3  ;;  %v26413_v15 = vand.u32 4294901760, %v165_v10  ;;  %v26417_v17 = vsub.f32 %v99_v0, %v177_v3  ;;  %v103_v38 = vld [vmem:[#allocation5 + $0x20] sm:$0xff]  ;;  %v104_v47 = vld [vmem:[#allocation5 + $0x28] sm:$0xff]  ;;  %v105_v52 = vld [vmem:[#allocation5 + $0x30] sm:$0xff] }
  0x5e   :  { %v26415_v16 = vand.u32 4294901760, %v168_v11  ;;  %v26419_v18 = vpack.c.bf16 %v186_v9, %v183_v6  ;;  %v26421_v19 = vsub.f32 %v100_v1, %v180_v4  ;;  %v171_v20 = vsel %vm163_vm0, %v121_v12, 0  ;;  %v106_v53 = vld [vmem:[#allocation5 + $0x38] sm:$0xff]  ;;  %s2354_s27 = smul.f32 0.083333336, %s29713_s0 }
  0x5f   :  { %30132 = vst [vmem:[#allocation22_spill] sm:$0xff] %v26413_v15  ;;  %v174_v21 = vsel %vm163_vm0, %v122_v13, 0  ;;  %23107 = vmatprep.subr.bf16.mxu0 %v26411_v14  ;;  %v26427_v22 = vsub.f32 %v165_v10, %v26413_v15  ;;  %v288_v24 = vand.u32 4294901760, %v26417_v17  ;;  %v26433_v25 = vand.u32 4294901760, %v171_v20  ;;  %s2355_s19 = smul.f32 0.16666667, %s29713_s0 }
  0x60   :  { %30133 = vst [vmem:[#allocation23_spill] sm:$0xff] %v26415_v16  ;;  %v26430_v23 = vsub.f32 %v168_v11, %v26415_v16  ;;  %23109 = vmatpush3.bf16.msra.mxu0 %v26411_v14  ;;  %v295_v26 = vand.u32 4294901760, %v26421_v19  ;;  %v26437_v27 = vand.u32 4294901760, %v174_v21  ;;  %v26439_v28 = vsub.f32 %v101_v2, %v183_v6  ;;  %s26278_s0 = smov [#allocation14]  }
  0x61   :  { %30134 = vst [vmem:[#allocation24_spill] sm:$0xff] %v26427_v22  ;;  %30136 = vst [vmem:[#allocation26_spill] sm:$0xff] %v26433_v25  ;;  %v26441_v29 = vsub.f32 %v102_v5, %v186_v9  ;;  %23111 = vmatprep.subr.bf16.mxu0 %v26419_v18  ;;  %v26445_v30 = vand.u32 4294901760, %v26427_v22  ;;  %v289_v32 = vsub.f32 %v26417_v17, %v288_v24  ;;  %19770 = vmatprep.mubr.f32.mxu1 %v26427_v22  ;;  %s17700_s20 = sshll.u32 %s26278_s0, 4  ;;  %s17701_s20 = int_to_ptr.vmem [resolvable:$true] %s17700_s20 }
  0x62   :  { %30135 = vst [vmem:[#allocation25_spill] sm:$0xff] %v26430_v23  ;;  %30137 = vst [vmem:[#allocation27_spill] sm:$0xff] %v26437_v27  ;;  %v26448_v31 = vand.u32 4294901760, %v26430_v23  ;;  %v26454_v33 = vsub.f32 %v171_v20, %v26433_v25  ;;  %v296_v34 = vsub.f32 %v26421_v19, %v295_v26  ;;  %v26461_v35 = vsub.f32 %v174_v21, %v26437_v27  ;;  %s26217_s21 = scalar_lea.vmem %s17701_s20, 1024  ;;  %p26222_p13 = scmp.lt.s32.totalorder %s17701_s20, %s17701_s20 }
  0x63   :  { %30138 = vst [vmem:[#allocation28_spill] sm:$0xff] %v26445_v30  ;;  %v302_v36 = vand.u32 4294901760, %v26439_v28  ;;  %v309_v37 = vand.u32 4294901760, %v26441_v29  ;;  %v248_v39 = vsub.f32 %v26427_v22, %v26445_v30  ;;  %v290_v41 = vand.u32 4294901760, %v289_v32  ;;  %p26218_p12 = scmp.ne.s32.totalorder %s17701_s20, %s26217_s21  ;;  %p26223_p0 = scmp.lt.s32.totalorder %s26217_s21, %s26217_s21 }
  0x64   :  { %30139 = vst [vmem:[#allocation29_spill] sm:$0xff] %v26448_v31  ;;  %30140 = vst [vmem:[#allocation30_spill] sm:$0xff] %v26454_v33  ;;  %v258_v40 = vsub.f32 %v26430_v23, %v26448_v31  ;;  %v26470_v42 = vand.u32 4294901760, %v26454_v33  ;;  %23113 = vmatpush3.bf16.msra.mxu0 %v26419_v18  ;;  %v297_v43 = vand.u32 4294901760, %v296_v34  ;;  %v26474_v44 = vand.u32 4294901760, %v26461_v35 }
  0x65   :  { %30141 = vst [vmem:[#allocation31_spill] sm:$0xff] %v26461_v35  ;;  %v303_v45 = vsub.f32 %v26439_v28, %v302_v36  ;;  %v310_v46 = vsub.f32 %v26441_v29, %v309_v37  ;;  %v26482_v48 = vand.u32 4294901760, %v248_v39  ;;  %v791_v51 = vand.u32 4294901760, %v103_v38  ;;  %p26224_p1 = por %p26223_p0, %p26222_p13 }
  0x66   :  { %30142 = vst [vmem:[#allocation32_spill] sm:$0xff] %v26470_v42  ;;  %30143 = vst [vmem:[#allocation33_spill] sm:$0xff] %v26474_v44  ;;  %v26484_v49 = vand.u32 4294901760, %v258_v40  ;;  %v268_v50 = vsub.f32 %v26454_v33, %v26470_v42  ;;  %v23114_v54 = vpack.c.bf16 %v297_v43, %v290_v41  ;;  %v278_v55 = vsub.f32 %v26461_v35, %v26474_v44  ;;  %v26590_v43 = vld [vmem:[#allocation13 + $0x10] sm:$0xff] }
  0x67   :  { %30144 = vst [vmem:[#allocation34_spill] sm:$0xff] %v26482_v48  ;;  %v304_v56 = vand.u32 4294901760, %v303_v45  ;;  %v311_v57 = vand.u32 4294901760, %v310_v46  ;;  %19658 = vmatprep.mubr.f32.mxu0 %v26482_v48  ;;  %v794_v59 = vand.u32 4294901760, %v104_v47  ;;  %v26493_v60 = vsub.f32 %v103_v38, %v791_v51  ;;  %v140_v38 = vld [vmem:[#allocation13 + $0x8] sm:$0xff]  ;;  %v26592_v45 = vld [vmem:[#allocation13 + $0x18] sm:$0xff]  ;;  %p26225_p2 = pnand %p26224_p1, %p26218_p12 }
  0x68   :  { %30145 = vst [vmem:[#allocation35_spill] sm:$0xff] %v26484_v49  ;;  %v26491_v58 = vand.u32 4294901760, %v268_v50  ;;  %19659 = vmatmul.mubr.f32.vlgmr.msra.gmra.mrb[0].mxu0 %v26484_v49  ;;  %23115 = vmatprep.subr.bf16.mxu0 %v23114_v54  ;;  %v26496_v61 = vand.u32 4294901760, %v278_v55  ;;  %v797_v63 = vand.u32 4294901760, %v105_v52  ;;  %v800_v0 = vand.u32 4294901760, %v106_v53 }
  0x69   :  { %v23118_v62 = vpack.c.bf16 %v311_v57, %v304_v56  ;;  %23117 = vmatpush3.bf16.msra.mxu0 %v23114_v54  ;;  %v26499_v1 = vsub.f32 %v104_v47, %v794_v59  ;;  %v23122_v5 = vpack.c.bf16 %v26421_v19, %v26417_v17  ;;  %v23126_v7 = vpack.c.bf16 %v26441_v29, %v26439_v28  ;;  %v26615_v56 = vld [vmem:[#allocation13 + $0x30] sm:$0xff]  ;;  %v26617_v57 = vld [vmem:[#allocation13 + $0x38] sm:$0xff] }
  0x6a   :  { %30146 = vst [vmem:[#allocation36_spill] sm:$0xff] %v26491_v58  ;;  %30147 = vst [vmem:[#allocation37_spill] sm:$0xff] %v26496_v61  ;;  %19661 = vmatprep.mubr.f32.mxu0 %v26491_v58  ;;  %v26501_v2 = vsub.f32 %v105_v52, %v797_v63  ;;  %v26503_v3 = vsub.f32 %v106_v53, %v800_v0  ;;  %v26515_v8 = vpack.c.bf16 %v794_v59, %v791_v51  ;;  %v26600_v51 = vld [vmem:[#allocation13 + $0x20] sm:$0xff]  ;;  %v26602_v52 = vld [vmem:[#allocation13 + $0x28] sm:$0xff] }
  0x6b   :  { %23119 = vmatprep.subr.bf16.mxu0 %v23118_v62  ;;  %v23170_v4 = vpack.c.bf16 %v26499_v1, %v26493_v60  ;;  %v26520_v9 = vpack.c.bf16 %v800_v0, %v797_v63  ;;  %v902_v10 = vand.u32 4294901760, %v26493_v60  ;;  %v909_v11 = vand.u32 4294901760, %v26499_v1  ;;  %v26631_v63 = vld [vmem:[#allocation13 + $0x40] sm:$0xff]  ;;  %v26633_v0 = vld [vmem:[#allocation13 + $0x48] sm:$0xff] }
  0x6c   :  { %19662 = vmatmul.mubr.f32.gmra.mrb[2].mxu0 %v26496_v61  ;;  %v23174_v6 = vpack.c.bf16 %v26503_v3, %v26501_v2  ;;  %v916_v13 = vand.u32 4294901760, %v26501_v2  ;;  %v923_v20 = vand.u32 4294901760, %v26503_v3  ;;  %v23138_v21 = vpack.c.bf16 %v295_v26, %v288_v24 }
  0x6d   :  { %23121 = vmatpush3.bf16.msra.mxu0 %v23118_v62  ;;  %23171 = vmatprep.subr.bf16.mxu1 %v23170_v4  ;;  %v23186_v12 = vpack.c.bf16 %v909_v11, %v902_v10  ;;  %v23142_v17 = vpack.c.bf16 %v309_v37, %v302_v36  ;;  %v903_v19 = vsub.f32 %v26493_v60, %v902_v10  ;;  %v139_v37 = vld [vmem:[#allocation13] sm:$0xff]  ;;  %v1408_v41 = vand.u32 4294901760, %v140_v38 }
  0x6e   :  { %23173 = vmatpush3.bf16.msra.mxu1 %v23170_v4  ;;  %19672 = vmatprep.mubr.f32.mxu0 %v26413_v15  ;;  %v23190_v32 = vpack.c.bf16 %v923_v20, %v916_v13  ;;  %v910_v24 = vsub.f32 %v26499_v1, %v909_v11  ;;  %v917_v28 = vsub.f32 %v26501_v2, %v916_v13  ;;  %v1405_v40 = vand.u32 4294901760, %v139_v37  ;;  %v151_v10 = vld [vmem:[#allocation13 + $0x60] sm:$0xff]  ;;  %v152_v11 = vld [vmem:[#allocation13 + $0x68] sm:$0xff] }
  0x6f   :  { %23123 = vmatprep.subr.bf16.mxu0 %v23122_v5  ;;  %23175 = vmatprep.subr.bf16.mxu1 %v23174_v6  ;;  %v924_v29 = vsub.f32 %v26503_v3, %v923_v20  ;;  %v1411_v47 = vand.u32 4294901760, %v26590_v43  ;;  %v1414_v50 = vand.u32 4294901760, %v26592_v45  ;;  %v1417_v54 = vand.u32 4294901760, %v26600_v51 }
  0x70   :  { %19673 = vmatmul.mubr.f32.vlgmr.msra.gmra.mrb[0].mxu0 %v26415_v16  ;;  %v911_v26 = vand.u32 4294901760, %v910_v24  ;;  %v918_v34 = vand.u32 4294901760, %v917_v28  ;;  %v26596_v46 = vpack.c.bf16 %v1408_v41, %v1405_v40  ;;  %v1420_v55 = vand.u32 4294901760, %v26602_v52 }
  0x71   :  { %23125 = vmatpush3.bf16.msra.mxu0 %v23122_v5  ;;  %19675 = vmatprep.mubr.f32.mxu0 %v26433_v25  ;;  %v925_v36 = vand.u32 4294901760, %v924_v29  ;;  %v26611_v53 = vpack.c.bf16 %v1414_v50, %v1411_v47  ;;  %v1423_v60 = vand.u32 4294901760, %v26615_v56  ;;  %v1426_v62 = vand.u32 4294901760, %v26617_v57  ;;  %v149_v5 = vld [vmem:[#allocation13 + $0x50] sm:$0xff] }
  0x72   :  { %23177 = vmatpush3.bf16.msra.mxu1 %v23174_v6  ;;  %23127 = vmatprep.subr.bf16.mxu0 %v23126_v7  ;;  %30148 = vst [vmem:[#allocation38_spill] sm:$0xff] %v26596_v46  ;;  %v26627_v59 = vpack.c.bf16 %v1420_v55, %v1417_v54  ;;  %v29725_v2 = vand.u32 4294901760, %v26631_v63  ;;  %v29724_v3 = vand.u32 4294901760, %v26633_v0  ;;  %v150_v6 = vld [vmem:[#allocation13 + $0x58] sm:$0xff]  ;;  %v1444_v13 = vand.u32 4294901760, %v152_v11 }
  0x73   :  { %23179 = vmatprep.subr.bf16.mxu1 %v26515_v8  ;;  %v23166_v39 = vpack.c.bf16 %v925_v36, %v918_v34  ;;  %30149 = vst [vmem:[#allocation39_spill] sm:$0xff] %v26611_v53  ;;  %v26642_v1 = vpack.c.bf16 %v1426_v62, %v1423_v60 }
  0x74   :  { %19676 = vmatmul.mubr.f32.gmra.mrb[2].mxu0 %v26437_v27  ;;  %30150 = vst [vmem:[#allocation40_spill] sm:$0xff] %v26627_v59  ;;  %v26652_v4 = vpack.c.bf16 %v29724_v3, %v29725_v2 }
  0x75   :  { %23129 = vmatpush3.bf16.msra.mxu0 %v23126_v7  ;;  %19771 = vmatmul.mubr.f32.vlgmr.msra.gmra.mrb[0].mxu1 %v26430_v23  ;;  %30151 = vst [vmem:[#allocation41_spill] sm:$0xff] %v26642_v1  ;;  %v1435_v7 = vand.u32 4294901760, %v149_v5 }
  0x76   :  { %23181 = vmatpush3.bf16.msra.mxu1 %v26515_v8  ;;  %19686 = vmatprep.mubr.f32.mxu0 %v26427_v22  ;;  %30152 = vst [vmem:[#allocation42_spill] sm:$0xff] %v26652_v4 }
  0x77   :  { %23131 = vmatprep.subr.bf16.mxu0 %v26411_v14  ;;  %19773 = vmatprep.mubr.f32.mxu1 %v26454_v33 }
  0x78   :  { %19687 = vmatmul.mubr.f32.vlgmr.msra.gmra.mrb[0].mxu0 %v26430_v23  ;;  %23183 = vmatprep.subr.bf16.mxu1 %v26520_v9 }
  0x79   :  { %23133 = vmatpush3.bf16.msra.mxu0 %v26411_v14  ;;  %19774 = vmatmul.mubr.f32.gmra.mrb[2].mxu1 %v26461_v35 }
  0x7a   :  { %23185 = vmatpush3.bf16.msra.mxu1 %v26520_v9  ;;  %19689 = vmatprep.mubr.f32.mxu0 %v26454_v33 }
  0x7b   :  { %23135 = vmatprep.subr.bf16.mxu0 %v26419_v18  ;;  %19784 = vmatprep.mubr.f32.mxu1 %v26445_v30 }
  0x7c   :  { %19690 = vmatmul.mubr.f32.gmra.mrb[2].mxu0 %v26461_v35  ;;  %23187 = vmatprep.subr.bf16.mxu1 %v23186_v12 }
  0x7d   :  { %23137 = vmatpush3.bf16.msra.mxu0 %v26419_v18  ;;  %19785 = vmatmul.mubr.f32.vlgmr.msra.gmra.mrb[0].mxu1 %v26448_v31 }
  0x7e   :  { %23189 = vmatpush3.bf16.msra.mxu1 %v23186_v12  ;;  %19700 = vmatprep.mubr.f32.mxu0 %v26445_v30  ;;  %v1441_v12 = vand.u32 4294901760, %v151_v10 }
  0x7f   :  { %23139 = vmatprep.subr.bf16.mxu0 %v23138_v21  ;;  %19787 = vmatprep.mubr.f32.mxu1 %v26470_v42 }
  0x80   :  { %19701 = vmatmul.mubr.f32.vlgmr.msra.gmra.mrb[0].mxu0 %v26448_v31  ;;  %23191 = vmatprep.subr.bf16.mxu1 %v23190_v32  ;;  %v26661_v20 = vpack.c.bf16 %v1444_v13, %v1441_v12 }
  0x81   :  { %23141 = vmatpush3.bf16.msra.mxu0 %v23138_v21  ;;  %19788 = vmatmul.mubr.f32.gmra.mrb[2].mxu1 %v26474_v44  ;;  %v26663_v21 = vsub.f32 %v139_v37, %v1405_v40 }
  0x82   :  { %23193 = vmatpush3.bf16.msra.mxu1 %v23190_v32  ;;  %19703 = vmatprep.mubr.f32.mxu0 %v26470_v42  ;;  %30154 = vst [vmem:[#allocation44_spill] sm:$0xff] %v26661_v20  ;;  %v26665_v32 = vsub.f32 %v140_v38, %v1408_v41 }
  0x83   :  { %23143 = vmatprep.subr.bf16.mxu0 %v23142_v17  ;;  %19798 = vmatprep.mubr.f32.mxu1 %v26413_v15 }
  0x84   :  { %19704 = vmatmul.mubr.f32.gmra.mrb[2].mxu0 %v26474_v44  ;;  %23195 = vmatprep.subr.bf16.mxu1 %v26515_v8  ;;  %v29722_v28 = vand.u32 4294901760, %v26665_v32 }
  0x85   :  { %23145 = vmatpush3.bf16.msra.mxu0 %v23142_v17  ;;  %19799 = vmatmul.mubr.f32.vlgmr.msra.gmra.mrb[0].mxu1 %v26415_v16  ;;  %v153_v17 = vld [vmem:[#allocation13 + $0x70] sm:$0xff] }
  0x86   :  { %23197 = vmatpush3.bf16.msra.mxu1 %v26515_v8  ;;  %19714 = vmatprep.mubr.f32.mxu0 %v26413_v15  ;;  %v1447_v24 = vand.u32 4294901760, %v153_v17  ;;  %v1576_v34 = vsub.f32 %v26665_v32, %v29722_v28 }
  0x87   :  { %23147 = vmatprep.subr.bf16.mxu0 %v26411_v14  ;;  %19801 = vmatprep.mubr.f32.mxu1 %v26433_v25 }
  0x88   :  { %19715 = vmatmul.mubr.f32.vlgmr.msra.gmra.mrb[0].mxu0 %v26415_v16  ;;  %23199 = vmatprep.subr.bf16.mxu1 %v26520_v9  ;;  %v1577_v37 = vand.u32 4294901760, %v1576_v34  ;;  %v26696_v34 = vsub.f32 %v151_v10, %v1441_v12  ;;  %v26707_v3 = vsub.f32 %v153_v17, %v1447_v24 }
  0x89   :  { %23149 = vmatpush3.bf16.msra.mxu0 %v26411_v14  ;;  %19802 = vmatmul.mubr.f32.gmra.mrb[2].mxu1 %v26437_v27  ;;  %v904_v14 = vand.u32 4294901760, %v903_v19  ;;  %v154_v19 = vld [vmem:[#allocation13 + $0x78] sm:$0xff] }
  0x8a   :  { %23201 = vmatpush3.bf16.msra.mxu1 %v26520_v9  ;;  %19717 = vmatprep.mubr.f32.mxu0 %v26433_v25  ;;  %v29727_v12 = vand.u32 4294901760, %v26707_v3 }
  0x8b   :  { %23151 = vmatprep.subr.bf16.mxu0 %v26419_v18  ;;  %19812 = vmatprep.mubr.f32.mxu1 %v26413_v15 }
  0x8c   :  { %19718 = vmatmul.mubr.f32.gmra.mrb[2].mxu0 %v26437_v27 }
  0x8d   :  { %23153 = vmatpush3.bf16.msra.mxu0 %v26419_v18  ;;  %19813 = vmatmul.mubr.f32.vlgmr.msra.gmra.mrb[0].mxu1 %v26415_v16  ;;  %v23162_v18 = vpack.c.bf16 %v911_v26, %v904_v14  ;;  %v1450_v14 = vand.u32 4294901760, %v154_v19  ;;  %v29721_v26 = vand.u32 4294901760, %v26663_v21 }
  0x8e   :  { %19728 = vmatprep.mubr.f32.mxu0 %v26413_v15  ;;  %23155 = vmatprep.subr.bf16.mxu0 %v26515_v8 }
  0x8f   :  { %19815 = vmatprep.mubr.f32.mxu1 %v26433_v25  ;;  %v26671_v29 = vpack.c.bf16 %v1450_v14, %v1447_v24  ;;  %v26709_v2 = vsub.f32 %v154_v19, %v1450_v14 }
  0x90   :  { %19729 = vmatmul.mubr.f32.vlgmr.msra.gmra.mrb[0].mxu0 %v26415_v16 }
  0x91   :  { %23157 = vmatpush3.bf16.msra.mxu0 %v26515_v8  ;;  %19816 = vmatmul.mubr.f32.gmra.mrb[2].mxu1 %v26437_v27  ;;  %v1438_v8 = vand.u32 4294901760, %v150_v6  ;;  %30155 = vst [vmem:[#allocation45_spill] sm:$0xff] %v26671_v29 }
  0x92   :  { %19731 = vmatprep.mubr.f32.mxu0 %v26433_v25  ;;  %23159 = vmatprep.subr.bf16.mxu0 %v26520_v9 }
  0x93   :  { %v26686_v40 = vsub.f32 %v150_v6, %v1438_v8  ;;  %v29729_v6 = vand.u32 4294901760, %v26696_v34 }
  0x94   :  { %19732 = vmatmul.mubr.f32.gmra.mrb[2].mxu0 %v26437_v27 }
  0x95   :  { %23161 = vmatpush3.bf16.msra.mxu0 %v26520_v9  ;;  %19742 = vmatprep.mubr.f32.mxu0 %v26482_v48  ;;  %v26657_v9 = vpack.c.bf16 %v1438_v8, %v1435_v7 }
  0x96   :  { %23163 = vmatprep.subr.bf16.mxu0 %v23162_v18 }
  0x97   :  { %30153 = vst [vmem:[#allocation43_spill] sm:$0xff] %v26657_v9 }
  0x98   :  { %19743 = vmatmul.mubr.f32.vlgmr.msra.gmra.mrb[4].mxu0 %v26484_v49 }
  0x99   :  { %23165 = vmatpush3.bf16.msra.mxu0 %v23162_v18  ;;  %19745 = vmatprep.mubr.f32.mxu0 %v26491_v58  ;;  %v1569_v18 = vsub.f32 %v26663_v21, %v29721_v26  ;;  %v29730_v26 = vand.u32 4294901760, %v26686_v40 }
  0x9a   :  { %23167 = vmatprep.subr.bf16.mxu0 %v23166_v39 }
  0x9b   :  { %v1570_v36 = vand.u32 4294901760, %v1569_v18  ;;  %v1646_v18 = vsub.f32 %v26686_v40, %v29730_v26 }
  0x9c   :  { %19746 = vmatmul.mubr.f32.gmra.mrb[6].mxu0 %v26496_v61 }
  0x9d   :  { %23169 = vmatpush3.bf16.msra.mxu0 %v23166_v39  ;;  %19756 = vmatprep.mubr.f32.mxu0 %v26413_v15  ;;  %v26681_v38 = vpack.c.bf16 %v1577_v37, %v1570_v36  ;;  %v26684_v39 = vsub.f32 %v149_v5, %v1435_v7  ;;  %v26698_v36 = vsub.f32 %v152_v11, %v1444_v13  ;;  %v1647_v7 = vand.u32 4294901760, %v1646_v18 }
  0x9e   :  { %23203 = vmatprep.subr.bf16.mxu0 %v26596_v46  ;;  %v29726_v13 = vand.u32 4294901760, %v26709_v2  ;;  %v1667_v18 = vsub.f32 %v26707_v3, %v29727_v12 }
  0x9f   :  { %30156 = vst [vmem:[#allocation46_spill] sm:$0xff] %v26681_v38  ;;  %v29723_v41 = vand.u32 4294901760, %v26684_v39  ;;  %v29728_v8 = vand.u32 4294901760, %v26698_v36 }
  0xa0   :  { %19757 = vmatmul.mubr.f32.vlgmr.msra.gmra.mrb[4].mxu0 %v26415_v16  ;;  %v1674_v17 = vsub.f32 %v26709_v2, %v29726_v13  ;;  %v1668_v24 = vand.u32 4294901760, %v1667_v18  ;;  %v26750_v18 = vsub.f32 %v26592_v45, %v1414_v50  ;;  %v26757_v13 = vsub.f32 %v26600_v51, %v1417_v54 }
  0xa1   :  { %19759 = vmatprep.mubr.f32.mxu0 %v26433_v25  ;;  %23205 = vmatpush3.bf16.msra.mxu0 %v26596_v46  ;;  %v1639_v28 = vsub.f32 %v26684_v39, %v29723_v41  ;;  %v1653_v41 = vsub.f32 %v26696_v34, %v29729_v6  ;;  %v1660_v10 = vsub.f32 %v26698_v36, %v29728_v8 }
  0xa2   :  { %23207 = vmatprep.subr.bf16.mxu0 %v26611_v53  ;;  %v1675_v14 = vand.u32 4294901760, %v1674_v17 }
  0xa3   :  { %v1640_v5 = vand.u32 4294901760, %v1639_v28  ;;  %v1654_v11 = vand.u32 4294901760, %v1653_v41  ;;  %v1661_v28 = vand.u32 4294901760, %v1660_v10  ;;  %v26728_v41 = vpack.c.bf16 %v26665_v32, %v26663_v21 }
  0xa4   :  { %19760 = vmatmul.mubr.f32.gmra.mrb[6].mxu0 %v26437_v27  ;;  %v26736_v10 = vpack.c.bf16 %v26698_v36, %v26696_v34 }
  0xa5   :  { %23209 = vmatpush3.bf16.msra.mxu0 %v26611_v53  ;;  %v26702_v37 = vpack.c.bf16 %v1647_v7, %v1640_v5  ;;  %v26722_v19 = vpack.c.bf16 %v1661_v28, %v1654_v11  ;;  %v26724_v5 = vpack.c.bf16 %v1675_v14, %v1668_v24  ;;  %30160 = vst [vmem:[#allocation50_spill] sm:$0xff] %v26728_v41  ;;  %v29732_v24 = vand.u32 4294901760, %v26750_v18 }
  0xa6   :  { %23211 = vmatprep.subr.bf16.mxu0 %v26627_v59  ;;  %v26732_v7 = vpack.c.bf16 %v26686_v40, %v26684_v39  ;;  %30162 = vst [vmem:[#allocation52_spill] sm:$0xff] %v26736_v10  ;;  %v26740_v11 = vpack.c.bf16 %v26709_v2, %v26707_v3  ;;  %v26745_v28 = vsub.f32 %v26590_v43, %v1411_v47 }
  0xa7   :  { %30157 = vst [vmem:[#allocation47_spill] sm:$0xff] %v26702_v37  ;;  %30158 = vst [vmem:[#allocation48_spill] sm:$0xff] %v26722_v19  ;;  %v26762_v43 = vsub.f32 %v26602_v52, %v1420_v55  ;;  %v1590_v50 = vsub.f32 %v26750_v18, %v29732_v24  ;;  %v26788_v24 = vsub.f32 %v26617_v57, %v1426_v62 }
  0xa8   :  { %30159 = vst [vmem:[#allocation49_spill] sm:$0xff] %v26724_v5  ;;  %30161 = vst [vmem:[#allocation51_spill] sm:$0xff] %v26732_v7  ;;  %v29731_v17 = vand.u32 4294901760, %v26745_v28 }
  0xa9   :  { %23213 = vmatpush3.bf16.msra.mxu0 %v26627_v59  ;;  %30163 = vst [vmem:[#allocation53_spill] sm:$0xff] %v26740_v11  ;;  %v1591_v31 = vand.u32 4294901760, %v1590_v50  ;;  %v30165_v57 = vand.u32 4294901760, %v26762_v43 }
  0xaa   :  { %23215 = vmatprep.subr.bf16.mxu0 %v26642_v1  ;;  %v1583_v45 = vsub.f32 %v26745_v28, %v29731_v17  ;;  %v26783_v17 = vsub.f32 %v26615_v56, %v1423_v60  ;;  %v30164_v60 = vand.u32 4294901760, %v26757_v13 }
  0xab   :  { %v1604_v62 = vsub.f32 %v26762_v43, %v30165_v57  ;;  %v30167_v57 = vand.u32 4294901760, %v26633_v0 }
  0xac   :  { %v1584_v42 = vand.u32 4294901760, %v1583_v45  ;;  %v1597_v33 = vsub.f32 %v26757_v13, %v30164_v60  ;;  %v30166_v60 = vand.u32 4294901760, %v26631_v63  ;;  %v30170_v61 = vand.u32 4294901760, %v26783_v17 }
  0xad   :  { %23217 = vmatpush3.bf16.msra.mxu0 %v26642_v1  ;;  %v1605_v15 = vand.u32 4294901760, %v1604_v62 }
  0xae   :  { %23219 = vmatprep.subr.bf16.mxu0 %v26652_v4  ;;  %v26819_v27 = vsub.f32 %v26631_v63, %v30166_v60  ;;  %v26833_v25 = vpack.c.bf16 %v1591_v31, %v1584_v42  ;;  %v1598_v16 = vand.u32 4294901760, %v1597_v33 }
  0xb0   :  { %30169 = vst [vmem:[#allocation54_spill] sm:$0xff] %v26833_v25  ;;  %v29766_v31 = vand.u32 4294901760, %v26819_v27 }
  0xb1   :  { %23221 = vmatpush3.bf16.msra.mxu0 %v26652_v4 }
  0xb2   :  { %23223 = vmatprep.subr.bf16.mxu0 %v26657_v9 }
  0xb5   :  { %23225 = vmatpush3.bf16.msra.mxu0 %v26657_v9 }
  0xb6   :  { %23227 = vmatprep.subr.bf16.mxu0 %v26661_v20 }
  0xb9   :  { %23229 = vmatpush3.bf16.msra.mxu0 %v26661_v20 }
  0xba   :  { %23231 = vmatprep.subr.bf16.mxu0 %v26671_v29 }
  0xbd   :  { %23233 = vmatpush3.bf16.msra.mxu0 %v26671_v29 }
  0xbe   :  { %23235 = vmatprep.subr.bf16.mxu0 %v26681_v38 }
 0x160   :  { %v19814_v14 = vpop.f32.mrb[0].mxu1 }
 0x161   :  { %v1382_v47 = vpop.f32.mrb[1].mxu1 }
 0x163   :  { %v19730_v12 = vpop.f32.mrb[0].mxu0 }
 0x164   :  { %v26770_v8 = vand.u32 4294901760, %v19730_v12  ;;  %v768_v6 = vpop.f32.mrb[1].mxu0  ;;  %v26772_v51 = vpop.f32.mrb[2].mxu1 }
 0x165   :  { %v26776_v55 = vand.u32 4294901760, %v768_v6  ;;  %v26778_v26 = vpop.f32.mrb[3].mxu1 }
 0x166   :  { %v26791_v44 = vsub.f32 %v19730_v12, %v26770_v8  ;;  %v26824_v12 = vsub.f32 %v26633_v0, %v30167_v57  ;;  %v1611_v0 = vsub.f32 %v26783_v17, %v30170_v61  ;;  %v26851_v61 = vpack.c.bf16 %v1605_v15, %v1598_v16 }
 0x167   :  { %v26794_v54 = vsub.f32 %v768_v6, %v26776_v55  ;;  %v19733_v52 = vpop.f32.mrb[2].mxu0 }
 0x168   :  { %v29751_v30 = vand.u32 4294901760, %v26791_v44  ;;  %v26797_v35 = vand.u32 4294901760, %v19733_v52  ;;  %v780_v56 = vpop.f32.mrb[3].mxu0  ;;  %v29767_v33 = vand.u32 4294901760, %v26824_v12  ;;  %30172 = vst [vmem:[#allocation55_spill] sm:$0xff] %v26851_v61 }
 0x169   :  { %v26806_v6 = vand.u32 4294901760, %v780_v56  ;;  %v30168_v50 = vand.u32 4294901760, %v26794_v54 }
 0x16a   :  { %v1498_v23 = vsub.f32 %v26791_v44, %v29751_v30  ;;  %v26814_v22 = vsub.f32 %v19733_v52, %v26797_v35 }
 0x16b   :  { %v26827_v45 = vsub.f32 %v780_v56, %v26806_v6  ;;  %v1488_v30 = vsub.f32 %v26794_v54, %v30168_v50  ;;  %v30171_v56 = vand.u32 4294901760, %v26788_v24 }
 0x16c   :  { %v29762_v52 = vand.u32 4294901760, %v26814_v22  ;;  %v1499_v58 = vand.u32 4294901760, %v1498_v23  ;;  %v1612_v23 = vand.u32 4294901760, %v1611_v0 }
 0x16d   :  { %v29763_v63 = vand.u32 4294901760, %v26827_v45  ;;  %v1489_v60 = vand.u32 4294901760, %v1488_v30  ;;  %v1618_v57 = vsub.f32 %v26788_v24, %v30171_v56 }
 0x16e   :  { %v1518_v50 = vsub.f32 %v26814_v22, %v29762_v52  ;;  %v1625_v52 = vsub.f32 %v26819_v27, %v29766_v31 }
 0x16f   :  { %19850 = vmatprep.mubr.f32.mxu0 %v1489_v60  ;;  %v1508_v30 = vsub.f32 %v26827_v45, %v29763_v63  ;;  %v1619_v56 = vand.u32 4294901760, %v1618_v57  ;;  %v1632_v60 = vsub.f32 %v26824_v12, %v29767_v33 }
 0x170   :  { %19851 = vmatmul.mubr.f32.vlgmr.msra.gmra.mrb[8].mxu0 %v1499_v58  ;;  %v1519_v62 = vand.u32 4294901760, %v1518_v50  ;;  %v1626_v57 = vand.u32 4294901760, %v1625_v52 }
 0x171   :  { %23237 = vmatpush3.bf16.msra.mxu0 %v26681_v38  ;;  %v1509_v42 = vand.u32 4294901760, %v1508_v30  ;;  %v26864_v0 = vpack.c.bf16 %v1619_v56, %v1612_v23  ;;  %v1633_v50 = vand.u32 4294901760, %v1632_v60 }
 0x172   :  { %23239 = vmatprep.subr.bf16.mxu0 %v26833_v25 }
 0x173   :  { %v19758_v63 = vpop.f32.mrb[4].mxu0  ;;  %19853 = vmatprep.mubr.f32.mxu0 %v1509_v42  ;;  %30173 = vst [vmem:[#allocation56_spill] sm:$0xff] %v26864_v0  ;;  %v26880_v52 = vpack.c.bf16 %v1633_v50, %v1626_v57 }
 0x174   :  { %v25410_v58 = vadd.f32 %v19814_v14, %v19758_v63  ;;  %v986_v38 = vpop.f32.mrb[5].mxu0  ;;  %19854 = vmatmul.mubr.f32.gmra.mrb[10].mxu0 %v1519_v62 }
 0x175   :  { %v25411_v15 = vadd.f32 %v1382_v47, %v986_v38  ;;  %23241 = vmatpush3.bf16.msra.mxu0 %v26833_v25  ;;  %30175 = vst [vmem:[#allocation58_spill] sm:$0xff] %v26880_v52  ;;  %v130_v25 = vld [vmem:[#allocation10 + $0x38] sm:$0xff] }
 0x176   :  { %v26861_v16 = vand.u32 4294901760, %v25410_v58  ;;  %23243 = vmatprep.subr.bf16.mxu0 %v26851_v61 }
 0x177   :  { %v26866_v30 = vand.u32 4294901760, %v25411_v15  ;;  %v19761_v31 = vpop.f32.mrb[6].mxu0 }
 0x178   :  { %v26869_v33 = vsub.f32 %v25410_v58, %v26861_v16  ;;  %v25412_v14 = vadd.f32 %v26772_v51, %v19761_v31  ;;  %v998_v63 = vpop.f32.mrb[7].mxu0 }
 0x179   :  { %v26873_v38 = vsub.f32 %v25411_v15, %v26866_v30  ;;  %v25413_v47 = vadd.f32 %v26778_v26, %v998_v63  ;;  %23245 = vmatpush3.bf16.msra.mxu0 %v26851_v61  ;;  %v129_v61 = vld [vmem:[#allocation10 + $0x30] sm:$0xff] }
 0x17a   :  { %v26877_v42 = vand.u32 4294901760, %v25412_v14  ;;  %23247 = vmatprep.subr.bf16.mxu0 %v26864_v0  ;;  %v29768_v23 = vand.u32 4294901760, %v26869_v33 }
 0x17b   :  { %v26883_v62 = vand.u32 4294901760, %v25413_v47  ;;  %v29771_v51 = vand.u32 4294901760, %v26873_v38 }
 0x17c   :  { %30174 = vst [vmem:[#allocation57_spill] sm:$0xff] %v26877_v42  ;;  %v26887_v31 = vsub.f32 %v25412_v14, %v26877_v42  ;;  %v1538_v26 = vsub.f32 %v26869_v33, %v29768_v23 }
 0x17d   :  { %30176 = vst [vmem:[#allocation59_spill] sm:$0xff] %v26883_v62  ;;  %v26893_v56 = vsub.f32 %v25413_v47, %v26883_v62  ;;  %23249 = vmatpush3.bf16.msra.mxu0 %v26864_v0  ;;  %v1528_v60 = vsub.f32 %v26873_v38, %v29771_v51 }
 0x17e   :  { %23251 = vmatprep.subr.bf16.mxu0 %v26880_v52  ;;  %v29769_v58 = vand.u32 4294901760, %v26887_v31  ;;  %v1539_v50 = vand.u32 4294901760, %v1538_v26  ;;  %v26919_v26 = vpack.c.bf16 %v26750_v18, %v26745_v28 }
 0x17f   :  { %v1529_v15 = vand.u32 4294901760, %v1528_v60  ;;  %v29770_v57 = vand.u32 4294901760, %v26893_v56  ;;  %v26935_v60 = vpack.c.bf16 %v26788_v24, %v26783_v17 }
 0x180   :  { %v1558_v14 = vsub.f32 %v26887_v31, %v29769_v58  ;;  %30177 = vst [vmem:[#allocation60_spill] sm:$0xff] %v26919_v26 }
 0x181   :  { %23253 = vmatpush3.bf16.msra.mxu0 %v26880_v52  ;;  %19856 = vmatprep.mubr.f32.mxu0 %v1529_v15  ;;  %v1548_v63 = vsub.f32 %v26893_v56, %v29770_v57  ;;  %30179 = vst [vmem:[#allocation62_spill] sm:$0xff] %v26935_v60  ;;  %v26943_v15 = vpack.c.bf16 %v26824_v12, %v26819_v27  ;;  %v126_v57 = vld [vmem:[#allocation10 + $0x18] sm:$0xff] }
 0x182   :  { %19857 = vmatmul.mubr.f32.gmra.mrb[12].mxu0 %v1539_v50  ;;  %23255 = vmatprep.subr.bf16.mxu0 %v26702_v37  ;;  %v1559_v23 = vand.u32 4294901760, %v1558_v14  ;;  %v123_v50 = vld [vmem:[#allocation10] sm:$0xff]  ;;  %v124_v14 = vld [vmem:[#allocation10 + $0x8] sm:$0xff] }
 0x183   :  { %v1549_v47 = vand.u32 4294901760, %v1548_v63  ;;  %30180 = vst [vmem:[#allocation63_spill] sm:$0xff] %v26943_v15  ;;  %v125_v63 = vld [vmem:[#allocation10 + $0x10] sm:$0xff]  ;;  %v2360_v58 = vand.u32 4294901760, %v124_v14 }
 0x184   :  { %v2363_v51 = vand.u32 4294901760, %v125_v63 }
 0x185   :  { %23257 = vmatpush3.bf16.msra.mxu0 %v26702_v37  ;;  %19859 = vmatprep.mubr.f32.mxu0 %v1549_v47  ;;  %v2357_v47 = vand.u32 4294901760, %v123_v50  ;;  %v26953_v0 = vsub.f32 %v124_v14, %v2360_v58 }
 0x186   :  { %19860 = vmatmul.mubr.f32.gmra.mrb[14].mxu0 %v1559_v23  ;;  %23259 = vmatprep.subr.bf16.mxu0 %v26722_v19  ;;  %v26927_v23 = vpack.c.bf16 %v26762_v43, %v26757_v13 }
 0x187   :  { %19894 = vmatprep.mubr.f32.mxu0 %v26776_v55  ;;  %v26949_v37 = vpack.c.bf16 %v2360_v58, %v2357_v47  ;;  %v26951_v52 = vsub.f32 %v123_v50, %v2357_v47  ;;  %30183 = vst [vmem:[#allocation66_spill] sm:$0xff] %v26953_v0  ;;  %v29809_v50 = vand.u32 4294901760, %v26953_v0 }
 0x188   :  { %30178 = vst [vmem:[#allocation61_spill] sm:$0xff] %v26927_v23 }
 0x189   :  { %23261 = vmatpush3.bf16.msra.mxu0 %v26722_v19  ;;  %30181 = vst [vmem:[#allocation64_spill] sm:$0xff] %v26949_v37  ;;  %30182 = vst [vmem:[#allocation65_spill] sm:$0xff] %v26951_v52  ;;  %v29806_v37 = vand.u32 4294901760, %v26951_v52 }
 0x18a   :  { %23263 = vmatprep.subr.bf16.mxu0 %v26724_v5 }
 0x18d   :  { %23265 = vmatpush3.bf16.msra.mxu0 %v26724_v5 }
 0x18e   :  { %23267 = vmatprep.subr.bf16.mxu0 %v26728_v41 }
 0x190   :  { %19895 = vmatmul.mubr.f32.vlgmr.msra.gmra.mrb[8].mxu0 %v26770_v8 }
 0x191   :  { %19897 = vmatprep.mubr.f32.mxu0 %v26806_v6  ;;  %23269 = vmatpush3.bf16.msra.mxu0 %v26728_v41  ;;  %v2366_v41 = vand.u32 4294901760, %v126_v57 }
 0x192   :  { %23271 = vmatprep.subr.bf16.mxu0 %v26919_v26 }
 0x193   :  { %v26957_v49 = vpack.c.bf16 %v2366_v41, %v2363_v51  ;;  %v26959_v48 = vsub.f32 %v126_v57, %v2366_v41  ;;  %v2375_v57 = vand.u32 4294901760, %v129_v61 }
 0x194   :  { %19898 = vmatmul.mubr.f32.gmra.mrb[10].mxu0 %v26797_v35 }
 0x195   :  { %19900 = vmatprep.mubr.f32.mxu0 %v26866_v30  ;;  %23273 = vmatpush3.bf16.msra.mxu0 %v26919_v26  ;;  %v128_v26 = vld [vmem:[#allocation10 + $0x28] sm:$0xff]  ;;  %30185 = vst [vmem:[#allocation68_spill] sm:$0xff] %v26957_v49  ;;  %30186 = vst [vmem:[#allocation69_spill] sm:$0xff] %v26959_v48 }
 0x196   :  { %23275 = vmatprep.subr.bf16.mxu0 %v26927_v23  ;;  %v2372_v19 = vand.u32 4294901760, %v128_v26 }
 0x198   :  { %19901 = vmatmul.mubr.f32.gmra.mrb[12].mxu0 %v26861_v16  ;;  %v26969_v14 = vsub.f32 %v128_v26, %v2372_v19 }
 0x199   :  { %19903 = vmatprep.mubr.f32.mxu0 %v26883_v62  ;;  %23277 = vmatpush3.bf16.msra.mxu0 %v26927_v23  ;;  %v127_v23 = vld [vmem:[#allocation10 + $0x20] sm:$0xff] }
 0x19a   :  { %23279 = vmatprep.subr.bf16.mxu0 %v26935_v60  ;;  %v2369_v5 = vand.u32 4294901760, %v127_v23  ;;  %30189 = vst [vmem:[#allocation72_spill] sm:$0xff] %v26969_v14  ;;  %v29825_v26 = vand.u32 4294901760, %v26969_v14 }
 0x19c   :  { %19904 = vmatmul.mubr.f32.gmra.mrb[14].mxu0 %v26877_v42  ;;  %v26961_v42 = vpack.c.bf16 %v2372_v19, %v2369_v5  ;;  %v26963_v62 = vsub.f32 %v127_v23, %v2369_v5  ;;  %v2521_v5 = vsub.f32 %v26951_v52, %v29806_v37  ;;  %v2528_v23 = vsub.f32 %v26953_v0, %v29809_v50  ;;  %v131_v52 = vld [vmem:[#allocation10 + $0x40] sm:$0xff]  ;;  %v132_v50 = vld [vmem:[#allocation10 + $0x48] sm:$0xff] }
 0x19d   :  { %23281 = vmatpush3.bf16.msra.mxu0 %v26935_v60  ;;  %19938 = vmatprep.mubr.f32.mxu0 %v26794_v54  ;;  %v26955_v60 = vsub.f32 %v125_v63, %v2363_v51  ;;  %v29816_v51 = vand.u32 4294901760, %v26959_v48  ;;  %v2378_v63 = vand.u32 4294901760, %v130_v25  ;;  %v26992_v37 = vsub.f32 %v129_v61, %v2375_v57 }
 0x19e   :  { %23283 = vmatprep.subr.bf16.mxu0 %v26943_v15  ;;  %30187 = vst [vmem:[#allocation70_spill] sm:$0xff] %v26961_v42  ;;  %30188 = vst [vmem:[#allocation71_spill] sm:$0xff] %v26963_v62  ;;  %v29819_v41 = vand.u32 4294901760, %v26963_v62  ;;  %v2522_v0 = vand.u32 4294901760, %v2521_v5  ;;  %v2556_v49 = vsub.f32 %v26969_v14, %v29825_v26  ;;  %v2381_v5 = vand.u32 4294901760, %v131_v52 }
 0x19f   :  { %30184 = vst [vmem:[#allocation67_spill] sm:$0xff] %v26955_v60  ;;  %v29812_v58 = vand.u32 4294901760, %v26955_v60  ;;  %v2542_v47 = vsub.f32 %v26959_v48, %v29816_v51  ;;  %v26990_v42 = vpack.c.bf16 %v2378_v63, %v2375_v57  ;;  %30191 = vst [vmem:[#allocation74_spill] sm:$0xff] %v26992_v37  ;;  %v133_v51 = vld [vmem:[#allocation10 + $0x50] sm:$0xff]  ;;  %v27000_v61 = vsub.f32 %v130_v25, %v2378_v63  ;;  %v134_v57 = vld [vmem:[#allocation10 + $0x58] sm:$0xff] }
 0x1a1   :  { %23285 = vmatpush3.bf16.msra.mxu0 %v26943_v15  ;;  %v2535_v19 = vsub.f32 %v26955_v60, %v29812_v58  ;;  %v2549_v15 = vsub.f32 %v26963_v62, %v29819_v41  ;;  %30190 = vst [vmem:[#allocation73_spill] sm:$0xff] %v26990_v42  ;;  %v2529_v58 = vand.u32 4294901760, %v2528_v23  ;;  %v2543_v48 = vand.u32 4294901760, %v2542_v47 }
 0x1a2   :  { %23287 = vmatprep.subr.bf16.mxu0 %v26732_v7  ;;  %v29828_v62 = vand.u32 4294901760, %v26992_v37  ;;  %v2384_v23 = vand.u32 4294901760, %v132_v50  ;;  %v29837_v14 = vand.u32 4294901760, %v27000_v61  ;;  %v2387_v47 = vand.u32 4294901760, %v133_v51 }
 0x1a3   :  { %v2536_v60 = vand.u32 4294901760, %v2535_v19  ;;  %v2550_v41 = vand.u32 4294901760, %v2549_v15  ;;  %v27002_v42 = vpack.c.bf16 %v2529_v58, %v2522_v0  ;;  %v135_v15 = vld [vmem:[#allocation10 + $0x60] sm:$0xff] }
 0x1a4   :  { %v2563_v26 = vsub.f32 %v26992_v37, %v29828_v62  ;;  %v27014_v0 = vpack.c.bf16 %v2384_v23, %v2381_v5  ;;  %v2570_v63 = vsub.f32 %v27000_v61, %v29837_v14  ;;  %v27023_v62 = vsub.f32 %v132_v50, %v2384_v23 }
 0x1a5   :  { %23289 = vmatpush3.bf16.msra.mxu0 %v26732_v7  ;;  %30192 = vst [vmem:[#allocation75_spill] sm:$0xff] %v27002_v42  ;;  %v2557_v7 = vand.u32 4294901760, %v2556_v49  ;;  %v27004_v19 = vpack.c.bf16 %v2543_v48, %v2536_v60  ;;  %23427 = vmatprep.subr.bf16.mxu1 %v27002_v42  ;;  %v27016_v49 = vsub.f32 %v131_v52, %v2381_v5  ;;  %v2390_v48 = vand.u32 4294901760, %v134_v57  ;;  %v136_v60 = vld [vmem:[#allocation10 + $0x68] sm:$0xff] }
 0x1a6   :  { %23291 = vmatprep.subr.bf16.mxu0 %v26736_v10  ;;  %30195 = vst [vmem:[#allocation78_spill] sm:$0xff] %v27014_v0  ;;  %23429 = vmatpush3.bf16.msra.mxu1 %v27002_v42  ;;  %v2564_v58 = vand.u32 4294901760, %v2563_v26  ;;  %v2393_v5 = vand.u32 4294901760, %v135_v15  ;;  %v2571_v37 = vand.u32 4294901760, %v2570_v63  ;;  %v29844_v26 = vand.u32 4294901760, %v27023_v62 }
 0x1a7   :  { %30193 = vst [vmem:[#allocation76_spill] sm:$0xff] %v27004_v19  ;;  %v27012_v25 = vpack.c.bf16 %v2557_v7, %v2550_v41  ;;  %23431 = vmatprep.subr.bf16.mxu1 %v27004_v19  ;;  %v29836_v7 = vand.u32 4294901760, %v27016_v49  ;;  %v27029_v52 = vpack.c.bf16 %v2390_v48, %v2387_v47  ;;  %v27031_v41 = vsub.f32 %v134_v57, %v2390_v48 }
 0x1a8   :  { %v2396_v0 = vand.u32 4294901760, %v136_v60  ;;  %v27040_v23 = vsub.f32 %v135_v15, %v2393_v5  ;;  %v27044_v57 = vpack.c.bf16 %v2571_v37, %v2564_v58 }
 0x1a9   :  { %23293 = vmatpush3.bf16.msra.mxu0 %v26736_v10  ;;  %30194 = vst [vmem:[#allocation77_spill] sm:$0xff] %v27012_v25  ;;  %v27025_v10 = vsub.f32 %v133_v51, %v2387_v47  ;;  %v2577_v50 = vsub.f32 %v27016_v49, %v29836_v7  ;;  %v29838_v51 = vand.u32 4294901760, %v27031_v41  ;;  %v2584_v47 = vsub.f32 %v27023_v62, %v29844_v26 }
 0x1aa   :  { %23295 = vmatprep.subr.bf16.mxu0 %v26740_v11  ;;  %23433 = vmatpush3.bf16.msra.mxu1 %v27004_v19  ;;  %30196 = vst [vmem:[#allocation79_spill] sm:$0xff] %v27044_v57  ;;  %v27056_v7 = vpack.c.bf16 %v2396_v0, %v2393_v5  ;;  %v29843_v37 = vand.u32 4294901760, %v27040_v23  ;;  %v27060_v14 = vsub.f32 %v136_v60, %v2396_v0 }
 0x1ab   :  { %v29839_v42 = vand.u32 4294901760, %v27025_v10  ;;  %23435 = vmatprep.subr.bf16.mxu1 %v27012_v25  ;;  %v2578_v63 = vand.u32 4294901760, %v2577_v50  ;;  %v2598_v15 = vsub.f32 %v27031_v41, %v29838_v51  ;;  %v2585_v58 = vand.u32 4294901760, %v2584_v47 }
 0x1ac   :  { %v29842_v50 = vand.u32 4294901760, %v27060_v14  ;;  %v2605_v0 = vsub.f32 %v27040_v23, %v29843_v37  ;;  %v30252_v37 = vld [vmem:[#allocation72_spill] sm:$0xff] }
 0x1ad   :  { %23297 = vmatpush3.bf16.msra.mxu0 %v26740_v11  ;;  %v2591_v48 = vsub.f32 %v27025_v10, %v29839_v42  ;;  %v27068_v5 = vpack.c.bf16 %v2585_v58, %v2578_v63  ;;  %v2599_v42 = vand.u32 4294901760, %v2598_v15 }
 0x1ae   :  { %23299 = vmatprep.subr.bf16.mxu0 %v26596_v46  ;;  %23437 = vmatpush3.bf16.msra.mxu1 %v27012_v25  ;;  %v2612_v60 = vsub.f32 %v27060_v14, %v29842_v50  ;;  %v30251_v50 = vld [vmem:[#allocation71_spill] sm:$0xff] }
 0x1af   :  { %23439 = vmatprep.subr.bf16.mxu1 %v27044_v57  ;;  %30197 = vst [vmem:[#allocation80_spill] sm:$0xff] %v27068_v5  ;;  %v2592_v51 = vand.u32 4294901760, %v2591_v48  ;;  %v2606_v48 = vand.u32 4294901760, %v2605_v0  ;;  %v30204_v0 = vand.u32 4294901760, %v26745_v28  ;;  %v30212_v28 = vand.u32 4294901760, %v26814_v22 }
 0x1b0   :  { %19939 = vmatmul.mubr.f32.vlgmr.msra.gmra.mrb[8].mxu0 %v26791_v44  ;;  %v2613_v63 = vand.u32 4294901760, %v2612_v60  ;;  %v30205_v60 = vand.u32 4294901760, %v26750_v18  ;;  %v30213_v18 = vand.u32 4294901760, %v26873_v38  ;;  %v27312_v26 = vpack.c.bf16 %v30252_v37, %v30251_v50 }
 0x1b1   :  { %19941 = vmatprep.mubr.f32.mxu0 %v26827_v45  ;;  %23301 = vmatpush3.bf16.msra.mxu0 %v26596_v46  ;;  %v27082_v47 = vpack.c.bf16 %v2599_v42, %v2592_v51  ;;  %v30200_v42 = vand.u32 4294901760, %v26794_v54  ;;  %v30201_v54 = vand.u32 4294901760, %v26663_v21  ;;  %v30202_v51 = vand.u32 4294901760, %v26665_v32 }
 0x1b2   :  { %23303 = vmatprep.subr.bf16.mxu0 %v26611_v53  ;;  %23441 = vmatpush3.bf16.msra.mxu1 %v27044_v57  ;;  %v27090_v15 = vpack.c.bf16 %v2613_v63, %v2606_v48  ;;  %v27118_v48 = vpack.c.bf16 %v30205_v60, %v30204_v0  ;;  %v30207_v63 = vand.u32 4294901760, %v26791_v44  ;;  %v30209_v21 = vand.u32 4294901760, %v26757_v13 }
 0x1b3   :  { %23443 = vmatprep.subr.bf16.mxu1 %v27068_v5  ;;  %30198 = vst [vmem:[#allocation81_spill] sm:$0xff] %v27082_v47  ;;  %v27110_v58 = vpack.c.bf16 %v30202_v51, %v30201_v54  ;;  %v30210_v32 = vand.u32 4294901760, %v26762_v43  ;;  %v30214_v44 = vand.u32 4294901760, %v26783_v17  ;;  %v30217_v13 = vand.u32 4294901760, %v26869_v33 }
 0x1b4   :  { %19942 = vmatmul.mubr.f32.gmra.mrb[10].mxu0 %v26814_v22  ;;  %30199 = vst [vmem:[#allocation82_spill] sm:$0xff] %v27090_v15  ;;  %30206 = vst [vmem:[#allocation84_spill] sm:$0xff] %v27118_v48  ;;  %v30218_v43 = vand.u32 4294901760, %v26893_v56  ;;  %v30219_v22 = vand.u32 4294901760, %v26819_v27  ;;  %v30222_v17 = vand.u32 4294901760, %v26887_v31  ;;  %v30226_v27 = vand.u32 4294901760, %v26696_v34 }
 0x1b5   :  { %19944 = vmatprep.mubr.f32.mxu0 %v26873_v38  ;;  %23305 = vmatpush3.bf16.msra.mxu0 %v26611_v53  ;;  %30203 = vst [vmem:[#allocation83_spill] sm:$0xff] %v27110_v58  ;;  %v27130_v54 = vpack.c.bf16 %v30210_v32, %v30209_v21  ;;  %v30220_v38 = vand.u32 4294901760, %v26824_v12  ;;  %v30227_v12 = vand.u32 4294901760, %v26698_v36  ;;  %v30234_v34 = vld [vmem:[#allocation64_spill] sm:$0xff] }
 0x1b6   :  { %23307 = vmatprep.subr.bf16.mxu0 %v26627_v59  ;;  %23445 = vmatpush3.bf16.msra.mxu1 %v27068_v5  ;;  %v30235_v36 = vld [vmem:[#allocation68_spill] sm:$0xff] }
 0x1b7   :  { %23447 = vmatprep.subr.bf16.mxu1 %v27082_v47  ;;  %30211 = vst [vmem:[#allocation85_spill] sm:$0xff] %v27130_v54  ;;  %v27154_v0 = vpack.c.bf16 %v30220_v38, %v30219_v22  ;;  %v30240_v38 = vld [vmem:[#allocation65_spill] sm:$0xff] }
 0x1b8   :  { %19945 = vmatmul.mubr.f32.gmra.mrb[12].mxu0 %v26869_v33  ;;  %v30224_v33 = vand.u32 4294901760, %v26686_v40  ;;  %v30230_v40 = vand.u32 4294901760, %v26709_v2  ;;  %v30232_v2 = vld [vmem:[#allocation59_spill] sm:$0xff] }
 0x1b9   :  { %19947 = vmatprep.mubr.f32.mxu0 %v26893_v56  ;;  %23309 = vmatpush3.bf16.msra.mxu0 %v26627_v59  ;;  %30221 = vst [vmem:[#allocation87_spill] sm:$0xff] %v27154_v0 }
 0x1ba   :  { %23311 = vmatprep.subr.bf16.mxu0 %v26642_v1  ;;  %23449 = vmatpush3.bf16.msra.mxu1 %v27082_v47 }
 0x1bb   :  { %23451 = vmatprep.subr.bf16.mxu1 %v27090_v15 }
 0x1bc   :  { %19948 = vmatmul.mubr.f32.gmra.mrb[14].mxu0 %v26887_v31  ;;  %v27173_v31 = vpack.c.bf16 %v30227_v12, %v30226_v27 }
 0x1bd   :  { %23313 = vmatpush3.bf16.msra.mxu0 %v26642_v1  ;;  %19982 = vmatprep.mubr.f32.mxu0 %v30200_v42  ;;  %v30208_v42 = vand.u32 4294901760, %v26827_v45  ;;  %v30215_v45 = vand.u32 4294901760, %v26788_v24  ;;  %v30223_v24 = vand.u32 4294901760, %v26684_v39  ;;  %v30229_v39 = vand.u32 4294901760, %v26707_v3  ;;  %v30233_v3 = vld [vmem:[#allocation57_spill] sm:$0xff] }
 0x1be   :  { %23315 = vmatprep.subr.bf16.mxu0 %v26652_v4  ;;  %23453 = vmatpush3.bf16.msra.mxu1 %v27090_v15  ;;  %30228 = vst [vmem:[#allocation89_spill] sm:$0xff] %v27173_v31 }
 0x1bf   :  { %v27142_v51 = vpack.c.bf16 %v30215_v45, %v30214_v44  ;;  %v27165_v56 = vpack.c.bf16 %v30224_v33, %v30223_v24  ;;  %v27181_v60 = vpack.c.bf16 %v30230_v40, %v30229_v39 }
 0x1c1   :  { %23317 = vmatpush3.bf16.msra.mxu0 %v26652_v4  ;;  %30216 = vst [vmem:[#allocation86_spill] sm:$0xff] %v27142_v51  ;;  %30225 = vst [vmem:[#allocation88_spill] sm:$0xff] %v27165_v56 }
 0x1c2   :  { %23319 = vmatprep.subr.bf16.mxu0 %v26657_v9  ;;  %30231 = vst [vmem:[#allocation90_spill] sm:$0xff] %v27181_v60 }
 0x1c5   :  { %23321 = vmatpush3.bf16.msra.mxu0 %v26657_v9 }
 0x1c6   :  { %23323 = vmatprep.subr.bf16.mxu0 %v26661_v20 }
 0x1c9   :  { %23325 = vmatpush3.bf16.msra.mxu0 %v26661_v20 }
 0x1ca   :  { %23327 = vmatprep.subr.bf16.mxu0 %v26671_v29 }
 0x1cd   :  { %23329 = vmatpush3.bf16.msra.mxu0 %v26671_v29 }
 0x1ce   :  { %23331 = vmatprep.subr.bf16.mxu0 %v27110_v58 }
 0x1d0   :  { %19983 = vmatmul.mubr.f32.vlgmr.msra.gmra.mrb[8].mxu0 %v30207_v63 }
 0x1d1   :  { %19985 = vmatprep.mubr.f32.mxu0 %v30208_v42  ;;  %23333 = vmatpush3.bf16.msra.mxu0 %v27110_v58 }
 0x1d2   :  { %23335 = vmatprep.subr.bf16.mxu0 %v27118_v48 }
 0x1d4   :  { %19986 = vmatmul.mubr.f32.gmra.mrb[10].mxu0 %v30212_v28 }
 0x1d5   :  { %19988 = vmatprep.mubr.f32.mxu0 %v30213_v18  ;;  %23337 = vmatpush3.bf16.msra.mxu0 %v27118_v48 }
 0x1d6   :  { %23339 = vmatprep.subr.bf16.mxu0 %v27130_v54 }
 0x1d8   :  { %19989 = vmatmul.mubr.f32.gmra.mrb[12].mxu0 %v30217_v13 }
 0x1d9   :  { %19991 = vmatprep.mubr.f32.mxu0 %v30218_v43  ;;  %23341 = vmatpush3.bf16.msra.mxu0 %v27130_v54 }
 0x1da   :  { %23343 = vmatprep.subr.bf16.mxu0 %v27142_v51 }
 0x1dc   :  { %19992 = vmatmul.mubr.f32.gmra.mrb[14].mxu0 %v30222_v17  ;;  %v30241_v17 = vld [vmem:[#allocation66_spill] sm:$0xff] }
 0x1dd   :  { %23345 = vmatpush3.bf16.msra.mxu0 %v27142_v51  ;;  %20026 = vmatprep.mubr.f32.mxu0 %v26776_v55  ;;  %v27251_v24 = vpack.c.bf16 %v30241_v17, %v30240_v38  ;;  %30253 = vst [vmem:[#allocation66_spill] sm:$0xff] %v27312_v26 }
 0x1de   :  { %23347 = vmatprep.subr.bf16.mxu0 %v27154_v0 }
 0x1df   :  { %30242 = vst [vmem:[#allocation57_spill] sm:$0xff] %v27251_v24 }
 0x1e1   :  { %23349 = vmatpush3.bf16.msra.mxu0 %v27154_v0 }
 0x1e2   :  { %23351 = vmatprep.subr.bf16.mxu0 %v27165_v56 }
 0x1e5   :  { %23353 = vmatpush3.bf16.msra.mxu0 %v27165_v56 }
 0x1e6   :  { %23355 = vmatprep.subr.bf16.mxu0 %v27173_v31 }
 0x1e9   :  { %23357 = vmatpush3.bf16.msra.mxu0 %v27173_v31 }
 0x1ea   :  { %23359 = vmatprep.subr.bf16.mxu0 %v27181_v60 }
 0x1ed   :  { %23361 = vmatpush3.bf16.msra.mxu0 %v27181_v60 }
 0x1ee   :  { %23363 = vmatprep.subr.bf16.mxu0 %v26596_v46 }
 0x1f0   :  { %20027 = vmatmul.mubr.f32.vlgmr.msra.gmra.mrb[8].mxu0 %v26770_v8 }
 0x1f1   :  { %20029 = vmatprep.mubr.f32.mxu0 %v26806_v6  ;;  %23365 = vmatpush3.bf16.msra.mxu0 %v26596_v46 }
 0x1f2   :  { %23367 = vmatprep.subr.bf16.mxu0 %v26611_v53 }
 0x1f4   :  { %20030 = vmatmul.mubr.f32.gmra.mrb[10].mxu0 %v26797_v35 }
 0x1f5   :  { %20032 = vmatprep.mubr.f32.mxu0 %v26866_v30  ;;  %23369 = vmatpush3.bf16.msra.mxu0 %v26611_v53 }
 0x1f6   :  { %23371 = vmatprep.subr.bf16.mxu0 %v26627_v59 }
 0x1f8   :  { %20033 = vmatmul.mubr.f32.gmra.mrb[12].mxu0 %v26861_v16 }
 0x1f9   :  { %20035 = vmatprep.mubr.f32.mxu0 %v30232_v2  ;;  %23373 = vmatpush3.bf16.msra.mxu0 %v26627_v59 }
 0x1fa   :  { %23375 = vmatprep.subr.bf16.mxu0 %v26642_v1 }
 0x1fc   :  { %20036 = vmatmul.mubr.f32.gmra.mrb[14].mxu0 %v30233_v3 }
 0x1fd   :  { %23377 = vmatpush3.bf16.msra.mxu0 %v26642_v1  ;;  %20070 = vmatprep.mubr.f32.mxu0 %v26776_v55  ;;  %v30236_v55 = vld [vmem:[#allocation70_spill] sm:$0xff] }
 0x1fe   :  { %23379 = vmatprep.subr.bf16.mxu0 %v26652_v4 }
 0x201   :  { %23381 = vmatpush3.bf16.msra.mxu0 %v26652_v4 }
 0x202   :  { %23383 = vmatprep.subr.bf16.mxu0 %v26657_v9 }
 0x205   :  { %23385 = vmatpush3.bf16.msra.mxu0 %v26657_v9 }
 0x206   :  { %23387 = vmatprep.subr.bf16.mxu0 %v26661_v20 }
 0x209   :  { %23389 = vmatpush3.bf16.msra.mxu0 %v26661_v20 }
 0x20a   :  { %23391 = vmatprep.subr.bf16.mxu0 %v26671_v29 }
 0x20d   :  { %23393 = vmatpush3.bf16.msra.mxu0 %v26671_v29 }
 0x20e   :  { %23395 = vmatprep.subr.bf16.mxu0 %v30234_v34 }
 0x210   :  { %20071 = vmatmul.mubr.f32.vlgmr.msra.gmra.mrb[8].mxu0 %v26770_v8  ;;  %v30237_v8 = vld [vmem:[#allocation73_spill] sm:$0xff] }
 0x211   :  { %20073 = vmatprep.mubr.f32.mxu0 %v26806_v6  ;;  %23397 = vmatpush3.bf16.msra.mxu0 %v30234_v34  ;;  %v30238_v6 = vld [vmem:[#allocation78_spill] sm:$0xff] }
 0x212   :  { %23399 = vmatprep.subr.bf16.mxu0 %v30235_v36 }
 0x214   :  { %20074 = vmatmul.mubr.f32.gmra.mrb[10].mxu0 %v26797_v35  ;;  %v137_v35 = vld [vmem:[#allocation10 + $0x70] sm:$0xff] }
 0x215   :  { %20076 = vmatprep.mubr.f32.mxu0 %v26866_v30  ;;  %23401 = vmatpush3.bf16.msra.mxu0 %v30235_v36  ;;  %v2399_v30 = vand.u32 4294901760, %v137_v35 }
 0x216   :  { %23403 = vmatprep.subr.bf16.mxu0 %v30236_v55 }
 0x217   :  { %v27231_v42 = vsub.f32 %v137_v35, %v2399_v30 }
 0x218   :  { %20077 = vmatmul.mubr.f32.gmra.mrb[12].mxu0 %v26861_v16  ;;  %v138_v16 = vld [vmem:[#allocation10 + $0x78] sm:$0xff] }
 0x219   :  { %20079 = vmatprep.mubr.f32.mxu0 %v30232_v2  ;;  %23405 = vmatpush3.bf16.msra.mxu0 %v30236_v55  ;;  %v2402_v63 = vand.u32 4294901760, %v138_v16  ;;  %v29841_v32 = vand.u32 4294901760, %v27231_v42  ;;  %v30246_v2 = vld [vmem:[#allocation67_spill] sm:$0xff] }
 0x21a   :  { %23407 = vmatprep.subr.bf16.mxu0 %v30237_v8 }
 0x21b   :  { %v27233_v21 = vsub.f32 %v138_v16, %v2402_v63  ;;  %v2619_v18 = vsub.f32 %v27231_v42, %v29841_v32  ;;  %v27246_v22 = vpack.c.bf16 %v2402_v63, %v2399_v30 }
 0x21c   :  { %20080 = vmatmul.mubr.f32.gmra.mrb[14].mxu0 %v30233_v3  ;;  %v30247_v3 = vld [vmem:[#allocation69_spill] sm:$0xff] }
 0x21d   :  { %23409 = vmatpush3.bf16.msra.mxu0 %v30237_v8  ;;  %v29840_v28 = vand.u32 4294901760, %v27233_v21  ;;  %v2620_v45 = vand.u32 4294901760, %v2619_v18  ;;  %v27258_v33 = vpack.c.bf16 %v27233_v21, %v27231_v42  ;;  %v27274_v35 = vpack.c.bf16 %v30247_v3, %v30246_v2 }
 0x21e   :  { %23411 = vmatprep.subr.bf16.mxu0 %v30238_v6 }
 0x21f   :  { %v2626_v44 = vsub.f32 %v27233_v21, %v29840_v28  ;;  %30243 = vst [vmem:[#allocation64_spill] sm:$0xff] %v27258_v33  ;;  %30248 = vst [vmem:[#allocation73_spill] sm:$0xff] %v27274_v35 }
 0x221   :  { %23413 = vmatpush3.bf16.msra.mxu0 %v30238_v6  ;;  %v2627_v13 = vand.u32 4294901760, %v2626_v44 }
 0x222   :  { %23415 = vmatprep.subr.bf16.mxu0 %v27029_v52 }
 0x223   :  { %v27243_v43 = vpack.c.bf16 %v2627_v13, %v2620_v45 }
 0x225   :  { %23417 = vmatpush3.bf16.msra.mxu0 %v27029_v52  ;;  %30239 = vst [vmem:[#allocation59_spill] sm:$0xff] %v27243_v43  ;;  %23455 = vmatprep.subr.bf16.mxu1 %v27243_v43 }
 0x226   :  { %23419 = vmatprep.subr.bf16.mxu0 %v27056_v7  ;;  %23457 = vmatpush3.bf16.msra.mxu1 %v27243_v43 }
 0x227   :  { %23459 = vmatprep.subr.bf16.mxu1 %v27251_v24 }
 0x229   :  { %23421 = vmatpush3.bf16.msra.mxu0 %v27056_v7 }
 0x22a   :  { %23423 = vmatprep.subr.bf16.mxu0 %v27246_v22 }
 0x22d   :  { %23425 = vmatpush3.bf16.msra.mxu0 %v27246_v22 }
 0x2e3   :  { %v27260_v27 = vpop.f32.mrb[8].mxu0 }
 0x2e4   :  { %30244 = vst [vmem:[#allocation68_spill] sm:$0xff] %v27260_v27  ;;  %2347 = vst [vmem:[#allocation14 + $0x8] sm:$0xff] %v27260_v27  ;;  %v27263_v12 = vpop.f32.mrb[9].mxu0  ;;  %v27266_v39 = vand.u32 4294901760, %v27260_v27 }
 0x2e5   :  { %30245 = vst [vmem:[#allocation70_spill] sm:$0xff] %v27263_v12  ;;  %2346 = vst [vmem:[#allocation14] sm:$0xff] %v27263_v12  ;;  %v27270_v40 = vand.u32 4294901760, %v27263_v12 }
 0x2e6   :  { %v27278_v16 = vsub.f32 %v27260_v27, %v27266_v39 }
 0x2e7   :  { %v27280_v30 = vpop.f32.mrb[10].mxu0  ;;  %20158 = vmatprep.mubr.f32.mxu1 %v27270_v40  ;;  %v27285_v63 = vsub.f32 %v27263_v12, %v27270_v40 }
 0x2e8   :  { %30249 = vst [vmem:[#allocation78_spill] sm:$0xff] %v27280_v30  ;;  %2349 = vst [vmem:[#allocation14 + $0x18] sm:$0xff] %v27280_v30  ;;  %v27288_v18 = vpop.f32.mrb[11].mxu0  ;;  %20159 = vmatmul.mubr.f32.vlgmr.msra.gmra.mrb[4].mxu1 %v27266_v39  ;;  %v27292_v44 = vand.u32 4294901760, %v27280_v30  ;;  %v27295_v45 = vand.u32 4294901760, %v27278_v16 }
 0x2e9   :  { %30250 = vst [vmem:[#allocation65_spill] sm:$0xff] %v27288_v18  ;;  %2348 = vst [vmem:[#allocation14 + $0x10] sm:$0xff] %v27288_v18  ;;  %23461 = vmatpush3.bf16.msra.mxu1 %v27251_v24  ;;  %v27300_v13 = vand.u32 4294901760, %v27288_v18  ;;  %v27303_v28 = vand.u32 4294901760, %v27285_v63  ;;  %v27307_v32 = vpack.c.bf16 %v27278_v16, %v27285_v63 }
 0x2ea   :  { %23463 = vmatprep.subr.bf16.mxu1 %v27274_v35  ;;  %v2450_v43 = vsub.f32 %v27278_v16, %v27295_v45  ;;  %v27318_v24 = vsub.f32 %v27280_v30, %v27292_v44 }
 0x2eb   :  { %v27320_v15 = vpop.f32.mrb[12].mxu0  ;;  %20161 = vmatprep.mubr.f32.mxu1 %v27300_v13  ;;  %v2440_v47 = vsub.f32 %v27285_v63, %v27303_v28  ;;  %v27327_v5 = vsub.f32 %v27288_v18, %v27300_v13  ;;  %v27331_v57 = vpack.c.bf16 %v27295_v45, %v27303_v28 }
 0x2ec   :  { %30254 = vst [vmem:[#allocation67_spill] sm:$0xff] %v27320_v15  ;;  %2351 = vst [vmem:[#allocation14 + $0x28] sm:$0xff] %v27320_v15  ;;  %v27334_v25 = vpop.f32.mrb[13].mxu0  ;;  %20162 = vmatmul.mubr.f32.gmra.mrb[6].mxu1 %v27292_v44  ;;  %v2451_v19 = vand.u32 4294901760, %v2450_v43  ;;  %v27338_v60 = vand.u32 4294901760, %v27320_v15  ;;  %v27341_v31 = vand.u32 4294901760, %v27318_v24 }
 0x2ed   :  { %30255 = vst [vmem:[#allocation69_spill] sm:$0xff] %v27331_v57  ;;  %30256 = vst [vmem:[#allocation71_spill] sm:$0xff] %v27334_v25  ;;  %23465 = vmatpush3.bf16.msra.mxu1 %v27274_v35  ;;  %v2441_v56 = vand.u32 4294901760, %v2440_v47  ;;  %v27346_v0 = vand.u32 4294901760, %v27334_v25  ;;  %v27349_v51 = vand.u32 4294901760, %v27327_v5  ;;  %v30257_v43 = vld [vmem:[#allocation74_spill] sm:$0xff]  ;;  %v27364_v47 = vpack.c.bf16 %v27318_v24, %v27327_v5 }
 0x2ee   :  { %2350 = vst [vmem:[#allocation14 + $0x20] sm:$0xff] %v27334_v25  ;;  %23467 = vmatprep.subr.bf16.mxu1 %v27312_v26  ;;  %v27354_v54 = vpack.c.bf16 %v27000_v61, %v30257_v43  ;;  %v2470_v48 = vsub.f32 %v27318_v24, %v27341_v31  ;;  %v27360_v58 = vsub.f32 %v27320_v15, %v27338_v60 }
 0x2ef   :  { %30259 = vst [vmem:[#allocation74_spill] sm:$0xff] %v27364_v47  ;;  %v27366_v35 = vpop.f32.mrb[14].mxu0  ;;  %20114 = vmatprep.mubr.f32.mxu0 %v2441_v56  ;;  %20164 = vmatprep.mubr.f32.mxu1 %v27346_v0  ;;  %v2460_v11 = vsub.f32 %v27327_v5, %v27349_v51  ;;  %v2478_v29 = vsub.f32 %v27334_v25, %v27346_v0 }
 0x2f0   :  { %30258 = vst [vmem:[#allocation72_spill] sm:$0xff] %v27354_v54  ;;  %30260 = vst [vmem:[#allocation91_spill] sm:$0xff] %v27366_v35  ;;  %v27373_v20 = vpack.c.bf16 %v2451_v19, %v2441_v56  ;;  %v27376_v9 = vpop.f32.mrb[15].mxu0  ;;  %20115 = vmatmul.mubr.f32.vlgmr.msra.gmra.mrb[16].mxu0 %v2451_v19  ;;  %20165 = vmatmul.mubr.f32.gmra.mrb[8].mxu1 %v27338_v60  ;;  %v2471_v4 = vand.u32 4294901760, %v2470_v48  ;;  %v27380_v1 = vand.u32 4294901760, %v27366_v35  ;;  %v27383_v59 = vand.u32 4294901760, %v27360_v58 }
 0x2f1   :  { %2353 = vst [vmem:[#allocation14 + $0x38] sm:$0xff] %v27366_v35  ;;  %30261 = vst [vmem:[#allocation92_spill] sm:$0xff] %v27376_v9  ;;  %23469 = vmatpush3.bf16.msra.mxu1 %v27312_v26  ;;  %v2461_v56 = vand.u32 4294901760, %v2460_v11  ;;  %v27388_v53 = vand.u32 4294901760, %v27376_v9  ;;  %v27390_v46 = vand.u32 4294901760, %v2478_v29  ;;  %v27395_v19 = vpack.c.bf16 %v27023_v62, %v27016_v49 }
 0x2f2   :  { %2352 = vst [vmem:[#allocation14 + $0x30] sm:$0xff] %v27376_v9  ;;  %23471 = vmatprep.subr.bf16.mxu1 %v27354_v54  ;;  %v2490_v48 = vsub.f32 %v27360_v58, %v27383_v59  ;;  %v2508_v25 = vsub.f32 %v27366_v35, %v27380_v1  ;;  %v27429_v27 = vpack.c.bf16 %v27360_v58, %v2478_v29 }
 0x2f3   :  { %20117 = vmatprep.mubr.f32.mxu0 %v2461_v56  ;;  %20167 = vmatprep.mubr.f32.mxu1 %v27388_v53  ;;  %v2480_v11 = vsub.f32 %v2478_v29, %v27390_v46  ;;  %v2498_v26 = vsub.f32 %v27376_v9, %v27388_v53  ;;  %v27405_v15 = vpack.c.bf16 %v2471_v4, %v2461_v56 }
 0x2f4   :  { %20118 = vmatmul.mubr.f32.gmra.mrb[18].mxu0 %v2471_v4  ;;  %20168 = vmatmul.mubr.f32.gmra.mrb[10].mxu1 %v27380_v1  ;;  %v27408_v18 = vand.u32 4294901760, %v2508_v25  ;;  %v2491_v30 = vand.u32 4294901760, %v2490_v48  ;;  %v27417_v9 = vpack.c.bf16 %v27031_v41, %v27025_v10  ;;  %v27436_v47 = vpack.c.bf16 %v27060_v14, %v27040_v23 }
 0x2f5   :  { %23473 = vmatpush3.bf16.msra.mxu1 %v27354_v54  ;;  %20202 = vmatprep.mubr.f32.mxu1 %v27285_v63  ;;  %v2481_v35 = vand.u32 4294901760, %v2480_v11  ;;  %v27412_v12 = vand.u32 4294901760, %v2498_v26  ;;  %v27423_v54 = vpack.c.bf16 %v27341_v31, %v27349_v51  ;;  %v27431_v57 = vpack.c.bf16 %v2508_v25, %v2498_v26 }
 0x2f6   :  { %23475 = vmatprep.subr.bf16.mxu1 %v27395_v19  ;;  %30262 = vst [vmem:[#allocation93_spill] sm:$0xff] %v27417_v9  ;;  %v2510_v4 = vsub.f32 %v2508_v25, %v27408_v18  ;;  %30264 = vst [vmem:[#allocation95_spill] sm:$0xff] %v27436_v47 }
 0x2f7   :  { %20120 = vmatprep.mubr.f32.mxu0 %v2481_v35  ;;  %v2500_v56 = vsub.f32 %v2498_v26, %v27412_v12  ;;  %30263 = vst [vmem:[#allocation94_spill] sm:$0xff] %v27423_v54  ;;  %v27426_v11 = vpack.c.bf16 %v2491_v30, %v2481_v35  ;;  %v27440_v54 = vpack.c.bf16 %v27383_v59, %v27390_v46 }
 0x2f8   :  { %20121 = vmatmul.mubr.f32.gmra.mrb[20].mxu0 %v2491_v30  ;;  %v2511_v63 = vand.u32 4294901760, %v2510_v4  ;;  %v27444_v4 = vpack.c.bf16 %v27408_v18, %v27412_v12  ;;  %v30265_v30 = vld [vmem:[#allocation34_spill] sm:$0xff] }
 0x2f9   :  { %23477 = vmatpush3.bf16.msra.mxu1 %v27395_v19  ;;  %v2501_v48 = vand.u32 4294901760, %v2500_v56  ;;  %v118_v56 = vld [vmem:[#allocation8 + $0x18] sm:$0xff] }
 0x2fa   :  { %23479 = vmatprep.subr.bf16.mxu1 %v27417_v9 }
 0x2fb   :  { %20123 = vmatprep.mubr.f32.mxu0 %v2501_v48  ;;  %v27446_v35 = vpack.c.bf16 %v2511_v63, %v2501_v48 }
 0x2fc   :  { %20124 = vmatmul.mubr.f32.gmra.mrb[22].mxu0 %v2511_v63  ;;  %v27577_v63 = vpack.c.bf16 %v27266_v39, %v27270_v40 }
 0x2fd   :  { %23481 = vmatpush3.bf16.msra.mxu1 %v27417_v9  ;;  %20522 = vmatprep.mubr.f32.mxu0 %v30265_v30 }
 0x2fe   :  { %23483 = vmatprep.subr.bf16.mxu1 %v27436_v47 }
 0x301   :  { %23485 = vmatpush3.bf16.msra.mxu1 %v27436_v47 }
 0x302   :  { %23487 = vmatprep.subr.bf16.mxu1 %v27258_v33 }
 0x305   :  { %23489 = vmatpush3.bf16.msra.mxu1 %v27258_v33 }
 0x306   :  { %23491 = vmatprep.subr.bf16.mxu1 %v30234_v34 }
 0x308   :  { %20203 = vmatmul.mubr.f32.vlgmr.msra.gmra.mrb[4].mxu1 %v27278_v16 }
 0x309   :  { %20205 = vmatprep.mubr.f32.mxu1 %v27327_v5  ;;  %23493 = vmatpush3.bf16.msra.mxu1 %v30234_v34  ;;  %v30269_v5 = vand.u32 4294901760, %v30246_v2  ;;  %v30276_v2 = vand.u32 4294901760, %v27000_v61  ;;  %v30282_v61 = vand.u32 4294901760, %v27031_v41  ;;  %v30288_v41 = vand.u32 4294901760, %v27233_v21  ;;  %v117_v21 = vld [vmem:[#allocation8 + $0x10] sm:$0xff] }
 0x30a   :  { %23495 = vmatprep.subr.bf16.mxu1 %v30235_v36 }
 0x30c   :  { %20206 = vmatmul.mubr.f32.gmra.mrb[6].mxu1 %v27318_v24 }
 0x30d   :  { %20208 = vmatprep.mubr.f32.mxu1 %v2478_v29  ;;  %23497 = vmatpush3.bf16.msra.mxu1 %v30235_v36  ;;  %v30266_v29 = vand.u32 4294901760, %v30240_v38  ;;  %v30272_v38 = vand.u32 4294901760, %v30251_v50 }
 0x30e   :  { %23499 = vmatprep.subr.bf16.mxu1 %v30236_v55 }
 0x310   :  { %20209 = vmatmul.mubr.f32.gmra.mrb[8].mxu1 %v27360_v58  ;;  %v30270_v58 = vand.u32 4294901760, %v30247_v3 }
 0x311   :  { %20211 = vmatprep.mubr.f32.mxu1 %v2498_v26  ;;  %23501 = vmatpush3.bf16.msra.mxu1 %v30236_v55 }
 0x312   :  { %23503 = vmatprep.subr.bf16.mxu1 %v30237_v8 }
 0x314   :  { %20212 = vmatmul.mubr.f32.gmra.mrb[10].mxu1 %v2508_v25  ;;  %v30267_v25 = vand.u32 4294901760, %v30241_v17  ;;  %v30273_v17 = vand.u32 4294901760, %v30252_v37  ;;  %v30279_v37 = vand.u32 4294901760, %v27023_v62  ;;  %v30284_v62 = vand.u32 4294901760, %v27040_v23 }
 0x315   :  { %23505 = vmatpush3.bf16.msra.mxu1 %v30237_v8  ;;  %20246 = vmatprep.mubr.f32.mxu1 %v27303_v28  ;;  %v27486_v28 = vpack.c.bf16 %v30270_v58, %v30269_v5  ;;  %v3308_v5 = vsel %vm163_vm0, %v118_v56, 0  ;;  %v27592_v58 = vpack.c.bf16 %v27292_v44, %v27300_v13 }
 0x316   :  { %23507 = vmatprep.subr.bf16.mxu1 %v30238_v6  ;;  %v27478_v26 = vpack.c.bf16 %v30267_v25, %v30266_v29  ;;  %v27496_v24 = vpack.c.bf16 %v30273_v17, %v30272_v38  ;;  %v27597_v38 = vand.u32 4294901760, %v3308_v5 }
 0x317   :  { %30271 = vst [vmem:[#allocation97_spill] sm:$0xff] %v27486_v28 }
 0x318   :  { %30268 = vst [vmem:[#allocation96_spill] sm:$0xff] %v27478_v26  ;;  %30274 = vst [vmem:[#allocation98_spill] sm:$0xff] %v27496_v24 }
 0x319   :  { %23509 = vmatpush3.bf16.msra.mxu1 %v30238_v6  ;;  %30295 = vst [vmem:[#allocation109_spill] sm:$0xff] %v27597_v38 }
 0x31a   :  { %23511 = vmatprep.subr.bf16.mxu1 %v27029_v52 }
 0x31d   :  { %23513 = vmatpush3.bf16.msra.mxu1 %v27029_v52 }
 0x31e   :  { %23515 = vmatprep.subr.bf16.mxu1 %v27056_v7 }
 0x321   :  { %23517 = vmatpush3.bf16.msra.mxu1 %v27056_v7 }
 0x322   :  { %23519 = vmatprep.subr.bf16.mxu1 %v27246_v22 }
 0x325   :  { %23521 = vmatpush3.bf16.msra.mxu1 %v27246_v22 }
 0x326   :  { %23523 = vmatprep.subr.bf16.mxu1 %v27478_v26 }
 0x328   :  { %20247 = vmatmul.mubr.f32.vlgmr.msra.gmra.mrb[4].mxu1 %v27295_v45 }
 0x329   :  { %20249 = vmatprep.mubr.f32.mxu1 %v27349_v51  ;;  %23525 = vmatpush3.bf16.msra.mxu1 %v27478_v26  ;;  %v30275_v51 = vand.u32 4294901760, %v30257_v43  ;;  %v3305_v43 = vsel %vm163_vm0, %v117_v21, 0 }
 0x32a   :  { %23527 = vmatprep.subr.bf16.mxu1 %v27486_v28  ;;  %v27585_v25 = vand.u32 4294901760, %v3305_v43 }
 0x32b   :  { %v27506_v3 = vpack.c.bf16 %v30276_v2, %v30275_v51  ;;  %v27613_v2 = vsub.f32 %v3308_v5, %v27597_v38 }
 0x32c   :  { %20250 = vmatmul.mubr.f32.gmra.mrb[6].mxu1 %v27341_v31  ;;  %30293 = vst [vmem:[#allocation107_spill] sm:$0xff] %v27585_v25  ;;  %v27605_v51 = vsub.f32 %v3305_v43, %v27585_v25 }
 0x32d   :  { %20252 = vmatprep.mubr.f32.mxu1 %v27390_v46  ;;  %23529 = vmatpush3.bf16.msra.mxu1 %v27486_v28  ;;  %30277 = vst [vmem:[#allocation99_spill] sm:$0xff] %v27506_v3  ;;  %v30278_v46 = vand.u32 4294901760, %v27016_v49  ;;  %v30285_v49 = vand.u32 4294901760, %v27060_v14  ;;  %v115_v14 = vld [vmem:[#allocation8] sm:$0xff]  ;;  %30299 = vst [vmem:[#allocation113_spill] sm:$0xff] %v27613_v2 }
 0x32e   :  { %23531 = vmatprep.subr.bf16.mxu1 %v27496_v24  ;;  %v3299_v23 = vsel %vm163_vm0, %v115_v14, 0  ;;  %30297 = vst [vmem:[#allocation111_spill] sm:$0xff] %v27605_v51  ;;  %v30305_v14 = vld [vmem:[#allocation74_spill] sm:$0xff] }
 0x32f   :  { %v27516_v50 = vpack.c.bf16 %v30279_v37, %v30278_v46  ;;  %v27620_v46 = vand.u32 4294901760, %v27605_v51  ;;  %v27627_v37 = vand.u32 4294901760, %v27613_v2 }
 0x330   :  { %20253 = vmatmul.mubr.f32.gmra.mrb[8].mxu1 %v27383_v59  ;;  %v30281_v59 = vand.u32 4294901760, %v27025_v10  ;;  %v30287_v10 = vand.u32 4294901760, %v27231_v42  ;;  %v116_v42 = vld [vmem:[#allocation8 + $0x8] sm:$0xff] }
 0x331   :  { %20255 = vmatprep.mubr.f32.mxu1 %v27412_v12  ;;  %23533 = vmatpush3.bf16.msra.mxu1 %v27496_v24  ;;  %30280 = vst [vmem:[#allocation100_spill] sm:$0xff] %v27516_v50  ;;  %v27534_v12 = vpack.c.bf16 %v30285_v49, %v30284_v62  ;;  %v3302_v45 = vsel %vm163_vm0, %v116_v42, 0  ;;  %30300 = vst [vmem:[#allocation114_spill] sm:$0xff] %v27620_v46  ;;  %v3412_v49 = vsub.f32 %v27613_v2, %v27627_v37 }
 0x332   :  { %23535 = vmatprep.subr.bf16.mxu1 %v27506_v3  ;;  %v27526_v31 = vpack.c.bf16 %v30282_v61, %v30281_v59  ;;  %v27542_v16 = vpack.c.bf16 %v30288_v41, %v30287_v10  ;;  %v27579_v48 = vand.u32 4294901760, %v3302_v45  ;;  %30301 = vst [vmem:[#allocation115_spill] sm:$0xff] %v27627_v37  ;;  %v3402_v61 = vsub.f32 %v27605_v51, %v27620_v46 }
 0x333   :  { %30286 = vst [vmem:[#allocation102_spill] sm:$0xff] %v27534_v12  ;;  %v27643_v41 = vand.u32 4294901760, %v3412_v49  ;;  %v27754_v42 = vstv %s2354_s27 }
 0x334   :  { %20256 = vmatmul.mubr.f32.gmra.mrb[10].mxu1 %v27408_v18  ;;  %30283 = vst [vmem:[#allocation101_spill] sm:$0xff] %v27526_v31  ;;  %30289 = vst [vmem:[#allocation103_spill] sm:$0xff] %v27542_v16  ;;  %v27570_v18 = vand.u32 4294901760, %v3299_v23  ;;  %v27640_v10 = vand.u32 4294901760, %v3402_v61 }
 0x335   :  { %23537 = vmatpush3.bf16.msra.mxu1 %v27506_v3  ;;  %20290 = vmatprep.mubr.f32.mxu1 %v27270_v40  ;;  %30291 = vst [vmem:[#allocation105_spill] sm:$0xff] %v27579_v48  ;;  %30304 = vst [vmem:[#allocation118_spill] sm:$0xff] %v27643_v41 }
 0x336   :  { %23539 = vmatprep.subr.bf16.mxu1 %v27516_v50  ;;  %30290 = vst [vmem:[#allocation104_spill] sm:$0xff] %v27570_v18  ;;  %v27583_v29 = vsub.f32 %v3299_v23, %v27570_v18  ;;  %30303 = vst [vmem:[#allocation117_spill] sm:$0xff] %v27640_v10  ;;  %v23638_v23 = vpack.c.bf16 %v27380_v1, %v27388_v53 }
 0x337   :  { %30309 = vst [vmem:[#allocation74_spill] sm:$0xff] %v27754_v42 }
 0x338   :  { %30292 = vst [vmem:[#allocation106_spill] sm:$0xff] %v27583_v29  ;;  %v27602_v17 = vand.u32 4294901760, %v27583_v29 }
 0x339   :  { %23541 = vmatpush3.bf16.msra.mxu1 %v27516_v50 }
 0x33a   :  { %23543 = vmatprep.subr.bf16.mxu1 %v27526_v31  ;;  %30296 = vst [vmem:[#allocation110_spill] sm:$0xff] %v27602_v17 }
 0x33d   :  { %23545 = vmatpush3.bf16.msra.mxu1 %v27526_v31 }
 0x33e   :  { %23547 = vmatprep.subr.bf16.mxu1 %v27534_v12 }
 0x341   :  { %23549 = vmatpush3.bf16.msra.mxu1 %v27534_v12 }
 0x342   :  { %23551 = vmatprep.subr.bf16.mxu1 %v27542_v16 }
 0x345   :  { %23553 = vmatpush3.bf16.msra.mxu1 %v27542_v16 }
 0x346   :  { %23555 = vmatprep.subr.bf16.mxu1 %v30234_v34 }
 0x348   :  { %20291 = vmatmul.mubr.f32.vlgmr.msra.gmra.mrb[4].mxu1 %v27266_v39 }
 0x349   :  { %20293 = vmatprep.mubr.f32.mxu1 %v27300_v13  ;;  %23557 = vmatpush3.bf16.msra.mxu1 %v30234_v34 }
 0x34a   :  { %23559 = vmatprep.subr.bf16.mxu1 %v30235_v36 }
 0x34c   :  { %20294 = vmatmul.mubr.f32.gmra.mrb[6].mxu1 %v27292_v44 }
 0x34d   :  { %20296 = vmatprep.mubr.f32.mxu1 %v27346_v0  ;;  %23561 = vmatpush3.bf16.msra.mxu1 %v30235_v36 }
 0x34e   :  { %23563 = vmatprep.subr.bf16.mxu1 %v30236_v55 }
 0x350   :  { %20297 = vmatmul.mubr.f32.gmra.mrb[8].mxu1 %v27338_v60 }
 0x351   :  { %20299 = vmatprep.mubr.f32.mxu1 %v27388_v53  ;;  %23565 = vmatpush3.bf16.msra.mxu1 %v30236_v55 }
 0x352   :  { %23567 = vmatprep.subr.bf16.mxu1 %v30237_v8 }
 0x354   :  { %20300 = vmatmul.mubr.f32.gmra.mrb[10].mxu1 %v27380_v1 }
 0x355   :  { %23569 = vmatpush3.bf16.msra.mxu1 %v30237_v8  ;;  %20334 = vmatprep.mubr.f32.mxu1 %v27270_v40  ;;  %v27595_v40 = vsub.f32 %v3302_v45, %v27579_v48 }
 0x356   :  { %23571 = vmatprep.subr.bf16.mxu1 %v30238_v6 }
 0x357   :  { %30294 = vst [vmem:[#allocation108_spill] sm:$0xff] %v27595_v40 }
 0x359   :  { %23573 = vmatpush3.bf16.msra.mxu1 %v30238_v6 }
 0x35a   :  { %23575 = vmatprep.subr.bf16.mxu1 %v27029_v52 }
 0x35d   :  { %23577 = vmatpush3.bf16.msra.mxu1 %v27029_v52 }
 0x35e   :  { %23579 = vmatprep.subr.bf16.mxu1 %v27056_v7 }
 0x361   :  { %23581 = vmatpush3.bf16.msra.mxu1 %v27056_v7 }
 0x362   :  { %23583 = vmatprep.subr.bf16.mxu1 %v27246_v22 }
 0x365   :  { %23585 = vmatpush3.bf16.msra.mxu1 %v27246_v22 }
 0x366   :  { %23587 = vmatprep.subr.bf16.mxu1 %v27577_v63 }
 0x368   :  { %20335 = vmatmul.mubr.f32.vlgmr.msra.gmra.mrb[4].mxu1 %v27266_v39  ;;  %v27610_v39 = vand.u32 4294901760, %v27595_v40 }
 0x369   :  { %20337 = vmatprep.mubr.f32.mxu1 %v27300_v13  ;;  %23589 = vmatpush3.bf16.msra.mxu1 %v27577_v63  ;;  %v3382_v13 = vsub.f32 %v27583_v29, %v27602_v17 }
 0x36a   :  { %23591 = vmatprep.subr.bf16.mxu1 %v27592_v58  ;;  %30298 = vst [vmem:[#allocation112_spill] sm:$0xff] %v27610_v39 }
 0x36b   :  { %v27630_v59 = vand.u32 4294901760, %v3382_v13 }
 0x36c   :  { %20338 = vmatmul.mubr.f32.gmra.mrb[6].mxu1 %v27292_v44  ;;  %v3392_v44 = vsub.f32 %v27595_v40, %v27610_v39 }
 0x36d   :  { %20340 = vmatprep.mubr.f32.mxu1 %v27346_v0  ;;  %23593 = vmatpush3.bf16.msra.mxu1 %v27592_v58 }
 0x36e   :  { %23595 = vmatprep.subr.bf16.mxu1 %v27373_v20  ;;  %v27635_v62 = vand.u32 4294901760, %v3392_v44 }
 0x370   :  { %20341 = vmatmul.mubr.f32.gmra.mrb[8].mxu1 %v27338_v60  ;;  %30302 = vst [vmem:[#allocation116_spill] sm:$0xff] %v27635_v62 }
 0x371   :  { %20343 = vmatprep.mubr.f32.mxu1 %v27388_v53 }
 0x374   :  { %20344 = vmatmul.mubr.f32.gmra.mrb[10].mxu1 %v27380_v1 }
 0x375   :  { %20354 = vmatprep.mubr.f32.mxu1 %v27630_v59 }
 0x378   :  { %20355 = vmatmul.mubr.f32.vlgmr.msra.gmra.mrb[4].mxu1 %v27635_v62 }
 0x379   :  { %23597 = vmatpush3.bf16.msra.mxu1 %v27373_v20  ;;  %20357 = vmatprep.mubr.f32.mxu1 %v27640_v10  ;;  %v30306_v20 = vld [vmem:[#allocation69_spill] sm:$0xff] }
 0x37a   :  { %23599 = vmatprep.subr.bf16.mxu1 %v27405_v15 }
 0x37c   :  { %20358 = vmatmul.mubr.f32.gmra.mrb[6].mxu1 %v27643_v41 }
 0x37d   :  { %23601 = vmatpush3.bf16.msra.mxu1 %v27405_v15  ;;  %20368 = vmatprep.mubr.f32.mxu1 %v27570_v18  ;;  %v30307_v15 = vld [vmem:[#allocation94_spill] sm:$0xff] }
 0x37e   :  { %23603 = vmatprep.subr.bf16.mxu1 %v27307_v32 }
 0x380   :  { %20369 = vmatmul.mubr.f32.vlgmr.msra.gmra.mrb[4].mxu1 %v27579_v48 }
 0x381   :  { %23605 = vmatpush3.bf16.msra.mxu1 %v27307_v32  ;;  %20371 = vmatprep.mubr.f32.mxu1 %v27585_v25  ;;  %v23634_v32 = vpack.c.bf16 %v27338_v60, %v27346_v0 }
 0x382   :  { %23607 = vmatprep.subr.bf16.mxu1 %v30305_v14 }
 0x384   :  { %20372 = vmatmul.mubr.f32.gmra.mrb[6].mxu1 %v27597_v38 }
 0x385   :  { %23609 = vmatpush3.bf16.msra.mxu1 %v30305_v14  ;;  %20382 = vmatprep.mubr.f32.mxu1 %v27583_v29  ;;  %v30312_v14 = vld [vmem:[#allocation68_spill] sm:$0xff] }
 0x386   :  { %23611 = vmatprep.subr.bf16.mxu1 %v27577_v63 }
 0x388   :  { %20383 = vmatmul.mubr.f32.vlgmr.msra.gmra.mrb[4].mxu1 %v27595_v40 }
 0x389   :  { %23613 = vmatpush3.bf16.msra.mxu1 %v27577_v63  ;;  %20385 = vmatprep.mubr.f32.mxu1 %v27605_v51 }
 0x38a   :  { %23615 = vmatprep.subr.bf16.mxu1 %v27592_v58 }
 0x38c   :  { %20386 = vmatmul.mubr.f32.gmra.mrb[6].mxu1 %v27613_v2 }
 0x38d   :  { %23617 = vmatpush3.bf16.msra.mxu1 %v27592_v58  ;;  %20396 = vmatprep.mubr.f32.mxu1 %v27602_v17 }
 0x38e   :  { %23619 = vmatprep.subr.bf16.mxu1 %v30306_v20 }
 0x390   :  { %20397 = vmatmul.mubr.f32.vlgmr.msra.gmra.mrb[4].mxu1 %v27610_v39 }
 0x391   :  { %23621 = vmatpush3.bf16.msra.mxu1 %v30306_v20  ;;  %20399 = vmatprep.mubr.f32.mxu1 %v27620_v46 }
 0x392   :  { %23623 = vmatprep.subr.bf16.mxu1 %v30307_v15 }
 0x394   :  { %20400 = vmatmul.mubr.f32.gmra.mrb[6].mxu1 %v27627_v37 }
 0x395   :  { %23625 = vmatpush3.bf16.msra.mxu1 %v30307_v15  ;;  %20410 = vmatprep.mubr.f32.mxu1 %v27570_v18 }
 0x396   :  { %23627 = vmatprep.subr.bf16.mxu1 %v27577_v63 }
 0x398   :  { %20411 = vmatmul.mubr.f32.vlgmr.msra.gmra.mrb[4].mxu1 %v27579_v48 }
 0x399   :  { %23629 = vmatpush3.bf16.msra.mxu1 %v27577_v63  ;;  %20413 = vmatprep.mubr.f32.mxu1 %v27585_v25 }
 0x39a   :  { %23631 = vmatprep.subr.bf16.mxu1 %v27592_v58 }
 0x39c   :  { %20414 = vmatmul.mubr.f32.gmra.mrb[6].mxu1 %v27597_v38 }
 0x39d   :  { %23633 = vmatpush3.bf16.msra.mxu1 %v27592_v58  ;;  %20424 = vmatprep.mubr.f32.mxu1 %v27570_v18 }
 0x39e   :  { %23635 = vmatprep.subr.bf16.mxu1 %v23634_v32 }
 0x3a0   :  { %20425 = vmatmul.mubr.f32.vlgmr.msra.gmra.mrb[4].mxu1 %v27579_v48 }
 0x3a1   :  { %23637 = vmatpush3.bf16.msra.mxu1 %v23634_v32  ;;  %20427 = vmatprep.mubr.f32.mxu1 %v27585_v25 }
 0x3a2   :  { %23639 = vmatprep.subr.bf16.mxu1 %v23638_v23 }
 0x3a4   :  { %20428 = vmatmul.mubr.f32.gmra.mrb[6].mxu1 %v27597_v38 }
 0x3a5   :  { %23641 = vmatpush3.bf16.msra.mxu1 %v23638_v23  ;;  %20438 = vmatprep.mubr.f32.mxu1 %v27630_v59 }
 0x3a6   :  { %23643 = vmatprep.subr.bf16.mxu1 %v27426_v11 }
 0x3a8   :  { %20439 = vmatmul.mubr.f32.vlgmr.msra.gmra.mrb[8].mxu1 %v27635_v62 }
 0x3a9   :  { %23645 = vmatpush3.bf16.msra.mxu1 %v27426_v11  ;;  %20441 = vmatprep.mubr.f32.mxu1 %v27640_v10 }
 0x3aa   :  { %23647 = vmatprep.subr.bf16.mxu1 %v27446_v35 }
 0x3ac   :  { %20442 = vmatmul.mubr.f32.gmra.mrb[10].mxu1 %v27643_v41 }
 0x3ad   :  { %23649 = vmatpush3.bf16.msra.mxu1 %v27446_v35  ;;  %20452 = vmatprep.mubr.f32.mxu1 %v27570_v18 }
 0x3ae   :  { %23651 = vmatprep.subr.bf16.mxu1 %v27429_v27 }
 0x3b0   :  { %20453 = vmatmul.mubr.f32.vlgmr.msra.gmra.mrb[8].mxu1 %v27579_v48 }
 0x3b1   :  { %23653 = vmatpush3.bf16.msra.mxu1 %v27429_v27  ;;  %20455 = vmatprep.mubr.f32.mxu1 %v27585_v25 }
 0x3b2   :  { %23655 = vmatprep.subr.bf16.mxu1 %v27431_v57 }
 0x3b4   :  { %20456 = vmatmul.mubr.f32.gmra.mrb[10].mxu1 %v27597_v38 }
 0x3b5   :  { %23657 = vmatpush3.bf16.msra.mxu1 %v27431_v57  ;;  %20466 = vmatprep.mubr.f32.mxu1 %v27583_v29 }
 0x3b6   :  { %23659 = vmatprep.subr.bf16.mxu1 %v23634_v32 }
 0x3b8   :  { %20467 = vmatmul.mubr.f32.vlgmr.msra.gmra.mrb[8].mxu1 %v27595_v40 }
 0x3b9   :  { %23661 = vmatpush3.bf16.msra.mxu1 %v23634_v32  ;;  %20469 = vmatprep.mubr.f32.mxu1 %v27605_v51 }
 0x3ba   :  { %23663 = vmatprep.subr.bf16.mxu1 %v23638_v23 }
 0x3bc   :  { %20470 = vmatmul.mubr.f32.gmra.mrb[10].mxu1 %v27613_v2 }
 0x3bd   :  { %23665 = vmatpush3.bf16.msra.mxu1 %v23638_v23  ;;  %20480 = vmatprep.mubr.f32.mxu1 %v27602_v17 }
 0x3be   :  { %23667 = vmatprep.subr.bf16.mxu1 %v27440_v54 }
 0x3c0   :  { %20481 = vmatmul.mubr.f32.vlgmr.msra.gmra.mrb[8].mxu1 %v27610_v39 }
 0x3c1   :  { %23669 = vmatpush3.bf16.msra.mxu1 %v27440_v54  ;;  %20483 = vmatprep.mubr.f32.mxu1 %v27620_v46 }
 0x3c2   :  { %23671 = vmatprep.subr.bf16.mxu1 %v27444_v4 }
 0x3c3   :  { %v20116_v53 = vpop.f32.mrb[16].mxu0 }
 0x3c4   :  { %20484 = vmatmul.mubr.f32.gmra.mrb[10].mxu1 %v27627_v37  ;;  %v2443_v1 = vpop.f32.mrb[17].mxu0 }
 0x3c5   :  { %23673 = vmatpush3.bf16.msra.mxu1 %v27444_v4  ;;  %20494 = vmatprep.mubr.f32.mxu1 %v27570_v18  ;;  %v30308_v4 = vld [vmem:[#allocation75_spill] sm:$0xff] }
 0x3c6   :  { %23675 = vmatprep.subr.bf16.mxu1 %v23634_v32 }
 0x3c7   :  { %v20119_v57 = vpop.f32.mrb[18].mxu0 }
 0x3c8   :  { %20495 = vmatmul.mubr.f32.vlgmr.msra.gmra.mrb[8].mxu1 %v27579_v48  ;;  %v2463_v0 = vpop.f32.mrb[19].mxu0 }
 0x3c9   :  { %23677 = vmatpush3.bf16.msra.mxu1 %v23634_v32  ;;  %20497 = vmatprep.mubr.f32.mxu1 %v27585_v25  ;;  %v30314_v32 = vld [vmem:[#allocation70_spill] sm:$0xff] }
 0x3ca   :  { %23679 = vmatprep.subr.bf16.mxu1 %v23638_v23 }
 0x3cb   :  { %v27721_v54 = vpop.f32.mrb[20].mxu0 }
 0x3cc   :  { %20498 = vmatmul.mubr.f32.gmra.mrb[10].mxu1 %v27597_v38  ;;  %v27724_v60 = vpop.f32.mrb[21].mxu0 }
 0x3cd   :  { %23681 = vmatpush3.bf16.msra.mxu1 %v23638_v23  ;;  %20508 = vmatprep.mubr.f32.mxu1 %v27570_v18 }
 0x3ce   :  { %23971 = vmatprep.subr.bf16.mxu1 %v30234_v34 }
 0x3cf   :  { %v27728_v27 = vpop.f32.mrb[22].mxu0 }
 0x3d0   :  { %20509 = vmatmul.mubr.f32.vlgmr.msra.gmra.mrb[8].mxu1 %v27579_v48  ;;  %v27731_v11 = vpop.f32.mrb[23].mxu0 }
 0x3d1   :  { %20511 = vmatprep.mubr.f32.mxu1 %v27585_v25  ;;  %23973 = vmatpush3.bf16.msra.mxu1 %v30234_v34 }
 0x3d2   :  { %23975 = vmatprep.subr.bf16.mxu1 %v30235_v36 }
 0x3d4   :  { %20512 = vmatmul.mubr.f32.gmra.mrb[10].mxu1 %v27597_v38 }
 0x3d5   :  { %23977 = vmatpush3.bf16.msra.mxu1 %v30235_v36 }
 0x3d6   :  { %23979 = vmatprep.subr.bf16.mxu1 %v30236_v55 }
 0x3d9   :  { %23981 = vmatpush3.bf16.msra.mxu1 %v30236_v55 }
 0x3da   :  { %23983 = vmatprep.subr.bf16.mxu1 %v30237_v8 }
 0x3dd   :  { %23985 = vmatpush3.bf16.msra.mxu1 %v30237_v8 }
 0x3de   :  { %23987 = vmatprep.subr.bf16.mxu1 %v30238_v6 }
 0x3e1   :  { %23989 = vmatpush3.bf16.msra.mxu1 %v30238_v6 }
 0x3e2   :  { %23991 = vmatprep.subr.bf16.mxu1 %v27029_v52 }
 0x3e5   :  { %23993 = vmatpush3.bf16.msra.mxu1 %v27029_v52 }
 0x3e6   :  { %23995 = vmatprep.subr.bf16.mxu1 %v27056_v7 }
 0x3e9   :  { %23997 = vmatpush3.bf16.msra.mxu1 %v27056_v7 }
 0x3ea   :  { %23999 = vmatprep.subr.bf16.mxu1 %v27246_v22 }
 0x3ed   :  { %24001 = vmatpush3.bf16.msra.mxu1 %v27246_v22 }
 0x3ee   :  { %24003 = vmatprep.subr.bf16.mxu1 %v30308_v4 }
 0x473   :  { %v20426_v35 = vpop.f32.mrb[4].mxu1 }
 0x474   :  { %v25414_v21 = vadd.f32 %v20426_v35, %v20116_v53  ;;  %v3902_v45 = vpop.f32.mrb[5].mxu1 }
 0x475   :  { %v25415_v43 = vadd.f32 %v3902_v45, %v2443_v1 }
 0x476   :  { %v27757_v56 = vmul.f32 %v25414_v21, %v27754_v42 }
 0x477   :  { %v27760_v63 = vmul.f32 %v25415_v43, %v27754_v42  ;;  %v20429_v5 = vpop.f32.mrb[6].mxu1  ;;  %v30316_v43 = vld [vmem:[#allocation78_spill] sm:$0xff] }
 0x478   :  { %30310 = vst [vmem:[#allocation69_spill] sm:$0xff] %v27757_v56  ;;  %v4548_v58 = vmul.f32 3.0, %v27757_v56  ;;  %v25416_v13 = vadd.f32 %v20429_v5, %v20119_v57  ;;  %v3914_v44 = vpop.f32.mrb[7].mxu1 }
 0x479   :  { %30311 = vst [vmem:[#allocation94_spill] sm:$0xff] %v27760_v63  ;;  %v4547_v61 = vmul.f32 3.0, %v27760_v63  ;;  %v25417_v49 = vadd.f32 %v3914_v44, %v2463_v0  ;;  %v30317_v44 = vld [vmem:[#allocation65_spill] sm:$0xff] }
 0x47a   :  { %v4556_v20 = vadd.f32 %v30312_v14, %v4548_v58  ;;  %v27766_v15 = vmul.f32 %v25416_v13, %v27754_v42 }
 0x47b   :  { %v4555_v23 = vadd.f32 %v4547_v61, %v30314_v32  ;;  %v27770_v53 = vmul.f32 %v25417_v49, %v27754_v42 }
 0x47c   :  { %30313 = vst [vmem:[#allocation75_spill] sm:$0xff] %v27766_v15  ;;  %v4567_v1 = vand.u32 4294901760, %v4556_v20  ;;  %v4550_v35 = vmul.f32 3.0, %v27766_v15 }
 0x47d   :  { %30315 = vst [vmem:[#allocation68_spill] sm:$0xff] %v27770_v53  ;;  %v4564_v21 = vand.u32 4294901760, %v4555_v23  ;;  %v4549_v57 = vmul.f32 3.0, %v27770_v53 }
 0x47e   :  { %v4681_v45 = vsub.f32 %v4556_v20, %v4567_v1  ;;  %v4558_v5 = vadd.f32 %v30316_v43, %v4550_v35 }
 0x47f   :  { %v27775_v0 = vpack.c.bf16 %v4567_v1, %v4564_v21  ;;  %v4674_v58 = vsub.f32 %v4555_v23, %v4564_v21  ;;  %v4557_v13 = vadd.f32 %v4549_v57, %v30317_v44 }
 0x480   :  { %v4573_v14 = vand.u32 4294901760, %v4558_v5  ;;  %v4682_v63 = vand.u32 4294901760, %v4681_v45 }
 0x481   :  { %v4570_v61 = vand.u32 4294901760, %v4557_v13  ;;  %23683 = vmatprep.subr.bf16.mxu0 %v27775_v0  ;;  %v4675_v49 = vand.u32 4294901760, %v4674_v58  ;;  %v23698_v32 = vpack.c.bf16 %v4681_v45, %v4674_v58 }
 0x482   :  { %v4695_v56 = vsub.f32 %v4558_v5, %v4573_v14  ;;  %23685 = vmatpush3.bf16.msra.mxu0 %v27775_v0  ;;  %v4683_v15 = vsub.f32 %v4681_v45, %v4682_v63  ;;  %v30318_v45 = vld [vmem:[#allocation35_spill] sm:$0xff] }
 0x483   :  { %v27780_v53 = vpack.c.bf16 %v4573_v14, %v4570_v61  ;;  %v4688_v20 = vsub.f32 %v4557_v13, %v4570_v61  ;;  %v4676_v35 = vsub.f32 %v4674_v58, %v4675_v49  ;;  %v23714_v1 = vpack.c.bf16 %v4682_v63, %v4675_v49  ;;  %v30319_v63 = vld [vmem:[#allocation36_spill] sm:$0xff]  ;;  %v30320_v58 = vld [vmem:[#allocation37_spill] sm:$0xff]  ;;  %v30321_v14 = vld [vmem:[#allocation22_spill] sm:$0xff] }
 0x484   :  { %v4684_v43 = vand.u32 4294901760, %v4683_v15  ;;  %v4696_v23 = vand.u32 4294901760, %v4695_v56  ;;  %v30323_v61 = vld [vmem:[#allocation26_spill] sm:$0xff] }
 0x485   :  { %23687 = vmatprep.subr.bf16.mxu0 %v27780_v53  ;;  %v4677_v21 = vand.u32 4294901760, %v4676_v35  ;;  %v4689_v57 = vand.u32 4294901760, %v4688_v20  ;;  %v23702_v44 = vpack.c.bf16 %v4695_v56, %v4688_v20  ;;  %v30327_v49 = vld [vmem:[#allocation30_spill] sm:$0xff]  ;;  %v30330_v35 = vld [vmem:[#allocation29_spill] sm:$0xff] }
 0x486   :  { %23689 = vmatpush3.bf16.msra.mxu0 %v27780_v53  ;;  %v4697_v37 = vsub.f32 %v4695_v56, %v4696_v23  ;;  %v30322_v56 = vld [vmem:[#allocation23_spill] sm:$0xff] }
 0x487   :  { %v23690_v46 = vpack.c.bf16 %v4684_v43, %v4677_v21  ;;  %v4690_v5 = vsub.f32 %v4688_v20, %v4689_v57  ;;  %v23718_v39 = vpack.c.bf16 %v4696_v23, %v4689_v57  ;;  %v30328_v20 = vld [vmem:[#allocation31_spill] sm:$0xff]  ;;  %v30331_v43 = vld [vmem:[#allocation32_spill] sm:$0xff] }
 0x488   :  { %v4698_v17 = vand.u32 4294901760, %v4697_v37  ;;  %v30324_v37 = vld [vmem:[#allocation27_spill] sm:$0xff] }
 0x489   :  { %20523 = vmatmul.mubr.f32.vlgmr.msra.gmra.mrb[24].mxu0 %v30318_v45  ;;  %23691 = vmatprep.subr.bf16.mxu0 %v23690_v46  ;;  %v4691_v13 = vand.u32 4294901760, %v4690_v5  ;;  %v30332_v5 = vld [vmem:[#allocation33_spill] sm:$0xff] }
 0x48a   :  { %23693 = vmatpush3.bf16.msra.mxu0 %v23690_v46  ;;  %20525 = vmatprep.mubr.f32.mxu0 %v30319_v63  ;;  %v30325_v46 = vld [vmem:[#allocation24_spill] sm:$0xff] }
 0x48b   :  { %v23694_v15 = vpack.c.bf16 %v4698_v17, %v4691_v13  ;;  %v30326_v17 = vld [vmem:[#allocation25_spill] sm:$0xff] }
 0x48d   :  { %20526 = vmatmul.mubr.f32.gmra.mrb[26].mxu0 %v30320_v58  ;;  %23695 = vmatprep.subr.bf16.mxu0 %v23694_v15 }
 0x48e   :  { %23697 = vmatpush3.bf16.msra.mxu0 %v23694_v15  ;;  %20536 = vmatprep.mubr.f32.mxu0 %v30321_v14 }
 0x48f   :  { %23699 = vmatprep.subr.bf16.mxu0 %v23698_v32 }
 0x491   :  { %20537 = vmatmul.mubr.f32.vlgmr.msra.gmra.mrb[24].mxu0 %v30322_v56 }
 0x492   :  { %23701 = vmatpush3.bf16.msra.mxu0 %v23698_v32  ;;  %20539 = vmatprep.mubr.f32.mxu0 %v30323_v61  ;;  %v30329_v32 = vld [vmem:[#allocation28_spill] sm:$0xff] }
 0x493   :  { %23703 = vmatprep.subr.bf16.mxu0 %v23702_v44 }
 0x495   :  { %20540 = vmatmul.mubr.f32.gmra.mrb[26].mxu0 %v30324_v37 }
 0x496   :  { %23705 = vmatpush3.bf16.msra.mxu0 %v23702_v44  ;;  %20550 = vmatprep.mubr.f32.mxu0 %v30325_v46 }
 0x497   :  { %23707 = vmatprep.subr.bf16.mxu0 %v27775_v0 }
 0x499   :  { %20551 = vmatmul.mubr.f32.vlgmr.msra.gmra.mrb[24].mxu0 %v30326_v17 }
 0x49a   :  { %23709 = vmatpush3.bf16.msra.mxu0 %v27775_v0  ;;  %20553 = vmatprep.mubr.f32.mxu0 %v30327_v49 }
 0x49b   :  { %23711 = vmatprep.subr.bf16.mxu0 %v27780_v53 }
 0x49d   :  { %20554 = vmatmul.mubr.f32.gmra.mrb[26].mxu0 %v30328_v20 }
 0x49e   :  { %23713 = vmatpush3.bf16.msra.mxu0 %v27780_v53  ;;  %20564 = vmatprep.mubr.f32.mxu0 %v30329_v32 }
 0x49f   :  { %23715 = vmatprep.subr.bf16.mxu0 %v23714_v1 }
 0x4a1   :  { %20565 = vmatmul.mubr.f32.vlgmr.msra.gmra.mrb[24].mxu0 %v30330_v35 }
 0x4a2   :  { %23717 = vmatpush3.bf16.msra.mxu0 %v23714_v1  ;;  %20567 = vmatprep.mubr.f32.mxu0 %v30331_v43 }
 0x4a3   :  { %v20510_v23 = vpop.f32.mrb[8].mxu1  ;;  %23719 = vmatprep.subr.bf16.mxu0 %v23718_v39 }
 0x4a4   :  { %v25418_v21 = vadd.f32 %v20510_v23, %v27721_v54  ;;  %v4516_v57 = vpop.f32.mrb[9].mxu1 }
 0x4a5   :  { %v25419_v44 = vadd.f32 %v4516_v57, %v27724_v60  ;;  %20568 = vmatmul.mubr.f32.gmra.mrb[26].mxu0 %v30332_v5 }
 0x4a6   :  { %v27806_v13 = vmul.f32 %v25418_v21, %v27754_v42  ;;  %23721 = vmatpush3.bf16.msra.mxu0 %v23718_v39  ;;  %20578 = vmatprep.mubr.f32.mxu0 %v30321_v14  ;;  %v30335_v39 = vld [vmem:[#allocation67_spill] sm:$0xff] }
 0x4a7   :  { %v27810_v15 = vmul.f32 %v25419_v44, %v27754_v42  ;;  %v20513_v1 = vpop.f32.mrb[10].mxu1  ;;  %23723 = vmatprep.subr.bf16.mxu0 %v27775_v0  ;;  %v30337_v44 = vld [vmem:[#allocation71_spill] sm:$0xff] }
 0x4a8   :  { %30333 = vst [vmem:[#allocation70_spill] sm:$0xff] %v27806_v13  ;;  %v4552_v2 = vmul.f32 3.0, %v27806_v13  ;;  %v25420_v54 = vadd.f32 %v20513_v1, %v27728_v27  ;;  %v4528_v23 = vpop.f32.mrb[11].mxu1 }
 0x4a9   :  { %30334 = vst [vmem:[#allocation78_spill] sm:$0xff] %v27810_v15  ;;  %v4551_v60 = vmul.f32 3.0, %v27810_v15  ;;  %v25421_v57 = vadd.f32 %v4528_v23, %v27731_v11  ;;  %20579 = vmatmul.mubr.f32.vlgmr.msra.gmra.mrb[24].mxu0 %v30322_v56 }
 0x4aa   :  { %v4560_v21 = vadd.f32 %v30335_v39, %v4552_v2  ;;  %v27820_v51 = vmul.f32 %v25420_v54, %v27754_v42  ;;  %23725 = vmatpush3.bf16.msra.mxu0 %v27775_v0  ;;  %20581 = vmatprep.mubr.f32.mxu0 %v30323_v61  ;;  %v30339_v39 = vld [vmem:[#allocation91_spill] sm:$0xff] }
 0x4ab   :  { %v4559_v13 = vadd.f32 %v4551_v60, %v30337_v44  ;;  %v27826_v27 = vmul.f32 %v25421_v57, %v27754_v42  ;;  %23727 = vmatprep.subr.bf16.mxu0 %v27780_v53  ;;  %v30340_v44 = vld [vmem:[#allocation92_spill] sm:$0xff] }
 0x4ac   :  { %30336 = vst [vmem:[#allocation65_spill] sm:$0xff] %v27820_v51  ;;  %v5181_v1 = vand.u32 4294901760, %v4560_v21  ;;  %v4554_v11 = vmul.f32 3.0, %v27820_v51 }
 0x4ad   :  { %30338 = vst [vmem:[#allocation35_spill] sm:$0xff] %v27826_v27  ;;  %v5178_v23 = vand.u32 4294901760, %v4559_v13  ;;  %v4553_v2 = vmul.f32 3.0, %v27826_v27  ;;  %20582 = vmatmul.mubr.f32.gmra.mrb[26].mxu0 %v30324_v37 }
 0x4ae   :  { %v5295_v54 = vsub.f32 %v4560_v21, %v5181_v1  ;;  %v4562_v0 = vadd.f32 %v30339_v39, %v4554_v11  ;;  %23729 = vmatpush3.bf16.msra.mxu0 %v27780_v53  ;;  %20592 = vmatprep.mubr.f32.mxu0 %v30321_v14 }
 0x4af   :  { %v27835_v60 = vpack.c.bf16 %v5181_v1, %v5178_v23  ;;  %v5288_v57 = vsub.f32 %v4559_v13, %v5178_v23  ;;  %v4561_v42 = vadd.f32 %v4553_v2, %v30340_v44 }
 0x4b0   :  { %v5187_v15 = vand.u32 4294901760, %v4562_v0  ;;  %v5296_v40 = vand.u32 4294901760, %v5295_v54 }
 0x4b1   :  { %v5184_v51 = vand.u32 4294901760, %v4561_v42  ;;  %20593 = vmatmul.mubr.f32.vlgmr.msra.gmra.mrb[24].mxu0 %v30322_v56  ;;  %23731 = vmatprep.subr.bf16.mxu0 %v27835_v60  ;;  %v5289_v27 = vand.u32 4294901760, %v5288_v57  ;;  %v23746_v21 = vpack.c.bf16 %v5295_v54, %v5288_v57 }
 0x4b2   :  { %v5309_v29 = vsub.f32 %v4562_v0, %v5187_v15  ;;  %23733 = vmatpush3.bf16.msra.mxu0 %v27835_v60  ;;  %20595 = vmatprep.mubr.f32.mxu0 %v30323_v61  ;;  %v5297_v53 = vsub.f32 %v5295_v54, %v5296_v40 }
 0x4b3   :  { %v23734_v1 = vpack.c.bf16 %v5187_v15, %v5184_v51  ;;  %v5302_v11 = vsub.f32 %v4561_v42, %v5184_v51  ;;  %v5290_v13 = vsub.f32 %v5288_v57, %v5289_v27  ;;  %v23762_v23 = vpack.c.bf16 %v5296_v40, %v5289_v27  ;;  %v30347_v42 = vld [vmem:[#allocation44_spill] sm:$0xff]  ;;  %v30348_v15 = vld [vmem:[#allocation45_spill] sm:$0xff]  ;;  %v30349_v27 = vld [vmem:[#allocation46_spill] sm:$0xff] }
 0x4b4   :  { %v5298_v2 = vand.u32 4294901760, %v5297_v53  ;;  %v5310_v39 = vand.u32 4294901760, %v5309_v29 }
 0x4b5   :  { %20596 = vmatmul.mubr.f32.gmra.mrb[26].mxu0 %v30324_v37  ;;  %23735 = vmatprep.subr.bf16.mxu0 %v23734_v1  ;;  %v5291_v44 = vand.u32 4294901760, %v5290_v13  ;;  %v5303_v38 = vand.u32 4294901760, %v5302_v11  ;;  %v23750_v25 = vpack.c.bf16 %v5309_v29, %v5302_v11 }
 0x4b6   :  { %23737 = vmatpush3.bf16.msra.mxu0 %v23734_v1  ;;  %20606 = vmatprep.mubr.f32.mxu0 %v30265_v30  ;;  %v5311_v0 = vsub.f32 %v5309_v29, %v5310_v39  ;;  %v30343_v29 = vld [vmem:[#allocation40_spill] sm:$0xff] }
 0x4b7   :  { %v23738_v48 = vpack.c.bf16 %v5298_v2, %v5291_v44  ;;  %v5304_v18 = vsub.f32 %v5302_v11, %v5303_v38  ;;  %v23766_v41 = vpack.c.bf16 %v5310_v39, %v5303_v38  ;;  %v30345_v38 = vld [vmem:[#allocation42_spill] sm:$0xff] }
 0x4b8   :  { %v5312_v54 = vand.u32 4294901760, %v5311_v0 }
 0x4b9   :  { %20607 = vmatmul.mubr.f32.vlgmr.msra.gmra.mrb[28].mxu0 %v30318_v45  ;;  %23739 = vmatprep.subr.bf16.mxu0 %v23738_v48  ;;  %v5305_v40 = vand.u32 4294901760, %v5304_v18  ;;  %v30341_v18 = vld [vmem:[#allocation38_spill] sm:$0xff] }
 0x4ba   :  { %23741 = vmatpush3.bf16.msra.mxu0 %v23738_v48  ;;  %20609 = vmatprep.mubr.f32.mxu0 %v30319_v63  ;;  %v30342_v48 = vld [vmem:[#allocation39_spill] sm:$0xff] }
 0x4bb   :  { %v23742_v51 = vpack.c.bf16 %v5312_v54, %v5305_v40 }
 0x4bd   :  { %20610 = vmatmul.mubr.f32.gmra.mrb[30].mxu0 %v30320_v58  ;;  %23743 = vmatprep.subr.bf16.mxu0 %v23742_v51 }
 0x4be   :  { %23745 = vmatpush3.bf16.msra.mxu0 %v23742_v51  ;;  %20620 = vmatprep.mubr.f32.mxu0 %v30321_v14 }
 0x4bf   :  { %23747 = vmatprep.subr.bf16.mxu0 %v23746_v21 }
 0x4c1   :  { %20621 = vmatmul.mubr.f32.vlgmr.msra.gmra.mrb[28].mxu0 %v30322_v56 }
 0x4c2   :  { %23749 = vmatpush3.bf16.msra.mxu0 %v23746_v21  ;;  %20623 = vmatprep.mubr.f32.mxu0 %v30323_v61 }
 0x4c3   :  { %23751 = vmatprep.subr.bf16.mxu0 %v23750_v25 }
 0x4c5   :  { %20624 = vmatmul.mubr.f32.gmra.mrb[30].mxu0 %v30324_v37 }
 0x4c6   :  { %23753 = vmatpush3.bf16.msra.mxu0 %v23750_v25  ;;  %20634 = vmatprep.mubr.f32.mxu0 %v30325_v46  ;;  %v30344_v25 = vld [vmem:[#allocation41_spill] sm:$0xff] }
 0x4c7   :  { %23755 = vmatprep.subr.bf16.mxu0 %v27835_v60 }
 0x4c9   :  { %20635 = vmatmul.mubr.f32.vlgmr.msra.gmra.mrb[28].mxu0 %v30326_v17 }
 0x4ca   :  { %23757 = vmatpush3.bf16.msra.mxu0 %v27835_v60  ;;  %20637 = vmatprep.mubr.f32.mxu0 %v30327_v49 }
 0x4cb   :  { %23759 = vmatprep.subr.bf16.mxu0 %v23734_v1 }
 0x4cd   :  { %20638 = vmatmul.mubr.f32.gmra.mrb[30].mxu0 %v30328_v20 }
 0x4ce   :  { %23761 = vmatpush3.bf16.msra.mxu0 %v23734_v1  ;;  %20648 = vmatprep.mubr.f32.mxu0 %v30329_v32  ;;  %v30350_v32 = vld [vmem:[#allocation54_spill] sm:$0xff] }
 0x4cf   :  { %23763 = vmatprep.subr.bf16.mxu0 %v23762_v23 }
 0x4d1   :  { %20649 = vmatmul.mubr.f32.vlgmr.msra.gmra.mrb[28].mxu0 %v30330_v35 }
 0x4d2   :  { %23765 = vmatpush3.bf16.msra.mxu0 %v23762_v23  ;;  %20651 = vmatprep.mubr.f32.mxu0 %v30331_v43 }
 0x4d3   :  { %23767 = vmatprep.subr.bf16.mxu0 %v23766_v41 }
 0x4d5   :  { %20652 = vmatmul.mubr.f32.gmra.mrb[30].mxu0 %v30332_v5 }
 0x4d6   :  { %23769 = vmatpush3.bf16.msra.mxu0 %v23766_v41  ;;  %20662 = vmatprep.mubr.f32.mxu0 %v30321_v14  ;;  %v30346_v41 = vld [vmem:[#allocation43_spill] sm:$0xff] }
 0x4d7   :  { %23771 = vmatprep.subr.bf16.mxu0 %v27835_v60 }
 0x4d9   :  { %20663 = vmatmul.mubr.f32.vlgmr.msra.gmra.mrb[28].mxu0 %v30322_v56 }
 0x4da   :  { %23773 = vmatpush3.bf16.msra.mxu0 %v27835_v60  ;;  %20665 = vmatprep.mubr.f32.mxu0 %v30323_v61 }
 0x4db   :  { %23775 = vmatprep.subr.bf16.mxu0 %v23734_v1 }
 0x4dd   :  { %20666 = vmatmul.mubr.f32.gmra.mrb[30].mxu0 %v30324_v37 }
 0x4de   :  { %23777 = vmatpush3.bf16.msra.mxu0 %v23734_v1  ;;  %20676 = vmatprep.mubr.f32.mxu0 %v30321_v14 }
 0x4df   :  { %23779 = vmatprep.subr.bf16.mxu0 %v30341_v18 }
 0x4e1   :  { %20677 = vmatmul.mubr.f32.vlgmr.msra.gmra.mrb[28].mxu0 %v30322_v56 }
 0x4e2   :  { %20679 = vmatprep.mubr.f32.mxu0 %v30323_v61  ;;  %23781 = vmatpush3.bf16.msra.mxu0 %v30341_v18 }
 0x4e3   :  { %23783 = vmatprep.subr.bf16.mxu0 %v30342_v48 }
 0x4e5   :  { %20680 = vmatmul.mubr.f32.gmra.mrb[30].mxu0 %v30324_v37 }
 0x4e6   :  { %23785 = vmatpush3.bf16.msra.mxu0 %v30342_v48 }
 0x4e7   :  { %23787 = vmatprep.subr.bf16.mxu0 %v30343_v29 }
 0x4ea   :  { %23789 = vmatpush3.bf16.msra.mxu0 %v30343_v29 }
 0x4eb   :  { %23791 = vmatprep.subr.bf16.mxu0 %v30344_v25 }
 0x4ee   :  { %23793 = vmatpush3.bf16.msra.mxu0 %v30344_v25 }
 0x4ef   :  { %23795 = vmatprep.subr.bf16.mxu0 %v30345_v38 }
 0x4f2   :  { %23797 = vmatpush3.bf16.msra.mxu0 %v30345_v38 }
 0x4f3   :  { %23799 = vmatprep.subr.bf16.mxu0 %v30346_v41 }
 0x4f6   :  { %23801 = vmatpush3.bf16.msra.mxu0 %v30346_v41 }
 0x4f7   :  { %23803 = vmatprep.subr.bf16.mxu0 %v30347_v42 }
 0x4fa   :  { %23805 = vmatpush3.bf16.msra.mxu0 %v30347_v42 }
 0x4fb   :  { %23807 = vmatprep.subr.bf16.mxu0 %v30348_v15 }
 0x4fe   :  { %23809 = vmatpush3.bf16.msra.mxu0 %v30348_v15 }
 0x4ff   :  { %23811 = vmatprep.subr.bf16.mxu0 %v30349_v27 }
 0x584   :  { %v20594_v60 = vpop.f32.mrb[24].mxu0 }
 0x585   :  { %v27888_v57 = vand.u32 4294901760, %v20594_v60  ;;  %v5155_v21 = vpop.f32.mrb[25].mxu0 }
 0x586   :  { %v27890_v53 = vand.u32 4294901760, %v5155_v21 }
 0x587   :  { %v27893_v1 = vsub.f32 %v20594_v60, %v27888_v57 }
 0x588   :  { %v27896_v11 = vsub.f32 %v5155_v21, %v27890_v53  ;;  %v20597_v13 = vpop.f32.mrb[26].mxu0 }
 0x589   :  { %v29951_v23 = vand.u32 4294901760, %v27893_v1  ;;  %v27899_v2 = vand.u32 4294901760, %v20597_v13  ;;  %v5167_v39 = vpop.f32.mrb[27].mxu0 }
 0x58a   :  { %v29952_v44 = vand.u32 4294901760, %v27896_v11  ;;  %v27902_v0 = vand.u32 4294901760, %v5167_v39 }
 0x58b   :  { %v5885_v54 = vsub.f32 %v27893_v1, %v29951_v23  ;;  %v27908_v40 = vsub.f32 %v20597_v13, %v27899_v2 }
 0x58c   :  { %v27911_v51 = vsub.f32 %v5167_v39, %v27902_v0  ;;  %v5875_v60 = vsub.f32 %v27896_v11, %v29952_v44 }
 0x58d   :  { %v29954_v21 = vand.u32 4294901760, %v27908_v40  ;;  %v5886_v35 = vand.u32 4294901760, %v5885_v54  ;;  %v30351_v54 = vld [vmem:[#allocation55_spill] sm:$0xff] }
 0x58e   :  { %v29955_v5 = vand.u32 4294901760, %v27911_v51  ;;  %v5876_v43 = vand.u32 4294901760, %v5875_v60  ;;  %v30353_v60 = vld [vmem:[#allocation58_spill] sm:$0xff] }
 0x58f   :  { %v5905_v23 = vsub.f32 %v27908_v40, %v29954_v21 }
 0x590   :  { %20714 = vmatprep.mubr.f32.mxu0 %v5876_v43  ;;  %v5895_v13 = vsub.f32 %v27911_v51, %v29955_v5  ;;  %v30352_v43 = vld [vmem:[#allocation56_spill] sm:$0xff] }
 0x591   :  { %20715 = vmatmul.mubr.f32.vlgmr.msra.gmra.mrb[32].mxu0 %v5886_v35  ;;  %v5906_v44 = vand.u32 4294901760, %v5905_v23  ;;  %v30354_v35 = vld [vmem:[#allocation47_spill] sm:$0xff]  ;;  %v30355_v23 = vld [vmem:[#allocation48_spill] sm:$0xff] }
 0x592   :  { %v5896_v39 = vand.u32 4294901760, %v5895_v13  ;;  %23813 = vmatpush3.bf16.msra.mxu0 %v30349_v27  ;;  %v30357_v13 = vld [vmem:[#allocation50_spill] sm:$0xff] }
 0x593   :  { %23815 = vmatprep.subr.bf16.mxu0 %v30350_v32 }
 0x594   :  { %20717 = vmatprep.mubr.f32.mxu0 %v5896_v39 }
 0x595   :  { %20718 = vmatmul.mubr.f32.gmra.mrb[34].mxu0 %v5906_v44  ;;  %v30356_v44 = vld [vmem:[#allocation49_spill] sm:$0xff] }
 0x596   :  { %23817 = vmatpush3.bf16.msra.mxu0 %v30350_v32 }
 0x597   :  { %23819 = vmatprep.subr.bf16.mxu0 %v30351_v54 }
 0x59a   :  { %23821 = vmatpush3.bf16.msra.mxu0 %v30351_v54 }
 0x59b   :  { %23823 = vmatprep.subr.bf16.mxu0 %v30352_v43 }
 0x59e   :  { %23825 = vmatpush3.bf16.msra.mxu0 %v30352_v43 }
 0x59f   :  { %23827 = vmatprep.subr.bf16.mxu0 %v30353_v60 }
 0x5a2   :  { %23829 = vmatpush3.bf16.msra.mxu0 %v30353_v60 }
 0x5a3   :  { %23831 = vmatprep.subr.bf16.mxu0 %v30354_v35 }
 0x5a6   :  { %23833 = vmatpush3.bf16.msra.mxu0 %v30354_v35 }
 0x5a7   :  { %23835 = vmatprep.subr.bf16.mxu0 %v30355_v23 }
 0x5aa   :  { %23837 = vmatpush3.bf16.msra.mxu0 %v30355_v23 }
 0x5ab   :  { %23839 = vmatprep.subr.bf16.mxu0 %v30356_v44 }
 0x5ae   :  { %23841 = vmatpush3.bf16.msra.mxu0 %v30356_v44 }
 0x5af   :  { %23843 = vmatprep.subr.bf16.mxu0 %v30357_v13 }
 0x5b4   :  { %v20678_v39 = vpop.f32.mrb[28].mxu0 }
 0x5b5   :  { %v27940_v21 = vand.u32 4294901760, %v20678_v39  ;;  %v5769_v5 = vpop.f32.mrb[29].mxu0 }
 0x5b6   :  { %v27942_v43 = vand.u32 4294901760, %v5769_v5 }
 0x5b7   :  { %v27945_v60 = vsub.f32 %v20678_v39, %v27940_v21 }
 0x5b8   :  { %v27948_v35 = vsub.f32 %v5769_v5, %v27942_v43  ;;  %v20681_v54 = vpop.f32.mrb[30].mxu0 }
 0x5b9   :  { %v29971_v23 = vand.u32 4294901760, %v27945_v60  ;;  %v27951_v32 = vand.u32 4294901760, %v20681_v54  ;;  %v5781_v44 = vpop.f32.mrb[31].mxu0 }
 0x5ba   :  { %v29975_v27 = vand.u32 4294901760, %v27948_v35  ;;  %v27954_v20 = vand.u32 4294901760, %v5781_v44 }
 0x5bb   :  { %v27957_v49 = vsub.f32 %v20681_v54, %v27951_v32  ;;  %v5925_v39 = vsub.f32 %v27945_v60, %v29971_v23 }
 0x5bc   :  { %v27963_v5 = vsub.f32 %v5781_v44, %v27954_v20  ;;  %v5915_v17 = vsub.f32 %v27948_v35, %v29975_v27  ;;  %v30370_v27 = vand.u32 4294901760, %v27908_v40 }
 0x5bd   :  { %v29973_v46 = vand.u32 4294901760, %v27957_v49  ;;  %v5926_v56 = vand.u32 4294901760, %v5925_v39  ;;  %v30363_v39 = vld [vmem:[#allocation52_spill] sm:$0xff] }
 0x5be   :  { %v29974_v37 = vand.u32 4294901760, %v27963_v5  ;;  %v5916_v61 = vand.u32 4294901760, %v5915_v17  ;;  %v30358_v17 = vld [vmem:[#allocation60_spill] sm:$0xff] }
 0x5bf   :  { %v5945_v54 = vsub.f32 %v27957_v49, %v29973_v46  ;;  %v30366_v46 = vld [vmem:[#allocation83_spill] sm:$0xff] }
 0x5c0   :  { %20720 = vmatprep.mubr.f32.mxu0 %v5916_v61  ;;  %v5935_v44 = vsub.f32 %v27963_v5, %v29974_v37  ;;  %v30361_v61 = vld [vmem:[#allocation63_spill] sm:$0xff]  ;;  %v30369_v37 = vld [vmem:[#allocation84_spill] sm:$0xff] }
 0x5c1   :  { %20721 = vmatmul.mubr.f32.gmra.mrb[36].mxu0 %v5926_v56  ;;  %v5946_v14 = vand.u32 4294901760, %v5945_v54  ;;  %v30359_v56 = vld [vmem:[#allocation61_spill] sm:$0xff] }
 0x5c2   :  { %v5936_v23 = vand.u32 4294901760, %v5935_v44  ;;  %v30364_v54 = vld [vmem:[#allocation53_spill] sm:$0xff]  ;;  %v30365_v44 = vand.u32 4294901760, %v27896_v11 }
 0x5c4   :  { %20723 = vmatprep.mubr.f32.mxu0 %v5936_v23  ;;  %v30362_v23 = vld [vmem:[#allocation51_spill] sm:$0xff] }
 0x5c5   :  { %20724 = vmatmul.mubr.f32.gmra.mrb[38].mxu0 %v5946_v14  ;;  %v30360_v14 = vld [vmem:[#allocation62_spill] sm:$0xff] }
 0x5c6   :  { %20758 = vmatprep.mubr.f32.mxu0 %v27890_v53 }
 0x5c9   :  { %20759 = vmatmul.mubr.f32.vlgmr.msra.gmra.mrb[32].mxu0 %v27888_v57 }
 0x5ca   :  { %23845 = vmatpush3.bf16.msra.mxu0 %v30357_v13  ;;  %20761 = vmatprep.mubr.f32.mxu0 %v27902_v0 }
 0x5cb   :  { %23847 = vmatprep.subr.bf16.mxu0 %v30358_v17 }
 0x5cd   :  { %20762 = vmatmul.mubr.f32.gmra.mrb[34].mxu0 %v27899_v2 }
 0x5ce   :  { %23849 = vmatpush3.bf16.msra.mxu0 %v30358_v17  ;;  %20764 = vmatprep.mubr.f32.mxu0 %v27942_v43 }
 0x5cf   :  { %23851 = vmatprep.subr.bf16.mxu0 %v30359_v56 }
 0x5d1   :  { %20765 = vmatmul.mubr.f32.gmra.mrb[36].mxu0 %v27940_v21 }
 0x5d2   :  { %23853 = vmatpush3.bf16.msra.mxu0 %v30359_v56  ;;  %20767 = vmatprep.mubr.f32.mxu0 %v27954_v20 }
 0x5d3   :  { %23855 = vmatprep.subr.bf16.mxu0 %v30360_v14 }
 0x5d5   :  { %20768 = vmatmul.mubr.f32.gmra.mrb[38].mxu0 %v27951_v32 }
 0x5d6   :  { %23857 = vmatpush3.bf16.msra.mxu0 %v30360_v14  ;;  %20802 = vmatprep.mubr.f32.mxu0 %v27896_v11  ;;  %v30367_v11 = vand.u32 4294901760, %v27893_v1 }
 0x5d7   :  { %23859 = vmatprep.subr.bf16.mxu0 %v30361_v61 }
 0x5da   :  { %23861 = vmatpush3.bf16.msra.mxu0 %v30361_v61 }
 0x5db   :  { %23863 = vmatprep.subr.bf16.mxu0 %v30362_v23 }
 0x5de   :  { %23865 = vmatpush3.bf16.msra.mxu0 %v30362_v23 }
 0x5df   :  { %23867 = vmatprep.subr.bf16.mxu0 %v30363_v39 }
 0x5e2   :  { %23869 = vmatpush3.bf16.msra.mxu0 %v30363_v39  ;;  %v30372_v39 = vld [vmem:[#allocation85_spill] sm:$0xff] }
 0x5e3   :  { %23871 = vmatprep.subr.bf16.mxu0 %v30364_v54 }
 0x5e6   :  { %23873 = vmatpush3.bf16.msra.mxu0 %v30364_v54  ;;  %v30371_v54 = vand.u32 4294901760, %v27948_v35 }
 0x5e7   :  { %23875 = vmatprep.subr.bf16.mxu0 %v30341_v18 }
 0x5e9   :  { %20803 = vmatmul.mubr.f32.vlgmr.msra.gmra.mrb[32].mxu0 %v27893_v1  ;;  %v30373_v1 = vand.u32 4294901760, %v27945_v60 }
 0x5ea   :  { %20805 = vmatprep.mubr.f32.mxu0 %v27911_v51  ;;  %23877 = vmatpush3.bf16.msra.mxu0 %v30341_v18 }
 0x5eb   :  { %23879 = vmatprep.subr.bf16.mxu0 %v30342_v48 }
 0x5ed   :  { %20806 = vmatmul.mubr.f32.gmra.mrb[34].mxu0 %v27908_v40  ;;  %v30376_v40 = vand.u32 4294901760, %v27957_v49 }
 0x5ee   :  { %20808 = vmatprep.mubr.f32.mxu0 %v27948_v35  ;;  %23881 = vmatpush3.bf16.msra.mxu0 %v30342_v48  ;;  %v30379_v35 = vld [vmem:[#allocation89_spill] sm:$0xff] }
 0x5ef   :  { %23883 = vmatprep.subr.bf16.mxu0 %v30343_v29 }
 0x5f1   :  { %20809 = vmatmul.mubr.f32.gmra.mrb[36].mxu0 %v27945_v60  ;;  %v30378_v60 = vld [vmem:[#allocation88_spill] sm:$0xff] }
 0x5f2   :  { %20811 = vmatprep.mubr.f32.mxu0 %v27963_v5  ;;  %23885 = vmatpush3.bf16.msra.mxu0 %v30343_v29 }
 0x5f3   :  { %23887 = vmatprep.subr.bf16.mxu0 %v30344_v25 }
 0x5f5   :  { %20812 = vmatmul.mubr.f32.gmra.mrb[38].mxu0 %v27957_v49 }
 0x5f6   :  { %23889 = vmatpush3.bf16.msra.mxu0 %v30344_v25  ;;  %20846 = vmatprep.mubr.f32.mxu0 %v30365_v44  ;;  %v30368_v44 = vand.u32 4294901760, %v27911_v51  ;;  %v30374_v51 = vand.u32 4294901760, %v27963_v5  ;;  %v30380_v5 = vld [vmem:[#allocation90_spill] sm:$0xff] }
 0x5f7   :  { %23891 = vmatprep.subr.bf16.mxu0 %v30345_v38 }
 0x5fa   :  { %23893 = vmatpush3.bf16.msra.mxu0 %v30345_v38 }
 0x5fb   :  { %23895 = vmatprep.subr.bf16.mxu0 %v30346_v41 }
 0x5fe   :  { %23897 = vmatpush3.bf16.msra.mxu0 %v30346_v41 }
 0x5ff   :  { %23899 = vmatprep.subr.bf16.mxu0 %v30347_v42 }
 0x602   :  { %23901 = vmatpush3.bf16.msra.mxu0 %v30347_v42 }
 0x603   :  { %23903 = vmatprep.subr.bf16.mxu0 %v30348_v15 }
 0x606   :  { %23905 = vmatpush3.bf16.msra.mxu0 %v30348_v15 }
 0x607   :  { %23907 = vmatprep.subr.bf16.mxu0 %v30366_v46 }
 0x609   :  { %20847 = vmatmul.mubr.f32.vlgmr.msra.gmra.mrb[32].mxu0 %v30367_v11  ;;  %v30375_v11 = vld [vmem:[#allocation86_spill] sm:$0xff] }
 0x60a   :  { %20849 = vmatprep.mubr.f32.mxu0 %v30368_v44  ;;  %23909 = vmatpush3.bf16.msra.mxu0 %v30366_v46 }
 0x60b   :  { %23911 = vmatprep.subr.bf16.mxu0 %v30369_v37 }
 0x60d   :  { %20850 = vmatmul.mubr.f32.gmra.mrb[34].mxu0 %v30370_v27  ;;  %v30377_v27 = vld [vmem:[#allocation87_spill] sm:$0xff] }
 0x60e   :  { %20852 = vmatprep.mubr.f32.mxu0 %v30371_v54  ;;  %23913 = vmatpush3.bf16.msra.mxu0 %v30369_v37 }
 0x60f   :  { %23915 = vmatprep.subr.bf16.mxu0 %v30372_v39 }
 0x611   :  { %20853 = vmatmul.mubr.f32.gmra.mrb[36].mxu0 %v30373_v1 }
 0x612   :  { %20855 = vmatprep.mubr.f32.mxu0 %v30374_v51  ;;  %23917 = vmatpush3.bf16.msra.mxu0 %v30372_v39 }
 0x613   :  { %23919 = vmatprep.subr.bf16.mxu0 %v30375_v11 }
 0x615   :  { %20856 = vmatmul.mubr.f32.gmra.mrb[38].mxu0 %v30376_v40 }
 0x616   :  { %23921 = vmatpush3.bf16.msra.mxu0 %v30375_v11  ;;  %20890 = vmatprep.mubr.f32.mxu0 %v27890_v53 }
 0x617   :  { %23923 = vmatprep.subr.bf16.mxu0 %v30377_v27 }
 0x61a   :  { %23925 = vmatpush3.bf16.msra.mxu0 %v30377_v27 }
 0x61b   :  { %23927 = vmatprep.subr.bf16.mxu0 %v30378_v60 }
 0x61e   :  { %23929 = vmatpush3.bf16.msra.mxu0 %v30378_v60 }
 0x61f   :  { %23931 = vmatprep.subr.bf16.mxu0 %v30379_v35 }
 0x622   :  { %23933 = vmatpush3.bf16.msra.mxu0 %v30379_v35 }
 0x623   :  { %23935 = vmatprep.subr.bf16.mxu0 %v30380_v5 }
 0x626   :  { %23937 = vmatpush3.bf16.msra.mxu0 %v30380_v5 }
 0x627   :  { %23939 = vmatprep.subr.bf16.mxu0 %v30341_v18 }
 0x629   :  { %20891 = vmatmul.mubr.f32.vlgmr.msra.gmra.mrb[32].mxu0 %v27888_v57 }
 0x62a   :  { %20893 = vmatprep.mubr.f32.mxu0 %v27902_v0  ;;  %23941 = vmatpush3.bf16.msra.mxu0 %v30341_v18 }
 0x62b   :  { %23943 = vmatprep.subr.bf16.mxu0 %v30342_v48 }
 0x62d   :  { %20894 = vmatmul.mubr.f32.gmra.mrb[34].mxu0 %v27899_v2 }
 0x62e   :  { %20896 = vmatprep.mubr.f32.mxu0 %v27942_v43  ;;  %23945 = vmatpush3.bf16.msra.mxu0 %v30342_v48  ;;  %v30382_v48 = vld [vmem:[#allocation77_spill] sm:$0xff] }
 0x62f   :  { %23947 = vmatprep.subr.bf16.mxu0 %v30343_v29 }
 0x631   :  { %20897 = vmatmul.mubr.f32.gmra.mrb[36].mxu0 %v27940_v21 }
 0x632   :  { %20899 = vmatprep.mubr.f32.mxu0 %v27954_v20  ;;  %23949 = vmatpush3.bf16.msra.mxu0 %v30343_v29 }
 0x633   :  { %23951 = vmatprep.subr.bf16.mxu0 %v30344_v25 }
 0x635   :  { %20900 = vmatmul.mubr.f32.gmra.mrb[38].mxu0 %v27951_v32 }
 0x636   :  { %23953 = vmatpush3.bf16.msra.mxu0 %v30344_v25  ;;  %20934 = vmatprep.mubr.f32.mxu0 %v27890_v53 }
 0x637   :  { %23955 = vmatprep.subr.bf16.mxu0 %v30345_v38 }
 0x63a   :  { %23957 = vmatpush3.bf16.msra.mxu0 %v30345_v38 }
 0x63b   :  { %23959 = vmatprep.subr.bf16.mxu0 %v30346_v41 }
 0x63e   :  { %23961 = vmatpush3.bf16.msra.mxu0 %v30346_v41 }
 0x63f   :  { %23963 = vmatprep.subr.bf16.mxu0 %v30347_v42 }
 0x642   :  { %23965 = vmatpush3.bf16.msra.mxu0 %v30347_v42 }
 0x643   :  { %23967 = vmatprep.subr.bf16.mxu0 %v30348_v15 }
 0x646   :  { %23969 = vmatpush3.bf16.msra.mxu0 %v30348_v15 }
 0x649   :  { %20935 = vmatmul.mubr.f32.vlgmr.msra.gmra.mrb[32].mxu0 %v27888_v57 }
 0x64a   :  { %20937 = vmatprep.mubr.f32.mxu0 %v27902_v0 }
 0x64d   :  { %20938 = vmatmul.mubr.f32.gmra.mrb[34].mxu0 %v27899_v2 }
 0x64e   :  { %20940 = vmatprep.mubr.f32.mxu0 %v27942_v43 }
 0x651   :  { %20941 = vmatmul.mubr.f32.gmra.mrb[36].mxu0 %v27940_v21 }
 0x652   :  { %20943 = vmatprep.mubr.f32.mxu0 %v27954_v20 }
 0x655   :  { %20944 = vmatmul.mubr.f32.gmra.mrb[38].mxu0 %v27951_v32 }
 0x656   :  { %21386 = vmatprep.mubr.f32.mxu0 %v30265_v30  ;;  %v30384_v30 = vld [vmem:[#allocation80_spill] sm:$0xff] }
 0x71c   :  { %v20936_v49 = vpop.f32.mrb[32].mxu0 }
 0x71d   :  { %v28088_v53 = vand.u32 4294901760, %v20936_v49  ;;  %v6687_v54 = vpop.f32.mrb[33].mxu0 }
 0x71e   :  { %v28090_v44 = vand.u32 4294901760, %v6687_v54 }
 0x71f   :  { %v28093_v57 = vsub.f32 %v20936_v49, %v28088_v53 }
 0x720   :  { %v28096_v2 = vsub.f32 %v6687_v54, %v28090_v44  ;;  %v20939_v0 = vpop.f32.mrb[34].mxu0 }
 0x721   :  { %v28099_v21 = vand.u32 4294901760, %v28093_v57  ;;  %v28101_v20 = vand.u32 4294901760, %v20939_v0  ;;  %v6699_v32 = vpop.f32.mrb[35].mxu0 }
 0x722   :  { %v28103_v43 = vand.u32 4294901760, %v6699_v32  ;;  %v28106_v1 = vand.u32 4294901760, %v28096_v2 }
 0x723   :  { %v6827_v51 = vsub.f32 %v28093_v57, %v28099_v21  ;;  %v28111_v40 = vsub.f32 %v20939_v0, %v28101_v20 }
 0x724   :  { %v28114_v49 = vsub.f32 %v6699_v32, %v28103_v43  ;;  %v20942_v54 = vpop.f32.mrb[36].mxu0  ;;  %v6817_v5 = vsub.f32 %v28096_v2, %v28106_v1 }
 0x725   :  { %v6828_v35 = vand.u32 4294901760, %v6827_v51  ;;  %v28118_v60 = vand.u32 4294901760, %v20942_v54  ;;  %v6711_v27 = vpop.f32.mrb[37].mxu0  ;;  %v28121_v11 = vand.u32 4294901760, %v28111_v40 }
 0x726   :  { %v28123_v39 = vand.u32 4294901760, %v6711_v27  ;;  %v6818_v37 = vand.u32 4294901760, %v6817_v5  ;;  %v28126_v0 = vand.u32 4294901760, %v28114_v49 }
 0x727   :  { %v28129_v32 = vsub.f32 %v20942_v54, %v28118_v60  ;;  %v6847_v46 = vsub.f32 %v28111_v40, %v28121_v11 }
 0x728   :  { %v28134_v51 = vsub.f32 %v6711_v27, %v28123_v39  ;;  %v20945_v23 = vpop.f32.mrb[38].mxu0  ;;  %20978 = vmatprep.mubr.f32.mxu1 %v6818_v37  ;;  %v6837_v61 = vsub.f32 %v28114_v49, %v28126_v0  ;;  %v28138_v14 = vpack.c.bf16 %v6828_v35, %v6818_v37  ;;  %v30381_v37 = vld [vmem:[#allocation76_spill] sm:$0xff] }
 0x729   :  { %v28140_v5 = vand.u32 4294901760, %v20945_v23  ;;  %v6723_v56 = vpop.f32.mrb[39].mxu0  ;;  %20979 = vmatmul.mubr.f32.vlgmr.msra.gmra.mrb[12].mxu1 %v6828_v35  ;;  %v6848_v17 = vand.u32 4294901760, %v6847_v46  ;;  %v28143_v54 = vand.u32 4294901760, %v28129_v32 }
 0x72a   :  { %v28145_v13 = vand.u32 4294901760, %v6723_v56  ;;  %24005 = vmatpush3.bf16.msra.mxu1 %v30308_v4  ;;  %v6838_v27 = vand.u32 4294901760, %v6837_v61  ;;  %v28149_v15 = vand.u32 4294901760, %v28134_v51 }
 0x72b   :  { %v28152_v42 = vsub.f32 %v20945_v23, %v28140_v5  ;;  %24007 = vmatprep.subr.bf16.mxu1 %v30381_v37  ;;  %v6867_v35 = vsub.f32 %v28129_v32, %v28143_v54 }
 0x72c   :  { %v28158_v46 = vsub.f32 %v6723_v56, %v28145_v13  ;;  %20981 = vmatprep.mubr.f32.mxu1 %v6838_v27  ;;  %v6857_v41 = vsub.f32 %v28134_v51, %v28149_v15  ;;  %v28162_v38 = vpack.c.bf16 %v6848_v17, %v6838_v27 }
 0x72d   :  { %20982 = vmatmul.mubr.f32.gmra.mrb[14].mxu1 %v6848_v17  ;;  %v6868_v61 = vand.u32 4294901760, %v6867_v35  ;;  %v28165_v25 = vand.u32 4294901760, %v28152_v42 }
 0x72e   :  { %24009 = vmatpush3.bf16.msra.mxu1 %v30381_v37  ;;  %v6858_v23 = vand.u32 4294901760, %v6857_v41  ;;  %v28169_v29 = vand.u32 4294901760, %v28158_v46  ;;  %v30383_v41 = vld [vmem:[#allocation79_spill] sm:$0xff] }
 0x72f   :  { %24011 = vmatprep.subr.bf16.mxu1 %v30382_v48  ;;  %v6887_v56 = vsub.f32 %v28152_v42, %v28165_v25 }
 0x730   :  { %20984 = vmatprep.mubr.f32.mxu1 %v6858_v23  ;;  %v6877_v27 = vsub.f32 %v28158_v46, %v28169_v29  ;;  %v28176_v17 = vpack.c.bf16 %v6868_v61, %v6858_v23  ;;  %v30385_v23 = vld [vmem:[#allocation81_spill] sm:$0xff] }
 0x731   :  { %20985 = vmatmul.mubr.f32.gmra.mrb[16].mxu1 %v6868_v61  ;;  %v6888_v35 = vand.u32 4294901760, %v6887_v56  ;;  %v30386_v61 = vld [vmem:[#allocation82_spill] sm:$0xff]  ;;  %v30387_v56 = vld [vmem:[#allocation59_spill] sm:$0xff] }
 0x732   :  { %24013 = vmatpush3.bf16.msra.mxu1 %v30382_v48  ;;  %v6878_v37 = vand.u32 4294901760, %v6877_v27  ;;  %v30389_v27 = vld [vmem:[#allocation73_spill] sm:$0xff] }
 0x733   :  { %24015 = vmatprep.subr.bf16.mxu1 %v30383_v41 }
 0x734   :  { %20987 = vmatprep.mubr.f32.mxu1 %v6878_v37  ;;  %v28180_v18 = vpack.c.bf16 %v6888_v35, %v6878_v37  ;;  %v30388_v37 = vld [vmem:[#allocation57_spill] sm:$0xff] }
 0x735   :  { %20988 = vmatmul.mubr.f32.gmra.mrb[18].mxu1 %v6888_v35  ;;  %v30390_v35 = vld [vmem:[#allocation66_spill] sm:$0xff] }
 0x736   :  { %24017 = vmatpush3.bf16.msra.mxu1 %v30383_v41  ;;  %21022 = vmatprep.mubr.f32.mxu1 %v28090_v44 }
 0x737   :  { %24019 = vmatprep.subr.bf16.mxu1 %v30384_v30 }
 0x73a   :  { %24021 = vmatpush3.bf16.msra.mxu1 %v30384_v30 }
 0x73b   :  { %24023 = vmatprep.subr.bf16.mxu1 %v30385_v23 }
 0x73e   :  { %24025 = vmatpush3.bf16.msra.mxu1 %v30385_v23 }
 0x73f   :  { %24027 = vmatprep.subr.bf16.mxu1 %v30386_v61 }
 0x742   :  { %24029 = vmatpush3.bf16.msra.mxu1 %v30386_v61 }
 0x743   :  { %24031 = vmatprep.subr.bf16.mxu1 %v30387_v56 }
 0x746   :  { %24033 = vmatpush3.bf16.msra.mxu1 %v30387_v56  ;;  %v30391_v56 = vld [vmem:[#allocation72_spill] sm:$0xff] }
 0x747   :  { %24035 = vmatprep.subr.bf16.mxu1 %v30388_v37 }
 0x749   :  { %21023 = vmatmul.mubr.f32.vlgmr.msra.gmra.mrb[12].mxu1 %v28088_v53 }
 0x74a   :  { %21025 = vmatprep.mubr.f32.mxu1 %v28103_v43  ;;  %24037 = vmatpush3.bf16.msra.mxu1 %v30388_v37 }
 0x74b   :  { %24039 = vmatprep.subr.bf16.mxu1 %v30389_v27 }
 0x74d   :  { %21026 = vmatmul.mubr.f32.gmra.mrb[14].mxu1 %v28101_v20 }
 0x74e   :  { %21028 = vmatprep.mubr.f32.mxu1 %v28123_v39  ;;  %24041 = vmatpush3.bf16.msra.mxu1 %v30389_v27 }
 0x74f   :  { %24043 = vmatprep.subr.bf16.mxu1 %v30390_v35 }
 0x751   :  { %21029 = vmatmul.mubr.f32.gmra.mrb[16].mxu1 %v28118_v60 }
 0x752   :  { %21031 = vmatprep.mubr.f32.mxu1 %v28145_v13  ;;  %24045 = vmatpush3.bf16.msra.mxu1 %v30390_v35 }
 0x753   :  { %24047 = vmatprep.subr.bf16.mxu1 %v30391_v56 }
 0x755   :  { %21032 = vmatmul.mubr.f32.gmra.mrb[18].mxu1 %v28140_v5 }
 0x756   :  { %24049 = vmatpush3.bf16.msra.mxu1 %v30391_v56  ;;  %21066 = vmatprep.mubr.f32.mxu1 %v28096_v2 }
 0x757   :  { %24051 = vmatprep.subr.bf16.mxu1 %v27395_v19 }
 0x75a   :  { %24053 = vmatpush3.bf16.msra.mxu1 %v27395_v19 }
 0x75b   :  { %24055 = vmatprep.subr.bf16.mxu1 %v27417_v9 }
 0x75e   :  { %24057 = vmatpush3.bf16.msra.mxu1 %v27417_v9 }
 0x75f   :  { %24059 = vmatprep.subr.bf16.mxu1 %v27436_v47 }
 0x762   :  { %24061 = vmatpush3.bf16.msra.mxu1 %v27436_v47 }
 0x763   :  { %24063 = vmatprep.subr.bf16.mxu1 %v27258_v33 }
 0x766   :  { %24065 = vmatpush3.bf16.msra.mxu1 %v27258_v33 }
 0x767   :  { %24067 = vmatprep.subr.bf16.mxu1 %v30234_v34 }
 0x769   :  { %21067 = vmatmul.mubr.f32.vlgmr.msra.gmra.mrb[12].mxu1 %v28093_v57 }
 0x76a   :  { %21069 = vmatprep.mubr.f32.mxu1 %v28114_v49  ;;  %24069 = vmatpush3.bf16.msra.mxu1 %v30234_v34 }
 0x76b   :  { %24071 = vmatprep.subr.bf16.mxu1 %v30235_v36 }
 0x76d   :  { %21070 = vmatmul.mubr.f32.gmra.mrb[14].mxu1 %v28111_v40 }
 0x76e   :  { %21072 = vmatprep.mubr.f32.mxu1 %v28134_v51  ;;  %24073 = vmatpush3.bf16.msra.mxu1 %v30235_v36 }
 0x76f   :  { %24075 = vmatprep.subr.bf16.mxu1 %v30236_v55 }
 0x771   :  { %21073 = vmatmul.mubr.f32.gmra.mrb[16].mxu1 %v28129_v32 }
 0x772   :  { %21075 = vmatprep.mubr.f32.mxu1 %v28158_v46  ;;  %24077 = vmatpush3.bf16.msra.mxu1 %v30236_v55 }
 0x773   :  { %24079 = vmatprep.subr.bf16.mxu1 %v30237_v8 }
 0x775   :  { %21076 = vmatmul.mubr.f32.gmra.mrb[18].mxu1 %v28152_v42 }
 0x776   :  { %24081 = vmatpush3.bf16.msra.mxu1 %v30237_v8  ;;  %21110 = vmatprep.mubr.f32.mxu1 %v28106_v1 }
 0x777   :  { %24083 = vmatprep.subr.bf16.mxu1 %v30238_v6 }
 0x77a   :  { %24085 = vmatpush3.bf16.msra.mxu1 %v30238_v6 }
 0x77b   :  { %24087 = vmatprep.subr.bf16.mxu1 %v27029_v52 }
 0x77e   :  { %24089 = vmatpush3.bf16.msra.mxu1 %v27029_v52 }
 0x77f   :  { %24091 = vmatprep.subr.bf16.mxu1 %v27056_v7 }
 0x782   :  { %24093 = vmatpush3.bf16.msra.mxu1 %v27056_v7 }
 0x783   :  { %24095 = vmatprep.subr.bf16.mxu1 %v27246_v22 }
 0x786   :  { %24097 = vmatpush3.bf16.msra.mxu1 %v27246_v22 }
 0x787   :  { %24099 = vmatprep.subr.bf16.mxu1 %v27478_v26 }
 0x789   :  { %21111 = vmatmul.mubr.f32.vlgmr.msra.gmra.mrb[12].mxu1 %v28099_v21 }
 0x78a   :  { %21113 = vmatprep.mubr.f32.mxu1 %v28126_v0  ;;  %24101 = vmatpush3.bf16.msra.mxu1 %v27478_v26 }
 0x78b   :  { %24103 = vmatprep.subr.bf16.mxu1 %v27486_v28 }
 0x78d   :  { %21114 = vmatmul.mubr.f32.gmra.mrb[14].mxu1 %v28121_v11 }
 0x78e   :  { %21116 = vmatprep.mubr.f32.mxu1 %v28149_v15  ;;  %24105 = vmatpush3.bf16.msra.mxu1 %v27486_v28  ;;  %v30404_v28 = vld [vmem:[#allocation115_spill] sm:$0xff] }
 0x78f   :  { %24107 = vmatprep.subr.bf16.mxu1 %v27496_v24 }
 0x791   :  { %21117 = vmatmul.mubr.f32.gmra.mrb[16].mxu1 %v28143_v54 }
 0x792   :  { %21119 = vmatprep.mubr.f32.mxu1 %v28169_v29  ;;  %24109 = vmatpush3.bf16.msra.mxu1 %v27496_v24  ;;  %v30403_v24 = vld [vmem:[#allocation114_spill] sm:$0xff] }
 0x793   :  { %24111 = vmatprep.subr.bf16.mxu1 %v27506_v3 }
 0x795   :  { %21120 = vmatmul.mubr.f32.gmra.mrb[18].mxu1 %v28165_v25 }
 0x796   :  { %24113 = vmatpush3.bf16.msra.mxu1 %v27506_v3  ;;  %21154 = vmatprep.mubr.f32.mxu1 %v28090_v44  ;;  %v30397_v3 = vld [vmem:[#allocation106_spill] sm:$0xff] }
 0x797   :  { %24115 = vmatprep.subr.bf16.mxu1 %v27516_v50 }
 0x79a   :  { %24117 = vmatpush3.bf16.msra.mxu1 %v27516_v50  ;;  %v30396_v50 = vld [vmem:[#allocation109_spill] sm:$0xff] }
 0x79b   :  { %24119 = vmatprep.subr.bf16.mxu1 %v27526_v31 }
 0x79e   :  { %24121 = vmatpush3.bf16.msra.mxu1 %v27526_v31  ;;  %v24182_v31 = vpack.c.bf16 %v28111_v40, %v28114_v49  ;;  %v24194_v40 = vpack.c.bf16 %v28099_v21, %v28106_v1  ;;  %v30401_v49 = vld [vmem:[#allocation110_spill] sm:$0xff]  ;;  %v24210_v21 = vpack.c.bf16 %v28118_v60, %v28123_v39 }
 0x79f   :  { %24123 = vmatprep.subr.bf16.mxu1 %v27534_v12 }
 0x7a2   :  { %24125 = vmatpush3.bf16.msra.mxu1 %v27534_v12  ;;  %v24166_v12 = vpack.c.bf16 %v28101_v20, %v28103_v43 }
 0x7a3   :  { %24127 = vmatprep.subr.bf16.mxu1 %v27542_v16 }
 0x7a6   :  { %24129 = vmatpush3.bf16.msra.mxu1 %v27542_v16  ;;  %v24162_v16 = vpack.c.bf16 %v28088_v53, %v28090_v44 }
 0x7a7   :  { %24131 = vmatprep.subr.bf16.mxu1 %v30234_v34 }
 0x7a9   :  { %21155 = vmatmul.mubr.f32.vlgmr.msra.gmra.mrb[12].mxu1 %v28088_v53 }
 0x7aa   :  { %21157 = vmatprep.mubr.f32.mxu1 %v28103_v43  ;;  %24133 = vmatpush3.bf16.msra.mxu1 %v30234_v34 }
 0x7ab   :  { %24135 = vmatprep.subr.bf16.mxu1 %v30235_v36 }
 0x7ad   :  { %21158 = vmatmul.mubr.f32.gmra.mrb[14].mxu1 %v28101_v20 }
 0x7ae   :  { %21160 = vmatprep.mubr.f32.mxu1 %v28123_v39  ;;  %24137 = vmatpush3.bf16.msra.mxu1 %v30235_v36 }
 0x7af   :  { %24139 = vmatprep.subr.bf16.mxu1 %v30236_v55 }
 0x7b1   :  { %21161 = vmatmul.mubr.f32.gmra.mrb[16].mxu1 %v28118_v60 }
 0x7b2   :  { %21163 = vmatprep.mubr.f32.mxu1 %v28145_v13  ;;  %24141 = vmatpush3.bf16.msra.mxu1 %v30236_v55 }
 0x7b3   :  { %24143 = vmatprep.subr.bf16.mxu1 %v30237_v8 }
 0x7b5   :  { %21164 = vmatmul.mubr.f32.gmra.mrb[18].mxu1 %v28140_v5 }
 0x7b6   :  { %24145 = vmatpush3.bf16.msra.mxu1 %v30237_v8  ;;  %21198 = vmatprep.mubr.f32.mxu1 %v28090_v44  ;;  %v24178_v44 = vpack.c.bf16 %v28093_v57, %v28096_v2  ;;  %v30398_v57 = vld [vmem:[#allocation108_spill] sm:$0xff]  ;;  %v30400_v2 = vld [vmem:[#allocation113_spill] sm:$0xff] }
 0x7b7   :  { %24147 = vmatprep.subr.bf16.mxu1 %v30238_v6 }
 0x7ba   :  { %24149 = vmatpush3.bf16.msra.mxu1 %v30238_v6 }
 0x7bb   :  { %24151 = vmatprep.subr.bf16.mxu1 %v27029_v52 }
 0x7be   :  { %24153 = vmatpush3.bf16.msra.mxu1 %v27029_v52 }
 0x7bf   :  { %24155 = vmatprep.subr.bf16.mxu1 %v27056_v7 }
 0x7c2   :  { %24157 = vmatpush3.bf16.msra.mxu1 %v27056_v7 }
 0x7c3   :  { %24159 = vmatprep.subr.bf16.mxu1 %v27246_v22 }
 0x7c6   :  { %24161 = vmatpush3.bf16.msra.mxu1 %v27246_v22 }
 0x7c7   :  { %24163 = vmatprep.subr.bf16.mxu1 %v24162_v16 }
 0x7c9   :  { %21199 = vmatmul.mubr.f32.vlgmr.msra.gmra.mrb[12].mxu1 %v28088_v53  ;;  %v30392_v53 = vld [vmem:[#allocation118_spill] sm:$0xff] }
 0x7ca   :  { %21201 = vmatprep.mubr.f32.mxu1 %v28103_v43  ;;  %24165 = vmatpush3.bf16.msra.mxu1 %v24162_v16  ;;  %v30394_v43 = vld [vmem:[#allocation105_spill] sm:$0xff] }
 0x7cb   :  { %24167 = vmatprep.subr.bf16.mxu1 %v24166_v12 }
 0x7cd   :  { %21202 = vmatmul.mubr.f32.gmra.mrb[14].mxu1 %v28101_v20  ;;  %v30393_v20 = vld [vmem:[#allocation104_spill] sm:$0xff] }
 0x7ce   :  { %21204 = vmatprep.mubr.f32.mxu1 %v28123_v39  ;;  %24169 = vmatpush3.bf16.msra.mxu1 %v24166_v12 }
 0x7cf   :  { %24171 = vmatprep.subr.bf16.mxu1 %v28138_v14 }
 0x7d1   :  { %21205 = vmatmul.mubr.f32.gmra.mrb[16].mxu1 %v28118_v60 }
 0x7d2   :  { %21207 = vmatprep.mubr.f32.mxu1 %v28145_v13 }
 0x7d5   :  { %21208 = vmatmul.mubr.f32.gmra.mrb[18].mxu1 %v28140_v5 }
 0x7d6   :  { %21218 = vmatprep.mubr.f32.mxu1 %v27630_v59 }
 0x7d9   :  { %21219 = vmatmul.mubr.f32.vlgmr.msra.gmra.mrb[12].mxu1 %v27635_v62 }
 0x7da   :  { %24173 = vmatpush3.bf16.msra.mxu1 %v28138_v14  ;;  %21221 = vmatprep.mubr.f32.mxu1 %v27640_v10  ;;  %v30395_v14 = vld [vmem:[#allocation107_spill] sm:$0xff] }
 0x7db   :  { %24175 = vmatprep.subr.bf16.mxu1 %v28162_v38 }
 0x7dd   :  { %21222 = vmatmul.mubr.f32.gmra.mrb[14].mxu1 %v30392_v53 }
 0x7de   :  { %24177 = vmatpush3.bf16.msra.mxu1 %v28162_v38  ;;  %21232 = vmatprep.mubr.f32.mxu1 %v30393_v20  ;;  %v30399_v38 = vld [vmem:[#allocation111_spill] sm:$0xff] }
 0x7df   :  { %24179 = vmatprep.subr.bf16.mxu1 %v24178_v44 }
 0x7e1   :  { %21233 = vmatmul.mubr.f32.vlgmr.msra.gmra.mrb[12].mxu1 %v30394_v43 }
 0x7e2   :  { %24181 = vmatpush3.bf16.msra.mxu1 %v24178_v44  ;;  %21235 = vmatprep.mubr.f32.mxu1 %v30395_v14  ;;  %v30402_v44 = vld [vmem:[#allocation112_spill] sm:$0xff] }
 0x7e3   :  { %24183 = vmatprep.subr.bf16.mxu1 %v24182_v31 }
 0x7e5   :  { %21236 = vmatmul.mubr.f32.gmra.mrb[14].mxu1 %v30396_v50 }
 0x7e6   :  { %24185 = vmatpush3.bf16.msra.mxu1 %v24182_v31  ;;  %21246 = vmatprep.mubr.f32.mxu1 %v30397_v3  ;;  %v24198_v31 = vpack.c.bf16 %v28121_v11, %v28126_v0  ;;  %v24214_v11 = vpack.c.bf16 %v28140_v5, %v28145_v13 }
 0x7e7   :  { %24187 = vmatprep.subr.bf16.mxu1 %v24162_v16 }
 0x7e9   :  { %21247 = vmatmul.mubr.f32.vlgmr.msra.gmra.mrb[12].mxu1 %v30398_v57 }
 0x7ea   :  { %24189 = vmatpush3.bf16.msra.mxu1 %v24162_v16  ;;  %21249 = vmatprep.mubr.f32.mxu1 %v30399_v38 }
 0x7eb   :  { %24191 = vmatprep.subr.bf16.mxu1 %v24166_v12 }
 0x7ed   :  { %21250 = vmatmul.mubr.f32.gmra.mrb[14].mxu1 %v30400_v2 }
 0x7ee   :  { %24193 = vmatpush3.bf16.msra.mxu1 %v24166_v12  ;;  %21260 = vmatprep.mubr.f32.mxu1 %v30401_v49 }
 0x7ef   :  { %24195 = vmatprep.subr.bf16.mxu1 %v24194_v40 }
 0x7f1   :  { %21261 = vmatmul.mubr.f32.vlgmr.msra.gmra.mrb[12].mxu1 %v30402_v44 }
 0x7f2   :  { %24197 = vmatpush3.bf16.msra.mxu1 %v24194_v40  ;;  %21263 = vmatprep.mubr.f32.mxu1 %v30403_v24 }
 0x7f3   :  { %24199 = vmatprep.subr.bf16.mxu1 %v24198_v31 }
 0x7f5   :  { %21264 = vmatmul.mubr.f32.gmra.mrb[14].mxu1 %v30404_v28 }
 0x7f6   :  { %24201 = vmatpush3.bf16.msra.mxu1 %v24198_v31  ;;  %21274 = vmatprep.mubr.f32.mxu1 %v30393_v20 }
 0x7f7   :  { %24203 = vmatprep.subr.bf16.mxu1 %v24162_v16 }
 0x7f9   :  { %21275 = vmatmul.mubr.f32.vlgmr.msra.gmra.mrb[12].mxu1 %v30394_v43 }
 0x7fa   :  { %24205 = vmatpush3.bf16.msra.mxu1 %v24162_v16  ;;  %21277 = vmatprep.mubr.f32.mxu1 %v30395_v14  ;;  %v24230_v16 = vpack.c.bf16 %v28152_v42, %v28158_v46  ;;  %v24246_v42 = vpack.c.bf16 %v28165_v25, %v28169_v29  ;;  %v28395_v29 = vstv %s2355_s19  ;;  %v26092_v46 = vld [vmem:[#allocation14] sm:$0xff] }
 0x7fb   :  { %24207 = vmatprep.subr.bf16.mxu1 %v24166_v12  ;;  %30405 = vst [vmem:[#allocation36_spill] sm:$0xff] %v28395_v29 }
 0x7fd   :  { %21278 = vmatmul.mubr.f32.gmra.mrb[14].mxu1 %v30396_v50 }
 0x7fe   :  { %24209 = vmatpush3.bf16.msra.mxu1 %v24166_v12  ;;  %21288 = vmatprep.mubr.f32.mxu1 %v30393_v20  ;;  %v24226_v12 = vpack.c.bf16 %v28129_v32, %v28134_v51  ;;  %v26091_v32 = vld [vmem:[#allocation14 + $0x8] sm:$0xff] }
 0x7ff   :  { %24211 = vmatprep.subr.bf16.mxu1 %v24210_v21 }
 0x801   :  { %21289 = vmatmul.mubr.f32.vlgmr.msra.gmra.mrb[12].mxu1 %v30394_v43 }
 0x802   :  { %24213 = vmatpush3.bf16.msra.mxu1 %v24210_v21  ;;  %21291 = vmatprep.mubr.f32.mxu1 %v30395_v14 }
 0x803   :  { %24215 = vmatprep.subr.bf16.mxu1 %v24214_v11 }
 0x805   :  { %21292 = vmatmul.mubr.f32.gmra.mrb[14].mxu1 %v30396_v50 }
 0x806   :  { %24217 = vmatpush3.bf16.msra.mxu1 %v24214_v11  ;;  %21302 = vmatprep.mubr.f32.mxu1 %v27630_v59 }
 0x807   :  { %24219 = vmatprep.subr.bf16.mxu1 %v28176_v17 }
 0x809   :  { %21303 = vmatmul.mubr.f32.vlgmr.msra.gmra.mrb[16].mxu1 %v27635_v62 }
 0x80a   :  { %24221 = vmatpush3.bf16.msra.mxu1 %v28176_v17  ;;  %21305 = vmatprep.mubr.f32.mxu1 %v27640_v10 }
 0x80b   :  { %24223 = vmatprep.subr.bf16.mxu1 %v28180_v18 }
 0x80d   :  { %21306 = vmatmul.mubr.f32.gmra.mrb[18].mxu1 %v30392_v53 }
 0x80e   :  { %24225 = vmatpush3.bf16.msra.mxu1 %v28180_v18  ;;  %21316 = vmatprep.mubr.f32.mxu1 %v30393_v20  ;;  %v24242_v18 = vpack.c.bf16 %v28143_v54, %v28149_v15 }
 0x80f   :  { %24227 = vmatprep.subr.bf16.mxu1 %v24226_v12 }
 0x811   :  { %21317 = vmatmul.mubr.f32.vlgmr.msra.gmra.mrb[16].mxu1 %v30394_v43 }
 0x812   :  { %24229 = vmatpush3.bf16.msra.mxu1 %v24226_v12  ;;  %21319 = vmatprep.mubr.f32.mxu1 %v30395_v14 }
 0x813   :  { %24231 = vmatprep.subr.bf16.mxu1 %v24230_v16 }
 0x815   :  { %21320 = vmatmul.mubr.f32.gmra.mrb[18].mxu1 %v30396_v50 }
 0x816   :  { %24233 = vmatpush3.bf16.msra.mxu1 %v24230_v16  ;;  %21330 = vmatprep.mubr.f32.mxu1 %v30397_v3 }
 0x817   :  { %24235 = vmatprep.subr.bf16.mxu1 %v24210_v21 }
 0x819   :  { %21331 = vmatmul.mubr.f32.vlgmr.msra.gmra.mrb[16].mxu1 %v30398_v57 }
 0x81a   :  { %24237 = vmatpush3.bf16.msra.mxu1 %v24210_v21  ;;  %21333 = vmatprep.mubr.f32.mxu1 %v30399_v38 }
 0x81b   :  { %24239 = vmatprep.subr.bf16.mxu1 %v24214_v11 }
 0x81d   :  { %21334 = vmatmul.mubr.f32.gmra.mrb[18].mxu1 %v30400_v2 }
 0x81e   :  { %24241 = vmatpush3.bf16.msra.mxu1 %v24214_v11  ;;  %21344 = vmatprep.mubr.f32.mxu1 %v30401_v49 }
 0x81f   :  { %24243 = vmatprep.subr.bf16.mxu1 %v24242_v18 }
 0x821   :  { %21345 = vmatmul.mubr.f32.vlgmr.msra.gmra.mrb[16].mxu1 %v30402_v44 }
 0x822   :  { %24245 = vmatpush3.bf16.msra.mxu1 %v24242_v18  ;;  %21347 = vmatprep.mubr.f32.mxu1 %v30403_v24  ;;  %v26093_v18 = vld [vmem:[#allocation14 + $0x18] sm:$0xff] }
 0x823   :  { %24247 = vmatprep.subr.bf16.mxu1 %v24246_v42 }
 0x825   :  { %21348 = vmatmul.mubr.f32.gmra.mrb[18].mxu1 %v30404_v28 }
 0x826   :  { %24249 = vmatpush3.bf16.msra.mxu1 %v24246_v42  ;;  %21358 = vmatprep.mubr.f32.mxu1 %v30393_v20 }
 0x827   :  { %24251 = vmatprep.subr.bf16.mxu1 %v24210_v21 }
 0x829   :  { %21359 = vmatmul.mubr.f32.vlgmr.msra.gmra.mrb[16].mxu1 %v30394_v43 }
 0x82a   :  { %24253 = vmatpush3.bf16.msra.mxu1 %v24210_v21  ;;  %21361 = vmatprep.mubr.f32.mxu1 %v30395_v14 }
 0x82b   :  { %24255 = vmatprep.subr.bf16.mxu1 %v24214_v11 }
 0x82d   :  { %21362 = vmatmul.mubr.f32.gmra.mrb[18].mxu1 %v30396_v50 }
 0x82e   :  { %24257 = vmatpush3.bf16.msra.mxu1 %v24214_v11  ;;  %21372 = vmatprep.mubr.f32.mxu1 %v30393_v20  ;;  %v30426_v20 = vld [vmem:[#allocation34_spill] sm:$0xff] }
 0x82f   :  { %24547 = vmatprep.subr.bf16.mxu1 %v30234_v34 }
 0x831   :  { %21373 = vmatmul.mubr.f32.vlgmr.msra.gmra.mrb[16].mxu1 %v30394_v43 }
 0x832   :  { %21375 = vmatprep.mubr.f32.mxu1 %v30395_v14  ;;  %24549 = vmatpush3.bf16.msra.mxu1 %v30234_v34 }
 0x833   :  { %24551 = vmatprep.subr.bf16.mxu1 %v30235_v36 }
 0x835   :  { %21376 = vmatmul.mubr.f32.gmra.mrb[18].mxu1 %v30396_v50 }
 0x836   :  { %24553 = vmatpush3.bf16.msra.mxu1 %v30235_v36 }
 0x837   :  { %24555 = vmatprep.subr.bf16.mxu1 %v30236_v55 }
 0x83a   :  { %24557 = vmatpush3.bf16.msra.mxu1 %v30236_v55 }
 0x83b   :  { %24559 = vmatprep.subr.bf16.mxu1 %v30237_v8 }
 0x83e   :  { %24561 = vmatpush3.bf16.msra.mxu1 %v30237_v8 }
 0x83f   :  { %24563 = vmatprep.subr.bf16.mxu1 %v30238_v6 }
 0x842   :  { %24565 = vmatpush3.bf16.msra.mxu1 %v30238_v6 }
 0x843   :  { %24567 = vmatprep.subr.bf16.mxu1 %v27029_v52 }
 0x846   :  { %24569 = vmatpush3.bf16.msra.mxu1 %v27029_v52 }
 0x847   :  { %24571 = vmatprep.subr.bf16.mxu1 %v27056_v7 }
 0x84a   :  { %24573 = vmatpush3.bf16.msra.mxu1 %v27056_v7 }
 0x84b   :  { %24575 = vmatprep.subr.bf16.mxu1 %v27246_v22 }
 0x84e   :  { %24577 = vmatpush3.bf16.msra.mxu1 %v27246_v22 }
 0x84f   :  { %24579 = vmatprep.subr.bf16.mxu1 %v30308_v4 }
 0x8d4   :  { %v21290_v25 = vpop.f32.mrb[12].mxu1 }
 0x8d5   :  { %v28398_v15 = vmul.f32 %v21290_v25, %v28395_v29  ;;  %v8267_v13 = vpop.f32.mrb[13].mxu1 }
 0x8d6   :  { %v28401_v39 = vmul.f32 %v28395_v29, %v8267_v13 }
 0x8d7   :  { %30406 = vst [vmem:[#allocation37_spill] sm:$0xff] %v28398_v15  ;;  %v8913_v60 = vmul.f32 1.5, %v28398_v15 }
 0x8d8   :  { %30407 = vst [vmem:[#allocation67_spill] sm:$0xff] %v28401_v39  ;;  %v8912_v1 = vmul.f32 1.5, %v28401_v39  ;;  %v21293_v0 = vpop.f32.mrb[14].mxu1 }
 0x8d9   :  { %v8921_v51 = vadd.f32 %v26091_v32, %v8913_v60  ;;  %v28406_v5 = vmul.f32 %v21293_v0, %v28395_v29  ;;  %v8279_v54 = vpop.f32.mrb[15].mxu1  ;;  %v26094_v60 = vld [vmem:[#allocation14 + $0x10] sm:$0xff] }
 0x8da   :  { %v8920_v17 = vadd.f32 %v26092_v46, %v8912_v1  ;;  %v28409_v40 = vmul.f32 %v28395_v29, %v8279_v54 }
 0x8db   :  { %30408 = vst [vmem:[#allocation71_spill] sm:$0xff] %v28406_v5  ;;  %v8932_v31 = vand.u32 4294901760, %v8921_v51  ;;  %v8915_v21 = vmul.f32 1.5, %v28406_v5 }
 0x8dc   :  { %30409 = vst [vmem:[#allocation91_spill] sm:$0xff] %v28409_v40  ;;  %v8929_v11 = vand.u32 4294901760, %v8920_v17  ;;  %v8914_v12 = vmul.f32 1.5, %v28409_v40 }
 0x8dd   :  { %v9046_v16 = vsub.f32 %v8921_v51, %v8932_v31  ;;  %v8923_v42 = vadd.f32 %v26093_v18, %v8915_v21 }
 0x8de   :  { %v28413_v25 = vpack.c.bf16 %v8932_v31, %v8929_v11  ;;  %v9039_v13 = vsub.f32 %v8920_v17, %v8929_v11  ;;  %v8922_v0 = vadd.f32 %v26094_v60, %v8914_v12 }
 0x8df   :  { %v8938_v32 = vand.u32 4294901760, %v8923_v42  ;;  %v9047_v39 = vand.u32 4294901760, %v9046_v16 }
 0x8e0   :  { %v8935_v1 = vand.u32 4294901760, %v8922_v0  ;;  %24259 = vmatprep.subr.bf16.mxu0 %v28413_v25  ;;  %v9040_v54 = vand.u32 4294901760, %v9039_v13  ;;  %v24274_v46 = vpack.c.bf16 %v9046_v16, %v9039_v13 }
 0x8e1   :  { %v9060_v15 = vsub.f32 %v8923_v42, %v8938_v32  ;;  %24261 = vmatpush3.bf16.msra.mxu0 %v28413_v25  ;;  %v9048_v5 = vsub.f32 %v9046_v16, %v9047_v39 }
 0x8e2   :  { %v28417_v40 = vpack.c.bf16 %v8938_v32, %v8935_v1  ;;  %v9053_v51 = vsub.f32 %v8922_v0, %v8935_v1  ;;  %v9041_v21 = vsub.f32 %v9039_v13, %v9040_v54  ;;  %v24290_v31 = vpack.c.bf16 %v9047_v39, %v9040_v54  ;;  %v30412_v13 = vld [vmem:[#allocation26_spill] sm:$0xff]  ;;  %v30417_v32 = vld [vmem:[#allocation31_spill] sm:$0xff]  ;;  %v30418_v1 = vld [vmem:[#allocation28_spill] sm:$0xff] }
 0x8e3   :  { %v9049_v18 = vand.u32 4294901760, %v9048_v5  ;;  %v9061_v17 = vand.u32 4294901760, %v9060_v15  ;;  %v30410_v5 = vld [vmem:[#allocation22_spill] sm:$0xff]  ;;  %v30419_v54 = vld [vmem:[#allocation29_spill] sm:$0xff] }
 0x8e4   :  { %24263 = vmatprep.subr.bf16.mxu0 %v28417_v40  ;;  %v9042_v11 = vand.u32 4294901760, %v9041_v21  ;;  %v9054_v12 = vand.u32 4294901760, %v9053_v51  ;;  %v24278_v60 = vpack.c.bf16 %v9060_v15, %v9053_v51  ;;  %v30416_v0 = vld [vmem:[#allocation30_spill] sm:$0xff]  ;;  %v30421_v21 = vld [vmem:[#allocation33_spill] sm:$0xff] }
 0x8e5   :  { %24265 = vmatpush3.bf16.msra.mxu0 %v28417_v40  ;;  %v9062_v28 = vsub.f32 %v9060_v15, %v9061_v17  ;;  %v30411_v15 = vld [vmem:[#allocation23_spill] sm:$0xff] }
 0x8e6   :  { %v24266_v24 = vpack.c.bf16 %v9049_v18, %v9042_v11  ;;  %v9055_v42 = vsub.f32 %v9053_v51, %v9054_v12  ;;  %v24294_v44 = vpack.c.bf16 %v9061_v17, %v9054_v12 }
 0x8e7   :  { %v9063_v49 = vand.u32 4294901760, %v9062_v28  ;;  %v30413_v28 = vld [vmem:[#allocation27_spill] sm:$0xff] }
 0x8e8   :  { %21387 = vmatmul.mubr.f32.vlgmr.msra.gmra.mrb[40].mxu0 %v30318_v45  ;;  %24267 = vmatprep.subr.bf16.mxu0 %v24266_v24  ;;  %v9056_v16 = vand.u32 4294901760, %v9055_v42  ;;  %v26095_v42 = vld [vmem:[#allocation14 + $0x28] sm:$0xff] }
 0x8e9   :  { %24269 = vmatpush3.bf16.msra.mxu0 %v24266_v24  ;;  %21389 = vmatprep.mubr.f32.mxu0 %v30319_v63  ;;  %v30414_v24 = vld [vmem:[#allocation24_spill] sm:$0xff] }
 0x8ea   :  { %v24270_v39 = vpack.c.bf16 %v9063_v49, %v9056_v16  ;;  %v30415_v49 = vld [vmem:[#allocation25_spill] sm:$0xff] }
 0x8ec   :  { %21390 = vmatmul.mubr.f32.gmra.mrb[42].mxu0 %v30320_v58  ;;  %24271 = vmatprep.subr.bf16.mxu0 %v24270_v39 }
 0x8ed   :  { %24273 = vmatpush3.bf16.msra.mxu0 %v24270_v39  ;;  %21400 = vmatprep.mubr.f32.mxu0 %v30410_v5 }
 0x8ee   :  { %24275 = vmatprep.subr.bf16.mxu0 %v24274_v46 }
 0x8f0   :  { %21401 = vmatmul.mubr.f32.vlgmr.msra.gmra.mrb[40].mxu0 %v30411_v15 }
 0x8f1   :  { %24277 = vmatpush3.bf16.msra.mxu0 %v24274_v46  ;;  %21403 = vmatprep.mubr.f32.mxu0 %v30412_v13  ;;  %v30420_v46 = vld [vmem:[#allocation32_spill] sm:$0xff] }
 0x8f2   :  { %24279 = vmatprep.subr.bf16.mxu0 %v24278_v60 }
 0x8f4   :  { %21404 = vmatmul.mubr.f32.gmra.mrb[42].mxu0 %v30413_v28 }
 0x8f5   :  { %24281 = vmatpush3.bf16.msra.mxu0 %v24278_v60  ;;  %21414 = vmatprep.mubr.f32.mxu0 %v30414_v24 }
 0x8f6   :  { %24283 = vmatprep.subr.bf16.mxu0 %v28413_v25 }
 0x8f8   :  { %21415 = vmatmul.mubr.f32.vlgmr.msra.gmra.mrb[40].mxu0 %v30415_v49 }
 0x8f9   :  { %24285 = vmatpush3.bf16.msra.mxu0 %v28413_v25  ;;  %21417 = vmatprep.mubr.f32.mxu0 %v30416_v0 }
 0x8fa   :  { %24287 = vmatprep.subr.bf16.mxu0 %v28417_v40 }
 0x8fc   :  { %21418 = vmatmul.mubr.f32.gmra.mrb[42].mxu0 %v30417_v32 }
 0x8fd   :  { %24289 = vmatpush3.bf16.msra.mxu0 %v28417_v40  ;;  %21428 = vmatprep.mubr.f32.mxu0 %v30418_v1 }
 0x8fe   :  { %24291 = vmatprep.subr.bf16.mxu0 %v24290_v31 }
 0x900   :  { %21429 = vmatmul.mubr.f32.vlgmr.msra.gmra.mrb[40].mxu0 %v30419_v54 }
 0x901   :  { %24293 = vmatpush3.bf16.msra.mxu0 %v24290_v31  ;;  %21431 = vmatprep.mubr.f32.mxu0 %v30420_v46 }
 0x902   :  { %24295 = vmatprep.subr.bf16.mxu0 %v24294_v44 }
 0x904   :  { %v21374_v51 = vpop.f32.mrb[16].mxu1  ;;  %21432 = vmatmul.mubr.f32.gmra.mrb[42].mxu0 %v30421_v21 }
 0x905   :  { %v28441_v18 = vmul.f32 %v21374_v51, %v28395_v29  ;;  %v8881_v17 = vpop.f32.mrb[17].mxu1  ;;  %24297 = vmatpush3.bf16.msra.mxu0 %v24294_v44  ;;  %21442 = vmatprep.mubr.f32.mxu0 %v30410_v5  ;;  %v26096_v51 = vld [vmem:[#allocation14 + $0x20] sm:$0xff] }
 0x906   :  { %v28445_v11 = vmul.f32 %v28395_v29, %v8881_v17  ;;  %24299 = vmatprep.subr.bf16.mxu0 %v28413_v25 }
 0x907   :  { %30422 = vst [vmem:[#allocation92_spill] sm:$0xff] %v28441_v18  ;;  %v8917_v31 = vmul.f32 1.5, %v28441_v18 }
 0x908   :  { %30423 = vst [vmem:[#allocation77_spill] sm:$0xff] %v28445_v11  ;;  %v8916_v12 = vmul.f32 1.5, %v28445_v11  ;;  %v21377_v60 = vpop.f32.mrb[18].mxu1  ;;  %21443 = vmatmul.mubr.f32.vlgmr.msra.gmra.mrb[40].mxu0 %v30411_v15 }
 0x909   :  { %v8925_v16 = vadd.f32 %v26095_v42, %v8917_v31  ;;  %v28452_v39 = vmul.f32 %v21377_v60, %v28395_v29  ;;  %v8893_v44 = vpop.f32.mrb[19].mxu1  ;;  %24301 = vmatpush3.bf16.msra.mxu0 %v28413_v25  ;;  %21445 = vmatprep.mubr.f32.mxu0 %v30412_v13  ;;  %v26097_v42 = vld [vmem:[#allocation14 + $0x38] sm:$0xff] }
 0x90a   :  { %v8924_v17 = vadd.f32 %v26096_v51, %v8916_v12  ;;  %v28457_v2 = vmul.f32 %v28395_v29, %v8893_v44  ;;  %24303 = vmatprep.subr.bf16.mxu0 %v28417_v40  ;;  %v26098_v51 = vld [vmem:[#allocation14 + $0x30] sm:$0xff] }
 0x90b   :  { %30424 = vst [vmem:[#allocation79_spill] sm:$0xff] %v28452_v39  ;;  %v9546_v11 = vand.u32 4294901760, %v8925_v16  ;;  %v8919_v18 = vmul.f32 1.5, %v28452_v39 }
 0x90c   :  { %30425 = vst [vmem:[#allocation80_spill] sm:$0xff] %v28457_v2  ;;  %v9543_v38 = vand.u32 4294901760, %v8924_v17  ;;  %v8918_v31 = vmul.f32 1.5, %v28457_v2  ;;  %21446 = vmatmul.mubr.f32.gmra.mrb[42].mxu0 %v30413_v28 }
 0x90d   :  { %v9660_v60 = vsub.f32 %v8925_v16, %v9546_v11  ;;  %v8927_v25 = vadd.f32 %v26097_v42, %v8919_v18  ;;  %24305 = vmatpush3.bf16.msra.mxu0 %v28417_v40  ;;  %21456 = vmatprep.mubr.f32.mxu0 %v30410_v5 }
 0x90e   :  { %v28465_v12 = vpack.c.bf16 %v9546_v11, %v9543_v38  ;;  %v9653_v44 = vsub.f32 %v8924_v17, %v9543_v38  ;;  %v8926_v29 = vadd.f32 %v26098_v51, %v8918_v31 }
 0x90f   :  { %v9552_v57 = vand.u32 4294901760, %v8927_v25  ;;  %v9661_v3 = vand.u32 4294901760, %v9660_v60 }
 0x910   :  { %v9549_v39 = vand.u32 4294901760, %v8926_v29  ;;  %21457 = vmatmul.mubr.f32.vlgmr.msra.gmra.mrb[40].mxu0 %v30411_v15  ;;  %24307 = vmatprep.subr.bf16.mxu0 %v28465_v12  ;;  %v9654_v2 = vand.u32 4294901760, %v9653_v44  ;;  %v24322_v16 = vpack.c.bf16 %v9660_v60, %v9653_v44 }
 0x911   :  { %v9674_v50 = vsub.f32 %v8927_v25, %v9552_v57  ;;  %24309 = vmatpush3.bf16.msra.mxu0 %v28465_v12  ;;  %21459 = vmatprep.mubr.f32.mxu0 %v30412_v13  ;;  %v9662_v40 = vsub.f32 %v9660_v60, %v9661_v3 }
 0x912   :  { %v24310_v18 = vpack.c.bf16 %v9552_v57, %v9549_v39  ;;  %v9667_v11 = vsub.f32 %v8926_v29, %v9549_v39  ;;  %v9655_v38 = vsub.f32 %v9653_v44, %v9654_v2  ;;  %v24338_v17 = vpack.c.bf16 %v9661_v3, %v9654_v2  ;;  %v30433_v2 = vld [vmem:[#allocation44_spill] sm:$0xff]  ;;  %v30434_v29 = vld [vmem:[#allocation45_spill] sm:$0xff]  ;;  %v30435_v39 = vld [vmem:[#allocation46_spill] sm:$0xff] }
 0x913   :  { %v9663_v31 = vand.u32 4294901760, %v9662_v40  ;;  %v9675_v42 = vand.u32 4294901760, %v9674_v50 }
 0x914   :  { %21460 = vmatmul.mubr.f32.gmra.mrb[42].mxu0 %v30413_v28  ;;  %24311 = vmatprep.subr.bf16.mxu0 %v24310_v18  ;;  %v9656_v51 = vand.u32 4294901760, %v9655_v38  ;;  %v9668_v14 = vand.u32 4294901760, %v9667_v11  ;;  %v24326_v43 = vpack.c.bf16 %v9674_v50, %v9667_v11 }
 0x915   :  { %24313 = vmatpush3.bf16.msra.mxu0 %v24310_v18  ;;  %21470 = vmatprep.mubr.f32.mxu0 %v30426_v20  ;;  %v9676_v25 = vsub.f32 %v9674_v50, %v9675_v42  ;;  %v30427_v50 = vld [vmem:[#allocation38_spill] sm:$0xff] }
 0x916   :  { %v24314_v53 = vpack.c.bf16 %v9663_v31, %v9656_v51  ;;  %v9669_v10 = vsub.f32 %v9667_v11, %v9668_v14  ;;  %v24342_v62 = vpack.c.bf16 %v9675_v42, %v9668_v14  ;;  %v30432_v14 = vld [vmem:[#allocation43_spill] sm:$0xff] }
 0x917   :  { %v9677_v60 = vand.u32 4294901760, %v9676_v25 }
 0x918   :  { %21471 = vmatmul.mubr.f32.vlgmr.msra.gmra.mrb[44].mxu0 %v30318_v45  ;;  %24315 = vmatprep.subr.bf16.mxu0 %v24314_v53  ;;  %v9670_v3 = vand.u32 4294901760, %v9669_v10  ;;  %v30429_v10 = vld [vmem:[#allocation40_spill] sm:$0xff] }
 0x919   :  { %24317 = vmatpush3.bf16.msra.mxu0 %v24314_v53  ;;  %21473 = vmatprep.mubr.f32.mxu0 %v30319_v63  ;;  %v30430_v53 = vld [vmem:[#allocation41_spill] sm:$0xff] }
 0x91a   :  { %v24318_v57 = vpack.c.bf16 %v9677_v60, %v9670_v3 }
 0x91c   :  { %21474 = vmatmul.mubr.f32.gmra.mrb[46].mxu0 %v30320_v58  ;;  %24319 = vmatprep.subr.bf16.mxu0 %v24318_v57 }
 0x91d   :  { %24321 = vmatpush3.bf16.msra.mxu0 %v24318_v57  ;;  %21484 = vmatprep.mubr.f32.mxu0 %v30410_v5 }
 0x91e   :  { %24323 = vmatprep.subr.bf16.mxu0 %v24322_v16 }
 0x920   :  { %21485 = vmatmul.mubr.f32.vlgmr.msra.gmra.mrb[44].mxu0 %v30411_v15 }
 0x921   :  { %24325 = vmatpush3.bf16.msra.mxu0 %v24322_v16  ;;  %21487 = vmatprep.mubr.f32.mxu0 %v30412_v13 }
 0x922   :  { %24327 = vmatprep.subr.bf16.mxu0 %v24326_v43 }
 0x924   :  { %21488 = vmatmul.mubr.f32.gmra.mrb[46].mxu0 %v30413_v28 }
 0x925   :  { %24329 = vmatpush3.bf16.msra.mxu0 %v24326_v43  ;;  %21498 = vmatprep.mubr.f32.mxu0 %v30414_v24  ;;  %v30431_v43 = vld [vmem:[#allocation42_spill] sm:$0xff] }
 0x926   :  { %24331 = vmatprep.subr.bf16.mxu0 %v28465_v12 }
 0x928   :  { %21499 = vmatmul.mubr.f32.vlgmr.msra.gmra.mrb[44].mxu0 %v30415_v49 }
 0x929   :  { %24333 = vmatpush3.bf16.msra.mxu0 %v28465_v12  ;;  %21501 = vmatprep.mubr.f32.mxu0 %v30416_v0 }
 0x92a   :  { %24335 = vmatprep.subr.bf16.mxu0 %v24310_v18 }
 0x92c   :  { %21502 = vmatmul.mubr.f32.gmra.mrb[46].mxu0 %v30417_v32 }
 0x92d   :  { %24337 = vmatpush3.bf16.msra.mxu0 %v24310_v18  ;;  %21512 = vmatprep.mubr.f32.mxu0 %v30418_v1  ;;  %v30436_v1 = vld [vmem:[#allocation54_spill] sm:$0xff] }
 0x92e   :  { %24339 = vmatprep.subr.bf16.mxu0 %v24338_v17 }
 0x930   :  { %21513 = vmatmul.mubr.f32.vlgmr.msra.gmra.mrb[44].mxu0 %v30419_v54 }
 0x931   :  { %24341 = vmatpush3.bf16.msra.mxu0 %v24338_v17  ;;  %21515 = vmatprep.mubr.f32.mxu0 %v30420_v46 }
 0x932   :  { %24343 = vmatprep.subr.bf16.mxu0 %v24342_v62 }
 0x934   :  { %21516 = vmatmul.mubr.f32.gmra.mrb[46].mxu0 %v30421_v21 }
 0x935   :  { %24345 = vmatpush3.bf16.msra.mxu0 %v24342_v62  ;;  %21526 = vmatprep.mubr.f32.mxu0 %v30410_v5  ;;  %v30428_v62 = vld [vmem:[#allocation39_spill] sm:$0xff] }
 0x936   :  { %24347 = vmatprep.subr.bf16.mxu0 %v28465_v12 }
 0x938   :  { %21527 = vmatmul.mubr.f32.vlgmr.msra.gmra.mrb[44].mxu0 %v30411_v15 }
 0x939   :  { %24349 = vmatpush3.bf16.msra.mxu0 %v28465_v12  ;;  %21529 = vmatprep.mubr.f32.mxu0 %v30412_v13 }
 0x93a   :  { %24351 = vmatprep.subr.bf16.mxu0 %v24310_v18 }
 0x93c   :  { %21530 = vmatmul.mubr.f32.gmra.mrb[46].mxu0 %v30413_v28 }
 0x93d   :  { %24353 = vmatpush3.bf16.msra.mxu0 %v24310_v18  ;;  %21540 = vmatprep.mubr.f32.mxu0 %v30410_v5 }
 0x93e   :  { %24355 = vmatprep.subr.bf16.mxu0 %v30427_v50 }
 0x940   :  { %21541 = vmatmul.mubr.f32.vlgmr.msra.gmra.mrb[44].mxu0 %v30411_v15 }
 0x941   :  { %21543 = vmatprep.mubr.f32.mxu0 %v30412_v13  ;;  %24357 = vmatpush3.bf16.msra.mxu0 %v30427_v50 }
 0x942   :  { %24359 = vmatprep.subr.bf16.mxu0 %v30428_v62 }
 0x944   :  { %21544 = vmatmul.mubr.f32.gmra.mrb[46].mxu0 %v30413_v28 }
 0x945   :  { %24361 = vmatpush3.bf16.msra.mxu0 %v30428_v62 }
 0x946   :  { %24363 = vmatprep.subr.bf16.mxu0 %v30429_v10 }
 0x949   :  { %24365 = vmatpush3.bf16.msra.mxu0 %v30429_v10 }
 0x94a   :  { %24367 = vmatprep.subr.bf16.mxu0 %v30430_v53 }
 0x94d   :  { %24369 = vmatpush3.bf16.msra.mxu0 %v30430_v53 }
 0x94e   :  { %24371 = vmatprep.subr.bf16.mxu0 %v30431_v43 }
 0x951   :  { %24373 = vmatpush3.bf16.msra.mxu0 %v30431_v43 }
 0x952   :  { %24375 = vmatprep.subr.bf16.mxu0 %v30432_v14 }
 0x955   :  { %24377 = vmatpush3.bf16.msra.mxu0 %v30432_v14 }
 0x956   :  { %24379 = vmatprep.subr.bf16.mxu0 %v30433_v2 }
 0x959   :  { %24381 = vmatpush3.bf16.msra.mxu0 %v30433_v2 }
 0x95a   :  { %24383 = vmatprep.subr.bf16.mxu0 %v30434_v29 }
 0x95d   :  { %24385 = vmatpush3.bf16.msra.mxu0 %v30434_v29 }
 0x95e   :  { %24387 = vmatprep.subr.bf16.mxu0 %v30435_v39 }
 0x9e3   :  { %v21458_v12 = vpop.f32.mrb[40].mxu0 }
 0x9e4   :  { %v28517_v44 = vand.u32 4294901760, %v21458_v12  ;;  %v9520_v16 = vpop.f32.mrb[41].mxu0 }
 0x9e5   :  { %v28519_v40 = vand.u32 4294901760, %v9520_v16 }
 0x9e6   :  { %v28522_v18 = vsub.f32 %v21458_v12, %v28517_v44 }
 0x9e7   :  { %v28525_v11 = vsub.f32 %v9520_v16, %v28519_v40  ;;  %v21461_v38 = vpop.f32.mrb[42].mxu0 }
 0x9e8   :  { %v30047_v17 = vand.u32 4294901760, %v28522_v18  ;;  %v28528_v31 = vand.u32 4294901760, %v21461_v38  ;;  %v9532_v42 = vpop.f32.mrb[43].mxu0 }
 0x9e9   :  { %v30048_v51 = vand.u32 4294901760, %v28525_v11  ;;  %v28531_v25 = vand.u32 4294901760, %v9532_v42 }
 0x9ea   :  { %v10250_v60 = vsub.f32 %v28522_v18, %v30047_v17  ;;  %v28537_v3 = vsub.f32 %v21461_v38, %v28528_v31 }
 0x9eb   :  { %v28540_v57 = vsub.f32 %v9532_v42, %v28531_v25  ;;  %v10240_v12 = vsub.f32 %v28525_v11, %v30048_v51 }
 0x9ec   :  { %v30050_v16 = vand.u32 4294901760, %v28537_v3  ;;  %v10251_v54 = vand.u32 4294901760, %v10250_v60  ;;  %v30437_v60 = vld [vmem:[#allocation55_spill] sm:$0xff] }
 0x9ed   :  { %v30051_v21 = vand.u32 4294901760, %v28540_v57  ;;  %v10241_v46 = vand.u32 4294901760, %v10240_v12  ;;  %v30439_v12 = vld [vmem:[#allocation58_spill] sm:$0xff] }
 0x9ee   :  { %v10270_v17 = vsub.f32 %v28537_v3, %v30050_v16 }
 0x9ef   :  { %21578 = vmatprep.mubr.f32.mxu0 %v10241_v46  ;;  %v10260_v38 = vsub.f32 %v28540_v57, %v30051_v21  ;;  %v30438_v46 = vld [vmem:[#allocation56_spill] sm:$0xff] }
 0x9f0   :  { %21579 = vmatmul.mubr.f32.vlgmr.msra.gmra.mrb[48].mxu0 %v10251_v54  ;;  %v10271_v51 = vand.u32 4294901760, %v10270_v17  ;;  %v30440_v54 = vld [vmem:[#allocation47_spill] sm:$0xff]  ;;  %v30441_v17 = vld [vmem:[#allocation48_spill] sm:$0xff] }
 0x9f1   :  { %v10261_v42 = vand.u32 4294901760, %v10260_v38  ;;  %24389 = vmatpush3.bf16.msra.mxu0 %v30435_v39  ;;  %v30443_v38 = vld [vmem:[#allocation50_spill] sm:$0xff] }
 0x9f2   :  { %24391 = vmatprep.subr.bf16.mxu0 %v30436_v1 }
 0x9f3   :  { %21581 = vmatprep.mubr.f32.mxu0 %v10261_v42 }
 0x9f4   :  { %21582 = vmatmul.mubr.f32.gmra.mrb[50].mxu0 %v10271_v51  ;;  %v30442_v51 = vld [vmem:[#allocation49_spill] sm:$0xff] }
 0x9f5   :  { %24393 = vmatpush3.bf16.msra.mxu0 %v30436_v1 }
 0x9f6   :  { %24395 = vmatprep.subr.bf16.mxu0 %v30437_v60 }
 0x9f9   :  { %24397 = vmatpush3.bf16.msra.mxu0 %v30437_v60 }
 0x9fa   :  { %24399 = vmatprep.subr.bf16.mxu0 %v30438_v46 }
 0x9fd   :  { %24401 = vmatpush3.bf16.msra.mxu0 %v30438_v46 }
 0x9fe   :  { %24403 = vmatprep.subr.bf16.mxu0 %v30439_v12 }
 0xa01   :  { %24405 = vmatpush3.bf16.msra.mxu0 %v30439_v12 }
 0xa02   :  { %24407 = vmatprep.subr.bf16.mxu0 %v30440_v54 }
 0xa05   :  { %24409 = vmatpush3.bf16.msra.mxu0 %v30440_v54 }
 0xa06   :  { %24411 = vmatprep.subr.bf16.mxu0 %v30441_v17 }
 0xa09   :  { %24413 = vmatpush3.bf16.msra.mxu0 %v30441_v17 }
 0xa0a   :  { %24415 = vmatprep.subr.bf16.mxu0 %v30442_v51 }
 0xa0d   :  { %24417 = vmatpush3.bf16.msra.mxu0 %v30442_v51 }
 0xa0e   :  { %24419 = vmatprep.subr.bf16.mxu0 %v30443_v38 }
 0xa13   :  { %v21542_v42 = vpop.f32.mrb[44].mxu0 }
 0xa14   :  { %v28569_v16 = vand.u32 4294901760, %v21542_v42  ;;  %v10134_v21 = vpop.f32.mrb[45].mxu0 }
 0xa15   :  { %v28571_v46 = vand.u32 4294901760, %v10134_v21 }
 0xa16   :  { %v28574_v12 = vsub.f32 %v21542_v42, %v28569_v16 }
 0xa17   :  { %v28577_v54 = vsub.f32 %v10134_v21, %v28571_v46  ;;  %v21545_v60 = vpop.f32.mrb[46].mxu0 }
 0xa18   :  { %v30067_v17 = vand.u32 4294901760, %v28574_v12  ;;  %v28580_v1 = vand.u32 4294901760, %v21545_v60  ;;  %v10146_v51 = vpop.f32.mrb[47].mxu0 }
 0xa19   :  { %v30071_v39 = vand.u32 4294901760, %v28577_v54  ;;  %v28583_v32 = vand.u32 4294901760, %v10146_v51 }
 0xa1a   :  { %v28586_v0 = vsub.f32 %v21545_v60, %v28580_v1  ;;  %v10290_v42 = vsub.f32 %v28574_v12, %v30067_v17 }
 0xa1b   :  { %v28592_v21 = vsub.f32 %v10146_v51, %v28583_v32  ;;  %v10280_v49 = vsub.f32 %v28577_v54, %v30071_v39  ;;  %v30456_v39 = vand.u32 4294901760, %v28537_v3 }
 0xa1c   :  { %v30069_v24 = vand.u32 4294901760, %v28586_v0  ;;  %v10291_v15 = vand.u32 4294901760, %v10290_v42  ;;  %v30449_v42 = vld [vmem:[#allocation52_spill] sm:$0xff] }
 0xa1d   :  { %v30070_v28 = vand.u32 4294901760, %v28592_v21  ;;  %v10281_v13 = vand.u32 4294901760, %v10280_v49  ;;  %v30444_v49 = vld [vmem:[#allocation60_spill] sm:$0xff] }
 0xa1e   :  { %v10310_v60 = vsub.f32 %v28586_v0, %v30069_v24  ;;  %v30452_v24 = vld [vmem:[#allocation83_spill] sm:$0xff] }
 0xa1f   :  { %21584 = vmatprep.mubr.f32.mxu0 %v10281_v13  ;;  %v10300_v51 = vsub.f32 %v28592_v21, %v30070_v28  ;;  %v30447_v13 = vld [vmem:[#allocation63_spill] sm:$0xff]  ;;  %v30455_v28 = vld [vmem:[#allocation84_spill] sm:$0xff] }
 0xa20   :  { %21585 = vmatmul.mubr.f32.gmra.mrb[52].mxu0 %v10291_v15  ;;  %v10311_v5 = vand.u32 4294901760, %v10310_v60  ;;  %v30445_v15 = vld [vmem:[#allocation61_spill] sm:$0xff] }
 0xa21   :  { %v10301_v17 = vand.u32 4294901760, %v10300_v51  ;;  %v30450_v60 = vld [vmem:[#allocation53_spill] sm:$0xff]  ;;  %v30451_v51 = vand.u32 4294901760, %v28525_v11 }
 0xa23   :  { %21587 = vmatprep.mubr.f32.mxu0 %v10301_v17  ;;  %v30448_v17 = vld [vmem:[#allocation51_spill] sm:$0xff] }
 0xa24   :  { %21588 = vmatmul.mubr.f32.gmra.mrb[54].mxu0 %v10311_v5  ;;  %v30446_v5 = vld [vmem:[#allocation62_spill] sm:$0xff] }
 0xa25   :  { %21622 = vmatprep.mubr.f32.mxu0 %v28519_v40 }
 0xa28   :  { %21623 = vmatmul.mubr.f32.vlgmr.msra.gmra.mrb[48].mxu0 %v28517_v44 }
 0xa29   :  { %24421 = vmatpush3.bf16.msra.mxu0 %v30443_v38  ;;  %21625 = vmatprep.mubr.f32.mxu0 %v28531_v25 }
 0xa2a   :  { %24423 = vmatprep.subr.bf16.mxu0 %v30444_v49 }
 0xa2c   :  { %21626 = vmatmul.mubr.f32.gmra.mrb[50].mxu0 %v28528_v31 }
 0xa2d   :  { %24425 = vmatpush3.bf16.msra.mxu0 %v30444_v49  ;;  %21628 = vmatprep.mubr.f32.mxu0 %v28571_v46 }
 0xa2e   :  { %24427 = vmatprep.subr.bf16.mxu0 %v30445_v15 }
 0xa30   :  { %21629 = vmatmul.mubr.f32.gmra.mrb[52].mxu0 %v28569_v16 }
 0xa31   :  { %24429 = vmatpush3.bf16.msra.mxu0 %v30445_v15  ;;  %21631 = vmatprep.mubr.f32.mxu0 %v28583_v32 }
 0xa32   :  { %24431 = vmatprep.subr.bf16.mxu0 %v30446_v5 }
 0xa34   :  { %21632 = vmatmul.mubr.f32.gmra.mrb[54].mxu0 %v28580_v1 }
 0xa35   :  { %24433 = vmatpush3.bf16.msra.mxu0 %v30446_v5  ;;  %21666 = vmatprep.mubr.f32.mxu0 %v28525_v11  ;;  %v30453_v11 = vand.u32 4294901760, %v28522_v18 }
 0xa36   :  { %24435 = vmatprep.subr.bf16.mxu0 %v30447_v13 }
 0xa39   :  { %24437 = vmatpush3.bf16.msra.mxu0 %v30447_v13 }
 0xa3a   :  { %24439 = vmatprep.subr.bf16.mxu0 %v30448_v17 }
 0xa3d   :  { %24441 = vmatpush3.bf16.msra.mxu0 %v30448_v17 }
 0xa3e   :  { %24443 = vmatprep.subr.bf16.mxu0 %v30449_v42 }
 0xa41   :  { %24445 = vmatpush3.bf16.msra.mxu0 %v30449_v42  ;;  %v30458_v42 = vld [vmem:[#allocation85_spill] sm:$0xff] }
 0xa42   :  { %24447 = vmatprep.subr.bf16.mxu0 %v30450_v60 }
 0xa45   :  { %24449 = vmatpush3.bf16.msra.mxu0 %v30450_v60  ;;  %v30457_v60 = vand.u32 4294901760, %v28577_v54 }
 0xa46   :  { %24451 = vmatprep.subr.bf16.mxu0 %v30427_v50 }
 0xa48   :  { %21667 = vmatmul.mubr.f32.vlgmr.msra.gmra.mrb[48].mxu0 %v28522_v18  ;;  %v30459_v18 = vand.u32 4294901760, %v28574_v12 }
 0xa49   :  { %21669 = vmatprep.mubr.f32.mxu0 %v28540_v57  ;;  %24453 = vmatpush3.bf16.msra.mxu0 %v30427_v50 }
 0xa4a   :  { %24455 = vmatprep.subr.bf16.mxu0 %v30428_v62 }
 0xa4c   :  { %21670 = vmatmul.mubr.f32.gmra.mrb[50].mxu0 %v28537_v3  ;;  %v30462_v3 = vand.u32 4294901760, %v28586_v0 }
 0xa4d   :  { %21672 = vmatprep.mubr.f32.mxu0 %v28577_v54  ;;  %24457 = vmatpush3.bf16.msra.mxu0 %v30428_v62  ;;  %v30465_v54 = vld [vmem:[#allocation89_spill] sm:$0xff] }
 0xa4e   :  { %24459 = vmatprep.subr.bf16.mxu0 %v30429_v10 }
 0xa50   :  { %21673 = vmatmul.mubr.f32.gmra.mrb[52].mxu0 %v28574_v12  ;;  %v30464_v12 = vld [vmem:[#allocation88_spill] sm:$0xff] }
 0xa51   :  { %21675 = vmatprep.mubr.f32.mxu0 %v28592_v21  ;;  %24461 = vmatpush3.bf16.msra.mxu0 %v30429_v10 }
 0xa52   :  { %24463 = vmatprep.subr.bf16.mxu0 %v30430_v53 }
 0xa54   :  { %21676 = vmatmul.mubr.f32.gmra.mrb[54].mxu0 %v28586_v0 }
 0xa55   :  { %24465 = vmatpush3.bf16.msra.mxu0 %v30430_v53  ;;  %21710 = vmatprep.mubr.f32.mxu0 %v30451_v51  ;;  %v30454_v51 = vand.u32 4294901760, %v28540_v57  ;;  %v30460_v57 = vand.u32 4294901760, %v28592_v21  ;;  %v30466_v21 = vld [vmem:[#allocation90_spill] sm:$0xff] }
 0xa56   :  { %24467 = vmatprep.subr.bf16.mxu0 %v30431_v43 }
 0xa59   :  { %24469 = vmatpush3.bf16.msra.mxu0 %v30431_v43 }
 0xa5a   :  { %24471 = vmatprep.subr.bf16.mxu0 %v30432_v14 }
 0xa5d   :  { %24473 = vmatpush3.bf16.msra.mxu0 %v30432_v14 }
 0xa5e   :  { %24475 = vmatprep.subr.bf16.mxu0 %v30433_v2 }
 0xa61   :  { %24477 = vmatpush3.bf16.msra.mxu0 %v30433_v2 }
 0xa62   :  { %24479 = vmatprep.subr.bf16.mxu0 %v30434_v29 }
 0xa65   :  { %24481 = vmatpush3.bf16.msra.mxu0 %v30434_v29 }
 0xa66   :  { %24483 = vmatprep.subr.bf16.mxu0 %v30452_v24 }
 0xa68   :  { %21711 = vmatmul.mubr.f32.vlgmr.msra.gmra.mrb[48].mxu0 %v30453_v11  ;;  %v30461_v11 = vld [vmem:[#allocation86_spill] sm:$0xff] }
 0xa69   :  { %21713 = vmatprep.mubr.f32.mxu0 %v30454_v51  ;;  %24485 = vmatpush3.bf16.msra.mxu0 %v30452_v24 }
 0xa6a   :  { %24487 = vmatprep.subr.bf16.mxu0 %v30455_v28 }
 0xa6c   :  { %21714 = vmatmul.mubr.f32.gmra.mrb[50].mxu0 %v30456_v39  ;;  %v30463_v39 = vld [vmem:[#allocation87_spill] sm:$0xff] }
 0xa6d   :  { %21716 = vmatprep.mubr.f32.mxu0 %v30457_v60  ;;  %24489 = vmatpush3.bf16.msra.mxu0 %v30455_v28 }
 0xa6e   :  { %24491 = vmatprep.subr.bf16.mxu0 %v30458_v42 }
 0xa70   :  { %21717 = vmatmul.mubr.f32.gmra.mrb[52].mxu0 %v30459_v18 }
 0xa71   :  { %21719 = vmatprep.mubr.f32.mxu0 %v30460_v57  ;;  %24493 = vmatpush3.bf16.msra.mxu0 %v30458_v42 }
 0xa72   :  { %24495 = vmatprep.subr.bf16.mxu0 %v30461_v11 }
 0xa74   :  { %21720 = vmatmul.mubr.f32.gmra.mrb[54].mxu0 %v30462_v3 }
 0xa75   :  { %24497 = vmatpush3.bf16.msra.mxu0 %v30461_v11  ;;  %21754 = vmatprep.mubr.f32.mxu0 %v28519_v40 }
 0xa76   :  { %24499 = vmatprep.subr.bf16.mxu0 %v30463_v39 }
 0xa79   :  { %24501 = vmatpush3.bf16.msra.mxu0 %v30463_v39 }
 0xa7a   :  { %24503 = vmatprep.subr.bf16.mxu0 %v30464_v12 }
 0xa7d   :  { %24505 = vmatpush3.bf16.msra.mxu0 %v30464_v12 }
 0xa7e   :  { %24507 = vmatprep.subr.bf16.mxu0 %v30465_v54 }
 0xa81   :  { %24509 = vmatpush3.bf16.msra.mxu0 %v30465_v54 }
 0xa82   :  { %24511 = vmatprep.subr.bf16.mxu0 %v30466_v21 }
 0xa85   :  { %24513 = vmatpush3.bf16.msra.mxu0 %v30466_v21 }
 0xa86   :  { %24515 = vmatprep.subr.bf16.mxu0 %v30427_v50 }
 0xa88   :  { %21755 = vmatmul.mubr.f32.vlgmr.msra.gmra.mrb[48].mxu0 %v28517_v44 }
 0xa89   :  { %21757 = vmatprep.mubr.f32.mxu0 %v28531_v25  ;;  %24517 = vmatpush3.bf16.msra.mxu0 %v30427_v50 }
 0xa8a   :  { %24519 = vmatprep.subr.bf16.mxu0 %v30428_v62 }
 0xa8c   :  { %21758 = vmatmul.mubr.f32.gmra.mrb[50].mxu0 %v28528_v31 }
 0xa8d   :  { %21760 = vmatprep.mubr.f32.mxu0 %v28571_v46  ;;  %24521 = vmatpush3.bf16.msra.mxu0 %v30428_v62 }
 0xa8e   :  { %24523 = vmatprep.subr.bf16.mxu0 %v30429_v10 }
 0xa90   :  { %21761 = vmatmul.mubr.f32.gmra.mrb[52].mxu0 %v28569_v16 }
 0xa91   :  { %21763 = vmatprep.mubr.f32.mxu0 %v28583_v32  ;;  %24525 = vmatpush3.bf16.msra.mxu0 %v30429_v10 }
 0xa92   :  { %24527 = vmatprep.subr.bf16.mxu0 %v30430_v53 }
 0xa94   :  { %21764 = vmatmul.mubr.f32.gmra.mrb[54].mxu0 %v28580_v1 }
 0xa95   :  { %24529 = vmatpush3.bf16.msra.mxu0 %v30430_v53  ;;  %21798 = vmatprep.mubr.f32.mxu0 %v28519_v40 }
 0xa96   :  { %24531 = vmatprep.subr.bf16.mxu0 %v30431_v43 }
 0xa99   :  { %24533 = vmatpush3.bf16.msra.mxu0 %v30431_v43 }
 0xa9a   :  { %24535 = vmatprep.subr.bf16.mxu0 %v30432_v14 }
 0xa9d   :  { %24537 = vmatpush3.bf16.msra.mxu0 %v30432_v14 }
 0xa9e   :  { %24539 = vmatprep.subr.bf16.mxu0 %v30433_v2 }
 0xaa1   :  { %24541 = vmatpush3.bf16.msra.mxu0 %v30433_v2 }
 0xaa2   :  { %24543 = vmatprep.subr.bf16.mxu0 %v30434_v29 }
 0xaa5   :  { %24545 = vmatpush3.bf16.msra.mxu0 %v30434_v29 }
 0xaa8   :  { %21799 = vmatmul.mubr.f32.vlgmr.msra.gmra.mrb[48].mxu0 %v28517_v44 }
 0xaa9   :  { %21801 = vmatprep.mubr.f32.mxu0 %v28531_v25 }
 0xaac   :  { %21802 = vmatmul.mubr.f32.gmra.mrb[50].mxu0 %v28528_v31 }
 0xaad   :  { %21804 = vmatprep.mubr.f32.mxu0 %v28571_v46 }
 0xab0   :  { %21805 = vmatmul.mubr.f32.gmra.mrb[52].mxu0 %v28569_v16 }
 0xab1   :  { %21807 = vmatprep.mubr.f32.mxu0 %v28583_v32 }
 0xab4   :  { %21808 = vmatmul.mubr.f32.gmra.mrb[54].mxu0 %v28580_v1 }
 0xab5   :  { %22250 = vmatprep.mubr.f32.mxu0 %v30426_v20 }
 0xb7b   :  { %v21800_v0 = vpop.f32.mrb[48].mxu0 }
 0xb7c   :  { %v28717_v40 = vand.u32 4294901760, %v21800_v0  ;;  %v11052_v60 = vpop.f32.mrb[49].mxu0 }
 0xb7d   :  { %v28719_v51 = vand.u32 4294901760, %v11052_v60 }
 0xb7e   :  { %v28722_v44 = vsub.f32 %v21800_v0, %v28717_v40 }
 0xb7f   :  { %v28725_v31 = vsub.f32 %v11052_v60, %v28719_v51  ;;  %v21803_v25 = vpop.f32.mrb[50].mxu0 }
 0xb80   :  { %v28728_v16 = vand.u32 4294901760, %v28722_v44  ;;  %v28730_v32 = vand.u32 4294901760, %v21803_v25  ;;  %v11064_v1 = vpop.f32.mrb[51].mxu0 }
 0xb81   :  { %v28732_v46 = vand.u32 4294901760, %v11064_v1  ;;  %v28735_v18 = vand.u32 4294901760, %v28725_v31 }
 0xb82   :  { %v11192_v57 = vsub.f32 %v28722_v44, %v28728_v16  ;;  %v28740_v3 = vsub.f32 %v21803_v25, %v28730_v32 }
 0xb83   :  { %v28743_v0 = vsub.f32 %v11064_v1, %v28732_v46  ;;  %v21806_v60 = vpop.f32.mrb[52].mxu0  ;;  %v11182_v21 = vsub.f32 %v28725_v31, %v28735_v18 }
 0xb84   :  { %v11193_v54 = vand.u32 4294901760, %v11192_v57  ;;  %v28747_v12 = vand.u32 4294901760, %v21806_v60  ;;  %v11076_v39 = vpop.f32.mrb[53].mxu0  ;;  %v28750_v11 = vand.u32 4294901760, %v28740_v3 }
 0xb85   :  { %v28752_v42 = vand.u32 4294901760, %v11076_v39  ;;  %v11183_v28 = vand.u32 4294901760, %v11182_v21  ;;  %v28755_v25 = vand.u32 4294901760, %v28743_v0 }
 0xb86   :  { %v28758_v1 = vsub.f32 %v21806_v60, %v28747_v12  ;;  %v11212_v24 = vsub.f32 %v28740_v3, %v28750_v11 }
 0xb87   :  { %v28763_v57 = vsub.f32 %v11076_v39, %v28752_v42  ;;  %v21809_v17 = vpop.f32.mrb[54].mxu0  ;;  %21842 = vmatprep.mubr.f32.mxu1 %v11183_v28  ;;  %v11202_v13 = vsub.f32 %v28743_v0, %v28755_v25  ;;  %v28767_v5 = vpack.c.bf16 %v11193_v54, %v11183_v28  ;;  %v30467_v28 = vld [vmem:[#allocation76_spill] sm:$0xff] }
 0xb88   :  { %v28769_v21 = vand.u32 4294901760, %v21809_v17  ;;  %v11088_v15 = vpop.f32.mrb[55].mxu0  ;;  %21843 = vmatmul.mubr.f32.vlgmr.msra.gmra.mrb[20].mxu1 %v11193_v54  ;;  %v11213_v49 = vand.u32 4294901760, %v11212_v24  ;;  %v28772_v60 = vand.u32 4294901760, %v28758_v1 }
 0xb89   :  { %v28774_v38 = vand.u32 4294901760, %v11088_v15  ;;  %24581 = vmatpush3.bf16.msra.mxu1 %v30308_v4  ;;  %v11203_v39 = vand.u32 4294901760, %v11202_v13  ;;  %v28778_v29 = vand.u32 4294901760, %v28763_v57 }
 0xb8a   :  { %v28781_v2 = vsub.f32 %v21809_v17, %v28769_v21  ;;  %24583 = vmatprep.subr.bf16.mxu1 %v30467_v28  ;;  %v11232_v54 = vsub.f32 %v28758_v1, %v28772_v60 }
 0xb8b   :  { %v28787_v24 = vsub.f32 %v11088_v15, %v28774_v38  ;;  %21845 = vmatprep.mubr.f32.mxu1 %v11203_v39  ;;  %v11222_v14 = vsub.f32 %v28763_v57, %v28778_v29  ;;  %v28791_v43 = vpack.c.bf16 %v11213_v49, %v11203_v39 }
 0xb8c   :  { %21846 = vmatmul.mubr.f32.gmra.mrb[22].mxu1 %v11213_v49  ;;  %v11233_v13 = vand.u32 4294901760, %v11232_v54  ;;  %v28794_v53 = vand.u32 4294901760, %v28781_v2 }
 0xb8d   :  { %24585 = vmatpush3.bf16.msra.mxu1 %v30467_v28  ;;  %v11223_v17 = vand.u32 4294901760, %v11222_v14  ;;  %v28798_v10 = vand.u32 4294901760, %v28787_v24 }
 0xb8e   :  { %24587 = vmatprep.subr.bf16.mxu1 %v30382_v48  ;;  %v11252_v15 = vsub.f32 %v28781_v2, %v28794_v53 }
 0xb8f   :  { %21848 = vmatprep.mubr.f32.mxu1 %v11223_v17  ;;  %v11242_v39 = vsub.f32 %v28787_v24, %v28798_v10  ;;  %v28805_v49 = vpack.c.bf16 %v11233_v13, %v11223_v17  ;;  %v30470_v17 = vld [vmem:[#allocation98_spill] sm:$0xff] }
 0xb90   :  { %21849 = vmatmul.mubr.f32.gmra.mrb[24].mxu1 %v11233_v13  ;;  %v11253_v54 = vand.u32 4294901760, %v11252_v15  ;;  %v30468_v13 = vld [vmem:[#allocation59_spill] sm:$0xff] }
 0xb91   :  { %24589 = vmatpush3.bf16.msra.mxu1 %v30382_v48  ;;  %v11243_v28 = vand.u32 4294901760, %v11242_v39  ;;  %v30471_v15 = vld [vmem:[#allocation99_spill] sm:$0xff]  ;;  %v30472_v39 = vld [vmem:[#allocation100_spill] sm:$0xff] }
 0xb92   :  { %24591 = vmatprep.subr.bf16.mxu1 %v30383_v41 }
 0xb93   :  { %21851 = vmatprep.mubr.f32.mxu1 %v11243_v28  ;;  %v28809_v14 = vpack.c.bf16 %v11253_v54, %v11243_v28  ;;  %v30469_v28 = vld [vmem:[#allocation97_spill] sm:$0xff] }
 0xb94   :  { %21852 = vmatmul.mubr.f32.gmra.mrb[26].mxu1 %v11253_v54  ;;  %v30473_v54 = vld [vmem:[#allocation101_spill] sm:$0xff] }
 0xb95   :  { %24593 = vmatpush3.bf16.msra.mxu1 %v30383_v41  ;;  %21886 = vmatprep.mubr.f32.mxu1 %v28719_v51 }
 0xb96   :  { %24595 = vmatprep.subr.bf16.mxu1 %v30384_v30 }
 0xb99   :  { %24597 = vmatpush3.bf16.msra.mxu1 %v30384_v30 }
 0xb9a   :  { %24599 = vmatprep.subr.bf16.mxu1 %v30385_v23 }
 0xb9d   :  { %24601 = vmatpush3.bf16.msra.mxu1 %v30385_v23 }
 0xb9e   :  { %24603 = vmatprep.subr.bf16.mxu1 %v30386_v61 }
 0xba1   :  { %24605 = vmatpush3.bf16.msra.mxu1 %v30386_v61 }
 0xba2   :  { %24607 = vmatprep.subr.bf16.mxu1 %v30468_v13 }
 0xba5   :  { %24609 = vmatpush3.bf16.msra.mxu1 %v30468_v13 }
 0xba6   :  { %24611 = vmatprep.subr.bf16.mxu1 %v30388_v37 }
 0xba8   :  { %21887 = vmatmul.mubr.f32.vlgmr.msra.gmra.mrb[20].mxu1 %v28717_v40 }
 0xba9   :  { %21889 = vmatprep.mubr.f32.mxu1 %v28732_v46  ;;  %24613 = vmatpush3.bf16.msra.mxu1 %v30388_v37 }
 0xbaa   :  { %24615 = vmatprep.subr.bf16.mxu1 %v30389_v27 }
 0xbac   :  { %21890 = vmatmul.mubr.f32.gmra.mrb[22].mxu1 %v28730_v32 }
 0xbad   :  { %21892 = vmatprep.mubr.f32.mxu1 %v28752_v42  ;;  %24617 = vmatpush3.bf16.msra.mxu1 %v30389_v27 }
 0xbae   :  { %24619 = vmatprep.subr.bf16.mxu1 %v30390_v35 }
 0xbb0   :  { %21893 = vmatmul.mubr.f32.gmra.mrb[24].mxu1 %v28747_v12 }
 0xbb1   :  { %21895 = vmatprep.mubr.f32.mxu1 %v28774_v38  ;;  %24621 = vmatpush3.bf16.msra.mxu1 %v30390_v35 }
 0xbb2   :  { %24623 = vmatprep.subr.bf16.mxu1 %v30391_v56 }
 0xbb4   :  { %21896 = vmatmul.mubr.f32.gmra.mrb[26].mxu1 %v28769_v21 }
 0xbb5   :  { %24625 = vmatpush3.bf16.msra.mxu1 %v30391_v56  ;;  %21930 = vmatprep.mubr.f32.mxu1 %v28725_v31 }
 0xbb6   :  { %24627 = vmatprep.subr.bf16.mxu1 %v27395_v19 }
 0xbb9   :  { %24629 = vmatpush3.bf16.msra.mxu1 %v27395_v19 }
 0xbba   :  { %24631 = vmatprep.subr.bf16.mxu1 %v27417_v9 }
 0xbbd   :  { %24633 = vmatpush3.bf16.msra.mxu1 %v27417_v9  ;;  %v30490_v9 = vld [vmem:[#allocation115_spill] sm:$0xff] }
 0xbbe   :  { %24635 = vmatprep.subr.bf16.mxu1 %v27436_v47 }
 0xbc1   :  { %24637 = vmatpush3.bf16.msra.mxu1 %v27436_v47  ;;  %v30489_v47 = vld [vmem:[#allocation114_spill] sm:$0xff] }
 0xbc2   :  { %24639 = vmatprep.subr.bf16.mxu1 %v27258_v33 }
 0xbc5   :  { %24641 = vmatpush3.bf16.msra.mxu1 %v27258_v33  ;;  %v30483_v33 = vld [vmem:[#allocation106_spill] sm:$0xff] }
 0xbc6   :  { %24643 = vmatprep.subr.bf16.mxu1 %v30234_v34 }
 0xbc8   :  { %21931 = vmatmul.mubr.f32.vlgmr.msra.gmra.mrb[20].mxu1 %v28722_v44 }
 0xbc9   :  { %21933 = vmatprep.mubr.f32.mxu1 %v28743_v0  ;;  %24645 = vmatpush3.bf16.msra.mxu1 %v30234_v34 }
 0xbca   :  { %24647 = vmatprep.subr.bf16.mxu1 %v30235_v36 }
 0xbcc   :  { %21934 = vmatmul.mubr.f32.gmra.mrb[22].mxu1 %v28740_v3 }
 0xbcd   :  { %21936 = vmatprep.mubr.f32.mxu1 %v28763_v57  ;;  %24649 = vmatpush3.bf16.msra.mxu1 %v30235_v36 }
 0xbce   :  { %24651 = vmatprep.subr.bf16.mxu1 %v30236_v55 }
 0xbd0   :  { %21937 = vmatmul.mubr.f32.gmra.mrb[24].mxu1 %v28758_v1 }
 0xbd1   :  { %21939 = vmatprep.mubr.f32.mxu1 %v28787_v24  ;;  %24653 = vmatpush3.bf16.msra.mxu1 %v30236_v55 }
 0xbd2   :  { %24655 = vmatprep.subr.bf16.mxu1 %v30237_v8 }
 0xbd4   :  { %21940 = vmatmul.mubr.f32.gmra.mrb[26].mxu1 %v28781_v2 }
 0xbd5   :  { %24657 = vmatpush3.bf16.msra.mxu1 %v30237_v8  ;;  %21974 = vmatprep.mubr.f32.mxu1 %v28735_v18 }
 0xbd6   :  { %24659 = vmatprep.subr.bf16.mxu1 %v30238_v6 }
 0xbd9   :  { %24661 = vmatpush3.bf16.msra.mxu1 %v30238_v6 }
 0xbda   :  { %24663 = vmatprep.subr.bf16.mxu1 %v27029_v52 }
 0xbdd   :  { %24665 = vmatpush3.bf16.msra.mxu1 %v27029_v52 }
 0xbde   :  { %24667 = vmatprep.subr.bf16.mxu1 %v27056_v7 }
 0xbe1   :  { %24669 = vmatpush3.bf16.msra.mxu1 %v27056_v7 }
 0xbe2   :  { %24671 = vmatprep.subr.bf16.mxu1 %v27246_v22 }
 0xbe5   :  { %24673 = vmatpush3.bf16.msra.mxu1 %v27246_v22 }
 0xbe6   :  { %24675 = vmatprep.subr.bf16.mxu1 %v27478_v26 }
 0xbe8   :  { %21975 = vmatmul.mubr.f32.vlgmr.msra.gmra.mrb[20].mxu1 %v28728_v16 }
 0xbe9   :  { %21977 = vmatprep.mubr.f32.mxu1 %v28755_v25  ;;  %24677 = vmatpush3.bf16.msra.mxu1 %v27478_v26  ;;  %v30482_v26 = vld [vmem:[#allocation109_spill] sm:$0xff] }
 0xbea   :  { %24679 = vmatprep.subr.bf16.mxu1 %v30469_v28 }
 0xbec   :  { %21978 = vmatmul.mubr.f32.gmra.mrb[22].mxu1 %v28750_v11 }
 0xbed   :  { %21980 = vmatprep.mubr.f32.mxu1 %v28778_v29  ;;  %24681 = vmatpush3.bf16.msra.mxu1 %v30469_v28  ;;  %v30474_v28 = vld [vmem:[#allocation102_spill] sm:$0xff] }
 0xbee   :  { %24683 = vmatprep.subr.bf16.mxu1 %v30470_v17 }
 0xbf0   :  { %21981 = vmatmul.mubr.f32.gmra.mrb[24].mxu1 %v28772_v60 }
 0xbf1   :  { %21983 = vmatprep.mubr.f32.mxu1 %v28798_v10  ;;  %24685 = vmatpush3.bf16.msra.mxu1 %v30470_v17  ;;  %v30475_v17 = vld [vmem:[#allocation103_spill] sm:$0xff] }
 0xbf2   :  { %24687 = vmatprep.subr.bf16.mxu1 %v30471_v15 }
 0xbf4   :  { %21984 = vmatmul.mubr.f32.gmra.mrb[26].mxu1 %v28794_v53 }
 0xbf5   :  { %24689 = vmatpush3.bf16.msra.mxu1 %v30471_v15  ;;  %22018 = vmatprep.mubr.f32.mxu1 %v28719_v51  ;;  %v24758_v15 = vpack.c.bf16 %v28740_v3, %v28743_v0  ;;  %v24770_v3 = vpack.c.bf16 %v28728_v16, %v28735_v18  ;;  %v30487_v0 = vld [vmem:[#allocation110_spill] sm:$0xff]  ;;  %v24786_v16 = vpack.c.bf16 %v28747_v12, %v28752_v42 }
 0xbf6   :  { %24691 = vmatprep.subr.bf16.mxu1 %v30472_v39 }
 0xbf9   :  { %24693 = vmatpush3.bf16.msra.mxu1 %v30472_v39  ;;  %v30480_v39 = vld [vmem:[#allocation105_spill] sm:$0xff] }
 0xbfa   :  { %24695 = vmatprep.subr.bf16.mxu1 %v30473_v54 }
 0xbfd   :  { %24697 = vmatpush3.bf16.msra.mxu1 %v30473_v54  ;;  %v30479_v54 = vld [vmem:[#allocation104_spill] sm:$0xff] }
 0xbfe   :  { %24699 = vmatprep.subr.bf16.mxu1 %v30474_v28 }
 0xc01   :  { %24701 = vmatpush3.bf16.msra.mxu1 %v30474_v28  ;;  %v24742_v28 = vpack.c.bf16 %v28730_v32, %v28732_v46 }
 0xc02   :  { %24703 = vmatprep.subr.bf16.mxu1 %v30475_v17 }
 0xc05   :  { %24705 = vmatpush3.bf16.msra.mxu1 %v30475_v17  ;;  %v24738_v17 = vpack.c.bf16 %v28717_v40, %v28719_v51 }
 0xc06   :  { %24707 = vmatprep.subr.bf16.mxu1 %v30234_v34 }
 0xc08   :  { %22019 = vmatmul.mubr.f32.vlgmr.msra.gmra.mrb[20].mxu1 %v28717_v40 }
 0xc09   :  { %22021 = vmatprep.mubr.f32.mxu1 %v28732_v46  ;;  %24709 = vmatpush3.bf16.msra.mxu1 %v30234_v34 }
 0xc0a   :  { %24711 = vmatprep.subr.bf16.mxu1 %v30235_v36 }
 0xc0c   :  { %22022 = vmatmul.mubr.f32.gmra.mrb[22].mxu1 %v28730_v32 }
 0xc0d   :  { %22024 = vmatprep.mubr.f32.mxu1 %v28752_v42  ;;  %24713 = vmatpush3.bf16.msra.mxu1 %v30235_v36 }
 0xc0e   :  { %24715 = vmatprep.subr.bf16.mxu1 %v30236_v55 }
 0xc10   :  { %22025 = vmatmul.mubr.f32.gmra.mrb[24].mxu1 %v28747_v12 }
 0xc11   :  { %22027 = vmatprep.mubr.f32.mxu1 %v28774_v38  ;;  %24717 = vmatpush3.bf16.msra.mxu1 %v30236_v55 }
 0xc12   :  { %24719 = vmatprep.subr.bf16.mxu1 %v30237_v8 }
 0xc14   :  { %22028 = vmatmul.mubr.f32.gmra.mrb[26].mxu1 %v28769_v21 }
 0xc15   :  { %24721 = vmatpush3.bf16.msra.mxu1 %v30237_v8  ;;  %22062 = vmatprep.mubr.f32.mxu1 %v28719_v51  ;;  %v30477_v51 = vld [vmem:[#allocation117_spill] sm:$0xff] }
 0xc16   :  { %24723 = vmatprep.subr.bf16.mxu1 %v30238_v6 }
 0xc19   :  { %24725 = vmatpush3.bf16.msra.mxu1 %v30238_v6 }
 0xc1a   :  { %24727 = vmatprep.subr.bf16.mxu1 %v27029_v52 }
 0xc1d   :  { %24729 = vmatpush3.bf16.msra.mxu1 %v27029_v52 }
 0xc1e   :  { %24731 = vmatprep.subr.bf16.mxu1 %v27056_v7 }
 0xc21   :  { %24733 = vmatpush3.bf16.msra.mxu1 %v27056_v7 }
 0xc22   :  { %24735 = vmatprep.subr.bf16.mxu1 %v27246_v22 }
 0xc25   :  { %24737 = vmatpush3.bf16.msra.mxu1 %v27246_v22 }
 0xc26   :  { %24739 = vmatprep.subr.bf16.mxu1 %v24738_v17 }
 0xc28   :  { %22063 = vmatmul.mubr.f32.vlgmr.msra.gmra.mrb[20].mxu1 %v28717_v40  ;;  %v30476_v40 = vld [vmem:[#allocation116_spill] sm:$0xff] }
 0xc29   :  { %22065 = vmatprep.mubr.f32.mxu1 %v28732_v46  ;;  %24741 = vmatpush3.bf16.msra.mxu1 %v24738_v17  ;;  %v24754_v46 = vpack.c.bf16 %v28722_v44, %v28725_v31  ;;  %v30484_v44 = vld [vmem:[#allocation108_spill] sm:$0xff]  ;;  %v30486_v31 = vld [vmem:[#allocation113_spill] sm:$0xff] }
 0xc2a   :  { %24743 = vmatprep.subr.bf16.mxu1 %v24742_v28 }
 0xc2c   :  { %22066 = vmatmul.mubr.f32.gmra.mrb[22].mxu1 %v28730_v32  ;;  %v30478_v32 = vld [vmem:[#allocation118_spill] sm:$0xff] }
 0xc2d   :  { %22068 = vmatprep.mubr.f32.mxu1 %v28752_v42  ;;  %24745 = vmatpush3.bf16.msra.mxu1 %v24742_v28  ;;  %v24806_v42 = vpack.c.bf16 %v28781_v2, %v28787_v24  ;;  %v24818_v2 = vpack.c.bf16 %v28772_v60, %v28778_v29  ;;  %v30492_v29 = vld [vmem:[#allocation37_spill] sm:$0xff]  ;;  %v30495_v60 = vld [vmem:[#allocation67_spill] sm:$0xff] }
 0xc2e   :  { %24747 = vmatprep.subr.bf16.mxu1 %v28767_v5 }
 0xc30   :  { %22069 = vmatmul.mubr.f32.gmra.mrb[24].mxu1 %v28747_v12  ;;  %v24822_v12 = vpack.c.bf16 %v28794_v53, %v28798_v10  ;;  %v30491_v53 = vld [vmem:[#allocation69_spill] sm:$0xff] }
 0xc31   :  { %22071 = vmatprep.mubr.f32.mxu1 %v28774_v38  ;;  %v17641_v18 = vadd.f32 %v30492_v29, %v30491_v53  ;;  %v30501_v53 = vld [vmem:[#allocation68_spill] sm:$0xff]  ;;  %v30502_v29 = vld [vmem:[#allocation91_spill] sm:$0xff] }
 0xc34   :  { %22072 = vmatmul.mubr.f32.gmra.mrb[26].mxu1 %v28769_v21 }
 0xc35   :  { %22082 = vmatprep.mubr.f32.mxu1 %v27630_v59 }
 0xc38   :  { %22083 = vmatmul.mubr.f32.vlgmr.msra.gmra.mrb[20].mxu1 %v30476_v40 }
 0xc39   :  { %24749 = vmatpush3.bf16.msra.mxu1 %v28767_v5  ;;  %22085 = vmatprep.mubr.f32.mxu1 %v30477_v51  ;;  %v30481_v5 = vld [vmem:[#allocation107_spill] sm:$0xff] }
 0xc3a   :  { %24751 = vmatprep.subr.bf16.mxu1 %v28791_v43 }
 0xc3c   :  { %22086 = vmatmul.mubr.f32.gmra.mrb[22].mxu1 %v30478_v32 }
 0xc3d   :  { %24753 = vmatpush3.bf16.msra.mxu1 %v28791_v43  ;;  %22096 = vmatprep.mubr.f32.mxu1 %v30479_v54  ;;  %v30485_v43 = vld [vmem:[#allocation111_spill] sm:$0xff] }
 0xc3e   :  { %24755 = vmatprep.subr.bf16.mxu1 %v24754_v46 }
 0xc40   :  { %22097 = vmatmul.mubr.f32.vlgmr.msra.gmra.mrb[20].mxu1 %v30480_v39 }
 0xc41   :  { %24757 = vmatpush3.bf16.msra.mxu1 %v24754_v46  ;;  %22099 = vmatprep.mubr.f32.mxu1 %v30481_v5  ;;  %v30488_v46 = vld [vmem:[#allocation112_spill] sm:$0xff] }
 0xc42   :  { %24759 = vmatprep.subr.bf16.mxu1 %v24758_v15 }
 0xc44   :  { %22100 = vmatmul.mubr.f32.gmra.mrb[22].mxu1 %v30482_v26 }
 0xc45   :  { %24761 = vmatpush3.bf16.msra.mxu1 %v24758_v15  ;;  %22110 = vmatprep.mubr.f32.mxu1 %v30483_v33  ;;  %v24774_v15 = vpack.c.bf16 %v28750_v11, %v28755_v25  ;;  %v24790_v11 = vpack.c.bf16 %v28769_v21, %v28774_v38  ;;  %v24802_v38 = vpack.c.bf16 %v28758_v1, %v28763_v57  ;;  %v30493_v25 = vld [vmem:[#allocation36_spill] sm:$0xff]  ;;  %v30494_v21 = vld [vmem:[#allocation94_spill] sm:$0xff] }
 0xc46   :  { %24763 = vmatprep.subr.bf16.mxu1 %v24738_v17  ;;  %v17640_v24 = vadd.f32 %v30495_v60, %v30494_v21  ;;  %v29039_v21 = vld [vmem:[#allocation14] sm:$0xff] }
 0xc47   :  { %30503 = vst [vmem:[#allocation73_spill] sm:$0xff] %v29039_v21 }
 0xc48   :  { %22111 = vmatmul.mubr.f32.vlgmr.msra.gmra.mrb[20].mxu1 %v30484_v44 }
 0xc49   :  { %24765 = vmatpush3.bf16.msra.mxu1 %v24738_v17  ;;  %22113 = vmatprep.mubr.f32.mxu1 %v30485_v43 }
 0xc4a   :  { %24767 = vmatprep.subr.bf16.mxu1 %v24742_v28 }
 0xc4c   :  { %22114 = vmatmul.mubr.f32.gmra.mrb[22].mxu1 %v30486_v31 }
 0xc4d   :  { %24769 = vmatpush3.bf16.msra.mxu1 %v24742_v28  ;;  %22124 = vmatprep.mubr.f32.mxu1 %v30487_v0 }
 0xc4e   :  { %24771 = vmatprep.subr.bf16.mxu1 %v24770_v3 }
 0xc50   :  { %22125 = vmatmul.mubr.f32.vlgmr.msra.gmra.mrb[20].mxu1 %v30488_v46 }
 0xc51   :  { %24773 = vmatpush3.bf16.msra.mxu1 %v24770_v3  ;;  %22127 = vmatprep.mubr.f32.mxu1 %v30489_v47 }
 0xc52   :  { %24775 = vmatprep.subr.bf16.mxu1 %v24774_v15 }
 0xc54   :  { %22128 = vmatmul.mubr.f32.gmra.mrb[22].mxu1 %v30490_v9 }
 0xc55   :  { %24777 = vmatpush3.bf16.msra.mxu1 %v24774_v15  ;;  %22138 = vmatprep.mubr.f32.mxu1 %v30479_v54 }
 0xc56   :  { %24779 = vmatprep.subr.bf16.mxu1 %v24738_v17 }
 0xc58   :  { %22139 = vmatmul.mubr.f32.vlgmr.msra.gmra.mrb[20].mxu1 %v30480_v39 }
 0xc59   :  { %24781 = vmatpush3.bf16.msra.mxu1 %v24738_v17  ;;  %22141 = vmatprep.mubr.f32.mxu1 %v30481_v5 }
 0xc5a   :  { %24783 = vmatprep.subr.bf16.mxu1 %v24742_v28 }
 0xc5c   :  { %22142 = vmatmul.mubr.f32.gmra.mrb[22].mxu1 %v30482_v26 }
 0xc5d   :  { %24785 = vmatpush3.bf16.msra.mxu1 %v24742_v28  ;;  %22152 = vmatprep.mubr.f32.mxu1 %v30479_v54 }
 0xc5e   :  { %24787 = vmatprep.subr.bf16.mxu1 %v24786_v16 }
 0xc60   :  { %22153 = vmatmul.mubr.f32.vlgmr.msra.gmra.mrb[20].mxu1 %v30480_v39 }
 0xc61   :  { %24789 = vmatpush3.bf16.msra.mxu1 %v24786_v16  ;;  %22155 = vmatprep.mubr.f32.mxu1 %v30481_v5 }
 0xc62   :  { %24791 = vmatprep.subr.bf16.mxu1 %v24790_v11 }
 0xc64   :  { %22156 = vmatmul.mubr.f32.gmra.mrb[22].mxu1 %v30482_v26 }
 0xc65   :  { %24793 = vmatpush3.bf16.msra.mxu1 %v24790_v11  ;;  %22166 = vmatprep.mubr.f32.mxu1 %v27630_v59 }
 0xc66   :  { %24795 = vmatprep.subr.bf16.mxu1 %v28805_v49 }
 0xc68   :  { %22167 = vmatmul.mubr.f32.vlgmr.msra.gmra.mrb[24].mxu1 %v30476_v40 }
 0xc69   :  { %24797 = vmatpush3.bf16.msra.mxu1 %v28805_v49  ;;  %22169 = vmatprep.mubr.f32.mxu1 %v30477_v51 }
 0xc6a   :  { %24799 = vmatprep.subr.bf16.mxu1 %v28809_v14 }
 0xc6c   :  { %22170 = vmatmul.mubr.f32.gmra.mrb[26].mxu1 %v30478_v32 }
 0xc6d   :  { %24801 = vmatpush3.bf16.msra.mxu1 %v28809_v14  ;;  %22180 = vmatprep.mubr.f32.mxu1 %v30479_v54 }
 0xc6e   :  { %24803 = vmatprep.subr.bf16.mxu1 %v24802_v38 }
 0xc70   :  { %22181 = vmatmul.mubr.f32.vlgmr.msra.gmra.mrb[24].mxu1 %v30480_v39 }
 0xc71   :  { %24805 = vmatpush3.bf16.msra.mxu1 %v24802_v38  ;;  %22183 = vmatprep.mubr.f32.mxu1 %v30481_v5 }
 0xc72   :  { %24807 = vmatprep.subr.bf16.mxu1 %v24806_v42 }
 0xc74   :  { %22184 = vmatmul.mubr.f32.gmra.mrb[26].mxu1 %v30482_v26 }
 0xc75   :  { %24809 = vmatpush3.bf16.msra.mxu1 %v24806_v42  ;;  %22194 = vmatprep.mubr.f32.mxu1 %v30483_v33  ;;  %v29033_v42 = vld [vmem:[#allocation14 + $0x8] sm:$0xff] }
 0xc76   :  { %24811 = vmatprep.subr.bf16.mxu1 %v24786_v16  ;;  %30500 = vst [vmem:[#allocation57_spill] sm:$0xff] %v29033_v42 }
 0xc78   :  { %22195 = vmatmul.mubr.f32.vlgmr.msra.gmra.mrb[24].mxu1 %v30484_v44 }
 0xc79   :  { %24813 = vmatpush3.bf16.msra.mxu1 %v24786_v16  ;;  %22197 = vmatprep.mubr.f32.mxu1 %v30485_v43 }
 0xc7a   :  { %24815 = vmatprep.subr.bf16.mxu1 %v24790_v11 }
 0xc7c   :  { %22198 = vmatmul.mubr.f32.gmra.mrb[26].mxu1 %v30486_v31 }
 0xc7d   :  { %24817 = vmatpush3.bf16.msra.mxu1 %v24790_v11  ;;  %22208 = vmatprep.mubr.f32.mxu1 %v30487_v0 }
 0xc7e   :  { %24819 = vmatprep.subr.bf16.mxu1 %v24818_v2 }
 0xc80   :  { %22209 = vmatmul.mubr.f32.vlgmr.msra.gmra.mrb[24].mxu1 %v30488_v46 }
 0xc81   :  { %24821 = vmatpush3.bf16.msra.mxu1 %v24818_v2  ;;  %22211 = vmatprep.mubr.f32.mxu1 %v30489_v47 }
 0xc82   :  { %24823 = vmatprep.subr.bf16.mxu1 %v24822_v12 }
 0xc84   :  { %22212 = vmatmul.mubr.f32.gmra.mrb[26].mxu1 %v30490_v9 }
 0xc85   :  { %24825 = vmatpush3.bf16.msra.mxu1 %v24822_v12  ;;  %22222 = vmatprep.mubr.f32.mxu1 %v30479_v54 }
 0xc86   :  { %24827 = vmatprep.subr.bf16.mxu1 %v24786_v16 }
 0xc88   :  { %22223 = vmatmul.mubr.f32.vlgmr.msra.gmra.mrb[24].mxu1 %v30480_v39 }
 0xc89   :  { %24829 = vmatpush3.bf16.msra.mxu1 %v24786_v16  ;;  %22225 = vmatprep.mubr.f32.mxu1 %v30481_v5  ;;  %v30498_v16 = vld [vmem:[#allocation75_spill] sm:$0xff] }
 0xc8a   :  { %24831 = vmatprep.subr.bf16.mxu1 %v24790_v11 }
 0xc8c   :  { %22226 = vmatmul.mubr.f32.gmra.mrb[26].mxu1 %v30482_v26 }
 0xc8d   :  { %24833 = vmatpush3.bf16.msra.mxu1 %v24790_v11  ;;  %22236 = vmatprep.mubr.f32.mxu1 %v30479_v54  ;;  %v30499_v11 = vld [vmem:[#allocation71_spill] sm:$0xff] }
 0xc8e   :  { %25123 = vmatprep.subr.bf16.mxu1 %v30234_v34  ;;  %v17643_v38 = vadd.f32 %v30499_v11, %v30498_v16 }
 0xc90   :  { %22237 = vmatmul.mubr.f32.vlgmr.msra.gmra.mrb[24].mxu1 %v30480_v39 }
 0xc91   :  { %22239 = vmatprep.mubr.f32.mxu1 %v30481_v5  ;;  %25125 = vmatpush3.bf16.msra.mxu1 %v30234_v34 }
 0xc92   :  { %25127 = vmatprep.subr.bf16.mxu1 %v30235_v36 }
 0xc94   :  { %22240 = vmatmul.mubr.f32.gmra.mrb[26].mxu1 %v30482_v26  ;;  %v29095_v26 = vld [vmem:[#allocation14 + $0x28] sm:$0xff] }
 0xc95   :  { %25129 = vmatpush3.bf16.msra.mxu1 %v30235_v36  ;;  %30528 = vst [vmem:[#allocation116_spill] sm:$0xff] %v29095_v26 }
 0xc96   :  { %25131 = vmatprep.subr.bf16.mxu1 %v30236_v55 }
 0xc99   :  { %25133 = vmatpush3.bf16.msra.mxu1 %v30236_v55 }
 0xc9a   :  { %25135 = vmatprep.subr.bf16.mxu1 %v30237_v8 }
 0xc9d   :  { %25137 = vmatpush3.bf16.msra.mxu1 %v30237_v8 }
 0xc9e   :  { %25139 = vmatprep.subr.bf16.mxu1 %v30238_v6 }
 0xca1   :  { %25141 = vmatpush3.bf16.msra.mxu1 %v30238_v6 }
 0xca2   :  { %25143 = vmatprep.subr.bf16.mxu1 %v27029_v52 }
 0xca5   :  { %25145 = vmatpush3.bf16.msra.mxu1 %v27029_v52 }
 0xca6   :  { %25147 = vmatprep.subr.bf16.mxu1 %v27056_v7 }
 0xca9   :  { %25149 = vmatpush3.bf16.msra.mxu1 %v27056_v7 }
 0xcaa   :  { %25151 = vmatprep.subr.bf16.mxu1 %v27246_v22 }
 0xcad   :  { %25153 = vmatpush3.bf16.msra.mxu1 %v27246_v22 }
 0xcae   :  { %25155 = vmatprep.subr.bf16.mxu1 %v30308_v4 }
 0xd33   :  { %v22154_v10 = vpop.f32.mrb[20].mxu1 }
 0xd34   :  { %v13269_v1 = vmul.f32 %v22154_v10, %v30493_v25  ;;  %v12632_v57 = vpop.f32.mrb[21].mxu1 }
 0xd35   :  { %v13268_v49 = vmul.f32 %v12632_v57, %v30493_v25  ;;  %v17642_v57 = vadd.f32 %v30502_v29, %v30501_v53 }
 0xd36   :  { %v13277_v14 = vmul.f32 3.0, %v13269_v1  ;;  %v29027_v28 = vadd.f32 %v17641_v18, %v13269_v1 }
 0xd37   :  { %v13276_v17 = vmul.f32 3.0, %v13268_v49  ;;  %v29029_v3 = vadd.f32 %v17640_v24, %v13268_v49  ;;  %v22157_v15 = vpop.f32.mrb[22].mxu1 }
 0xd38   :  { %30496 = vst [vmem:[#allocation81_spill] sm:$0xff] %v29027_v28  ;;  %v13285_v2 = vadd.f32 %v29033_v42, %v13277_v14  ;;  %v13271_v12 = vmul.f32 %v22157_v15, %v30493_v25  ;;  %v12644_v10 = vpop.f32.mrb[23].mxu1  ;;  %v29047_v15 = vld [vmem:[#allocation14 + $0x18] sm:$0xff]  ;;  %v29052_v28 = vld [vmem:[#allocation14 + $0x10] sm:$0xff] }
 0xd39   :  { %30497 = vst [vmem:[#allocation82_spill] sm:$0xff] %v29029_v3  ;;  %v13284_v18 = vadd.f32 %v29039_v21, %v13276_v17  ;;  %v13270_v1 = vmul.f32 %v12644_v10, %v30493_v25  ;;  %30506 = vst [vmem:[#allocation34_spill] sm:$0xff] %v29047_v15 }
 0xd3a   :  { %v13296_v60 = vand.u32 4294901760, %v13285_v2  ;;  %v13279_v24 = vmul.f32 3.0, %v13271_v12  ;;  %v29043_v49 = vadd.f32 %v17643_v38, %v13271_v12  ;;  %30507 = vst [vmem:[#allocation38_spill] sm:$0xff] %v29052_v28 }
 0xd3b   :  { %v13293_v16 = vand.u32 4294901760, %v13284_v18  ;;  %v13278_v11 = vmul.f32 3.0, %v13270_v1  ;;  %v29045_v3 = vadd.f32 %v17642_v57, %v13270_v1 }
 0xd3c   :  { %30504 = vst [vmem:[#allocation66_spill] sm:$0xff] %v29043_v49  ;;  %v13410_v14 = vsub.f32 %v13285_v2, %v13296_v60  ;;  %v13287_v42 = vadd.f32 %v29047_v15, %v13279_v24 }
 0xd3d   :  { %30505 = vst [vmem:[#allocation72_spill] sm:$0xff] %v29045_v3  ;;  %v29050_v53 = vpack.c.bf16 %v13296_v60, %v13293_v16  ;;  %v13403_v29 = vsub.f32 %v13284_v18, %v13293_v16  ;;  %v13286_v17 = vadd.f32 %v29052_v28, %v13278_v11 }
 0xd3e   :  { %v13302_v10 = vand.u32 4294901760, %v13287_v42  ;;  %v13411_v21 = vand.u32 4294901760, %v13410_v14 }
 0xd3f   :  { %v13299_v38 = vand.u32 4294901760, %v13286_v17  ;;  %24835 = vmatprep.subr.bf16.mxu0 %v29050_v53  ;;  %v13404_v12 = vand.u32 4294901760, %v13403_v29  ;;  %v24850_v57 = vpack.c.bf16 %v13410_v14, %v13403_v29 }
 0xd40   :  { %v13424_v1 = vsub.f32 %v13287_v42, %v13302_v10  ;;  %24837 = vmatpush3.bf16.msra.mxu0 %v29050_v53  ;;  %v13412_v2 = vsub.f32 %v13410_v14, %v13411_v21 }
 0xd41   :  { %v29057_v3 = vpack.c.bf16 %v13302_v10, %v13299_v38  ;;  %v13417_v60 = vsub.f32 %v13286_v17, %v13299_v38  ;;  %v13405_v24 = vsub.f32 %v13403_v29, %v13404_v12  ;;  %v24866_v18 = vpack.c.bf16 %v13411_v21, %v13404_v12  ;;  %v30508_v29 = vld [vmem:[#allocation22_spill] sm:$0xff]  ;;  %v30509_v17 = vld [vmem:[#allocation23_spill] sm:$0xff]  ;;  %v30516_v38 = vld [vmem:[#allocation28_spill] sm:$0xff] }
 0xd42   :  { %v13413_v16 = vand.u32 4294901760, %v13412_v2  ;;  %v13425_v15 = vand.u32 4294901760, %v13424_v1  ;;  %v30515_v10 = vld [vmem:[#allocation31_spill] sm:$0xff]  ;;  %v30518_v12 = vld [vmem:[#allocation32_spill] sm:$0xff]  ;;  %v30520_v2 = vld [vmem:[#allocation70_spill] sm:$0xff] }
 0xd43   :  { %24839 = vmatprep.subr.bf16.mxu0 %v29057_v3  ;;  %v13406_v11 = vand.u32 4294901760, %v13405_v24  ;;  %v13418_v28 = vand.u32 4294901760, %v13417_v60  ;;  %v24854_v49 = vpack.c.bf16 %v13424_v1, %v13417_v60 }
 0xd44   :  { %24841 = vmatpush3.bf16.msra.mxu0 %v29057_v3  ;;  %v13426_v9 = vsub.f32 %v13424_v1, %v13425_v15  ;;  %v30519_v1 = vld [vmem:[#allocation33_spill] sm:$0xff] }
 0xd45   :  { %v24842_v47 = vpack.c.bf16 %v13413_v16, %v13406_v11  ;;  %v13419_v42 = vsub.f32 %v13417_v60, %v13418_v28  ;;  %v24870_v46 = vpack.c.bf16 %v13425_v15, %v13418_v28  ;;  %v30510_v28 = vld [vmem:[#allocation26_spill] sm:$0xff]  ;;  %v30521_v60 = vld [vmem:[#allocation92_spill] sm:$0xff] }
 0xd46   :  { %v13427_v0 = vand.u32 4294901760, %v13426_v9  ;;  %v30511_v9 = vld [vmem:[#allocation27_spill] sm:$0xff]  ;;  %v30514_v15 = vld [vmem:[#allocation30_spill] sm:$0xff]  ;;  %v17645_v24 = vadd.f32 %v30521_v60, %v30520_v2 }
 0xd47   :  { %22251 = vmatmul.mubr.f32.vlgmr.msra.gmra.mrb[56].mxu0 %v30318_v45  ;;  %24843 = vmatprep.subr.bf16.mxu0 %v24842_v47  ;;  %v13420_v14 = vand.u32 4294901760, %v13419_v42  ;;  %v30522_v42 = vld [vmem:[#allocation78_spill] sm:$0xff] }
 0xd48   :  { %24845 = vmatpush3.bf16.msra.mxu0 %v24842_v47  ;;  %22253 = vmatprep.mubr.f32.mxu0 %v30319_v63  ;;  %v30512_v47 = vld [vmem:[#allocation24_spill] sm:$0xff] }
 0xd49   :  { %v24846_v21 = vpack.c.bf16 %v13427_v0, %v13420_v14  ;;  %v30513_v0 = vld [vmem:[#allocation25_spill] sm:$0xff] }
 0xd4a   :  { %v30523_v14 = vld [vmem:[#allocation77_spill] sm:$0xff] }
 0xd4b   :  { %22254 = vmatmul.mubr.f32.gmra.mrb[58].mxu0 %v30320_v58  ;;  %24847 = vmatprep.subr.bf16.mxu0 %v24846_v21 }
 0xd4c   :  { %24849 = vmatpush3.bf16.msra.mxu0 %v24846_v21  ;;  %22264 = vmatprep.mubr.f32.mxu0 %v30508_v29  ;;  %v17644_v21 = vadd.f32 %v30523_v14, %v30522_v42 }
 0xd4d   :  { %24851 = vmatprep.subr.bf16.mxu0 %v24850_v57 }
 0xd4f   :  { %22265 = vmatmul.mubr.f32.vlgmr.msra.gmra.mrb[56].mxu0 %v30509_v17 }
 0xd50   :  { %24853 = vmatpush3.bf16.msra.mxu0 %v24850_v57  ;;  %22267 = vmatprep.mubr.f32.mxu0 %v30510_v28 }
 0xd51   :  { %24855 = vmatprep.subr.bf16.mxu0 %v24854_v49 }
 0xd53   :  { %22268 = vmatmul.mubr.f32.gmra.mrb[58].mxu0 %v30511_v9 }
 0xd54   :  { %24857 = vmatpush3.bf16.msra.mxu0 %v24854_v49  ;;  %22278 = vmatprep.mubr.f32.mxu0 %v30512_v47  ;;  %v30517_v49 = vld [vmem:[#allocation29_spill] sm:$0xff] }
 0xd55   :  { %24859 = vmatprep.subr.bf16.mxu0 %v29050_v53 }
 0xd57   :  { %22279 = vmatmul.mubr.f32.vlgmr.msra.gmra.mrb[56].mxu0 %v30513_v0 }
 0xd58   :  { %24861 = vmatpush3.bf16.msra.mxu0 %v29050_v53  ;;  %22281 = vmatprep.mubr.f32.mxu0 %v30514_v15 }
 0xd59   :  { %24863 = vmatprep.subr.bf16.mxu0 %v29057_v3 }
 0xd5b   :  { %22282 = vmatmul.mubr.f32.gmra.mrb[58].mxu0 %v30515_v10 }
 0xd5c   :  { %24865 = vmatpush3.bf16.msra.mxu0 %v29057_v3  ;;  %22292 = vmatprep.mubr.f32.mxu0 %v30516_v38 }
 0xd5d   :  { %24867 = vmatprep.subr.bf16.mxu0 %v24866_v18 }
 0xd5f   :  { %22293 = vmatmul.mubr.f32.vlgmr.msra.gmra.mrb[56].mxu0 %v30517_v49 }
 0xd60   :  { %24869 = vmatpush3.bf16.msra.mxu0 %v24866_v18  ;;  %22295 = vmatprep.mubr.f32.mxu0 %v30518_v12 }
 0xd61   :  { %24871 = vmatprep.subr.bf16.mxu0 %v24870_v46 }
 0xd63   :  { %v22238_v57 = vpop.f32.mrb[24].mxu1  ;;  %22296 = vmatmul.mubr.f32.gmra.mrb[58].mxu0 %v30519_v1 }
 0xd64   :  { %v13273_v16 = vmul.f32 %v22238_v57, %v30493_v25  ;;  %v13246_v11 = vpop.f32.mrb[25].mxu1  ;;  %24873 = vmatpush3.bf16.msra.mxu0 %v24870_v46  ;;  %22306 = vmatprep.mubr.f32.mxu0 %v30508_v29  ;;  %v30526_v57 = vld [vmem:[#allocation65_spill] sm:$0xff]  ;;  %v30527_v46 = vld [vmem:[#allocation79_spill] sm:$0xff] }
 0xd65   :  { %v13272_v18 = vmul.f32 %v13246_v11, %v30493_v25  ;;  %24875 = vmatprep.subr.bf16.mxu0 %v29050_v53  ;;  %v17647_v60 = vadd.f32 %v30527_v46, %v30526_v57 }
 0xd66   :  { %v13281_v31 = vmul.f32 3.0, %v13273_v16  ;;  %v29088_v43 = vadd.f32 %v17645_v24, %v13273_v16  ;;  %v30529_v24 = vld [vmem:[#allocation35_spill] sm:$0xff]  ;;  %v30530_v16 = vld [vmem:[#allocation80_spill] sm:$0xff] }
 0xd67   :  { %v13280_v44 = vmul.f32 3.0, %v13272_v18  ;;  %v29090_v33 = vadd.f32 %v17644_v21, %v13272_v18  ;;  %v22241_v2 = vpop.f32.mrb[26].mxu1  ;;  %22307 = vmatmul.mubr.f32.vlgmr.msra.gmra.mrb[56].mxu0 %v30509_v17  ;;  %v17646_v21 = vadd.f32 %v30530_v16, %v30529_v24  ;;  %v29103_v18 = vld [vmem:[#allocation14 + $0x20] sm:$0xff]  ;;  %v29113_v24 = vld [vmem:[#allocation14 + $0x38] sm:$0xff] }
 0xd68   :  { %30524 = vst [vmem:[#allocation39_spill] sm:$0xff] %v29088_v43  ;;  %v13289_v42 = vadd.f32 %v29095_v26, %v13281_v31  ;;  %v13275_v11 = vmul.f32 %v22241_v2, %v30493_v25  ;;  %v13258_v14 = vpop.f32.mrb[27].mxu1  ;;  %24877 = vmatpush3.bf16.msra.mxu0 %v29050_v53  ;;  %22309 = vmatprep.mubr.f32.mxu0 %v30510_v28  ;;  %30531 = vst [vmem:[#allocation69_spill] sm:$0xff] %v29103_v18 }
 0xd69   :  { %30525 = vst [vmem:[#allocation59_spill] sm:$0xff] %v29090_v33  ;;  %v13288_v33 = vadd.f32 %v29103_v18, %v13280_v44  ;;  %v13274_v57 = vmul.f32 %v13258_v14, %v30493_v25  ;;  %24879 = vmatprep.subr.bf16.mxu0 %v29057_v3  ;;  %30534 = vst [vmem:[#allocation94_spill] sm:$0xff] %v29113_v24 }
 0xd6a   :  { %v13910_v46 = vand.u32 4294901760, %v13289_v42  ;;  %v13283_v31 = vmul.f32 3.0, %v13275_v11  ;;  %v29108_v26 = vadd.f32 %v17647_v60, %v13275_v11  ;;  %v29120_v60 = vld [vmem:[#allocation14 + $0x30] sm:$0xff] }
 0xd6b   :  { %v13907_v2 = vand.u32 4294901760, %v13288_v33  ;;  %v13282_v43 = vmul.f32 3.0, %v13274_v57  ;;  %v29110_v53 = vadd.f32 %v17646_v21, %v13274_v57  ;;  %22310 = vmatmul.mubr.f32.gmra.mrb[58].mxu0 %v30511_v9  ;;  %30535 = vst [vmem:[#allocation67_spill] sm:$0xff] %v29120_v60 }
 0xd6c   :  { %30532 = vst [vmem:[#allocation37_spill] sm:$0xff] %v29108_v26  ;;  %v14024_v5 = vsub.f32 %v13289_v42, %v13910_v46  ;;  %v13291_v16 = vadd.f32 %v29113_v24, %v13283_v31  ;;  %24881 = vmatpush3.bf16.msra.mxu0 %v29057_v3  ;;  %22320 = vmatprep.mubr.f32.mxu0 %v30508_v29 }
 0xd6d   :  { %30533 = vst [vmem:[#allocation36_spill] sm:$0xff] %v29110_v53  ;;  %v29118_v44 = vpack.c.bf16 %v13910_v46, %v13907_v2  ;;  %v14017_v25 = vsub.f32 %v13288_v33, %v13907_v2  ;;  %v13290_v11 = vadd.f32 %v29120_v60, %v13282_v43 }
 0xd6e   :  { %v13916_v14 = vand.u32 4294901760, %v13291_v16  ;;  %v14025_v21 = vand.u32 4294901760, %v14024_v5 }
 0xd6f   :  { %v13913_v57 = vand.u32 4294901760, %v13290_v11  ;;  %22321 = vmatmul.mubr.f32.vlgmr.msra.gmra.mrb[56].mxu0 %v30509_v17  ;;  %24883 = vmatprep.subr.bf16.mxu0 %v29118_v44  ;;  %v14018_v42 = vand.u32 4294901760, %v14017_v25  ;;  %v24898_v31 = vpack.c.bf16 %v14024_v5, %v14017_v25 }
 0xd70   :  { %v14038_v24 = vsub.f32 %v13291_v16, %v13916_v14  ;;  %24885 = vmatpush3.bf16.msra.mxu0 %v29118_v44  ;;  %22323 = vmatprep.mubr.f32.mxu0 %v30510_v28  ;;  %v14026_v3 = vsub.f32 %v14024_v5, %v14025_v21 }
 0xd71   :  { %v24886_v33 = vpack.c.bf16 %v13916_v14, %v13913_v57  ;;  %v14031_v46 = vsub.f32 %v13290_v11, %v13913_v57  ;;  %v14019_v2 = vsub.f32 %v14017_v25, %v14018_v42  ;;  %v24914_v53 = vpack.c.bf16 %v14025_v21, %v14018_v42 }
 0xd72   :  { %v14027_v43 = vand.u32 4294901760, %v14026_v3  ;;  %v14039_v60 = vand.u32 4294901760, %v14038_v24  ;;  %v30543_v3 = vld [vmem:[#allocation54_spill] sm:$0xff] }
 0xd73   :  { %22324 = vmatmul.mubr.f32.gmra.mrb[58].mxu0 %v30511_v9  ;;  %24887 = vmatprep.subr.bf16.mxu0 %v24886_v33  ;;  %v14020_v26 = vand.u32 4294901760, %v14019_v2  ;;  %v14032_v18 = vand.u32 4294901760, %v14031_v46  ;;  %v24902_v39 = vpack.c.bf16 %v14038_v24, %v14031_v46  ;;  %v30546_v2 = vld [vmem:[#allocation58_spill] sm:$0xff] }
 0xd74   :  { %24889 = vmatpush3.bf16.msra.mxu0 %v24886_v33  ;;  %22334 = vmatprep.mubr.f32.mxu0 %v30426_v20  ;;  %v14040_v16 = vsub.f32 %v14038_v24, %v14039_v60  ;;  %v30540_v20 = vld [vmem:[#allocation44_spill] sm:$0xff] }
 0xd75   :  { %v24890_v54 = vpack.c.bf16 %v14027_v43, %v14020_v26  ;;  %v14033_v32 = vsub.f32 %v14031_v46, %v14032_v18  ;;  %v24918_v51 = vpack.c.bf16 %v14039_v60, %v14032_v18  ;;  %v30536_v26 = vld [vmem:[#allocation40_spill] sm:$0xff]  ;;  %v30547_v43 = vld [vmem:[#allocation47_spill] sm:$0xff] }
 0xd76   :  { %v14041_v5 = vand.u32 4294901760, %v14040_v16  ;;  %v30545_v46 = vld [vmem:[#allocation56_spill] sm:$0xff] }
 0xd77   :  { %22335 = vmatmul.mubr.f32.vlgmr.msra.gmra.mrb[60].mxu0 %v30318_v45  ;;  %24891 = vmatprep.subr.bf16.mxu0 %v24890_v54  ;;  %v14034_v25 = vand.u32 4294901760, %v14033_v32  ;;  %v30537_v45 = vld [vmem:[#allocation41_spill] sm:$0xff]  ;;  %v30548_v16 = vld [vmem:[#allocation48_spill] sm:$0xff] }
 0xd78   :  { %24893 = vmatpush3.bf16.msra.mxu0 %v24890_v54  ;;  %22337 = vmatprep.mubr.f32.mxu0 %v30319_v63  ;;  %v30538_v63 = vld [vmem:[#allocation42_spill] sm:$0xff] }
 0xd79   :  { %v24894_v11 = vpack.c.bf16 %v14041_v5, %v14034_v25  ;;  %v30542_v54 = vld [vmem:[#allocation46_spill] sm:$0xff]  ;;  %v30549_v5 = vld [vmem:[#allocation49_spill] sm:$0xff] }
 0xd7a   :  { %v30550_v25 = vld [vmem:[#allocation50_spill] sm:$0xff] }
 0xd7b   :  { %22338 = vmatmul.mubr.f32.gmra.mrb[62].mxu0 %v30320_v58  ;;  %24895 = vmatprep.subr.bf16.mxu0 %v24894_v11  ;;  %v30539_v58 = vld [vmem:[#allocation43_spill] sm:$0xff] }
 0xd7c   :  { %24897 = vmatpush3.bf16.msra.mxu0 %v24894_v11  ;;  %22348 = vmatprep.mubr.f32.mxu0 %v30508_v29 }
 0xd7d   :  { %24899 = vmatprep.subr.bf16.mxu0 %v24898_v31 }
 0xd7f   :  { %22349 = vmatmul.mubr.f32.vlgmr.msra.gmra.mrb[60].mxu0 %v30509_v17 }
 0xd80   :  { %24901 = vmatpush3.bf16.msra.mxu0 %v24898_v31  ;;  %22351 = vmatprep.mubr.f32.mxu0 %v30510_v28 }
 0xd81   :  { %24903 = vmatprep.subr.bf16.mxu0 %v24902_v39 }
 0xd83   :  { %22352 = vmatmul.mubr.f32.gmra.mrb[62].mxu0 %v30511_v9 }
 0xd84   :  { %24905 = vmatpush3.bf16.msra.mxu0 %v24902_v39  ;;  %22362 = vmatprep.mubr.f32.mxu0 %v30512_v47  ;;  %v30541_v39 = vld [vmem:[#allocation45_spill] sm:$0xff] }
 0xd85   :  { %24907 = vmatprep.subr.bf16.mxu0 %v29118_v44 }
 0xd87   :  { %22363 = vmatmul.mubr.f32.vlgmr.msra.gmra.mrb[60].mxu0 %v30513_v0 }
 0xd88   :  { %24909 = vmatpush3.bf16.msra.mxu0 %v29118_v44  ;;  %22365 = vmatprep.mubr.f32.mxu0 %v30514_v15 }
 0xd89   :  { %24911 = vmatprep.subr.bf16.mxu0 %v24886_v33 }
 0xd8b   :  { %22366 = vmatmul.mubr.f32.gmra.mrb[62].mxu0 %v30515_v10 }
 0xd8c   :  { %24913 = vmatpush3.bf16.msra.mxu0 %v24886_v33  ;;  %22376 = vmatprep.mubr.f32.mxu0 %v30516_v38 }
 0xd8d   :  { %24915 = vmatprep.subr.bf16.mxu0 %v24914_v53 }
 0xd8f   :  { %22377 = vmatmul.mubr.f32.vlgmr.msra.gmra.mrb[60].mxu0 %v30517_v49 }
 0xd90   :  { %24917 = vmatpush3.bf16.msra.mxu0 %v24914_v53  ;;  %22379 = vmatprep.mubr.f32.mxu0 %v30518_v12 }
 0xd91   :  { %24919 = vmatprep.subr.bf16.mxu0 %v24918_v51 }
 0xd93   :  { %22380 = vmatmul.mubr.f32.gmra.mrb[62].mxu0 %v30519_v1 }
 0xd94   :  { %24921 = vmatpush3.bf16.msra.mxu0 %v24918_v51  ;;  %22390 = vmatprep.mubr.f32.mxu0 %v30508_v29 }
 0xd95   :  { %24923 = vmatprep.subr.bf16.mxu0 %v29118_v44 }
 0xd97   :  { %22391 = vmatmul.mubr.f32.vlgmr.msra.gmra.mrb[60].mxu0 %v30509_v17 }
 0xd98   :  { %24925 = vmatpush3.bf16.msra.mxu0 %v29118_v44  ;;  %22393 = vmatprep.mubr.f32.mxu0 %v30510_v28 }
 0xd99   :  { %24927 = vmatprep.subr.bf16.mxu0 %v24886_v33 }
 0xd9b   :  { %22394 = vmatmul.mubr.f32.gmra.mrb[62].mxu0 %v30511_v9 }
 0xd9c   :  { %24929 = vmatpush3.bf16.msra.mxu0 %v24886_v33  ;;  %22404 = vmatprep.mubr.f32.mxu0 %v30508_v29  ;;  %v30544_v33 = vld [vmem:[#allocation55_spill] sm:$0xff] }
 0xd9d   :  { %24931 = vmatprep.subr.bf16.mxu0 %v30427_v50 }
 0xd9f   :  { %22405 = vmatmul.mubr.f32.vlgmr.msra.gmra.mrb[60].mxu0 %v30509_v17 }
 0xda0   :  { %22407 = vmatprep.mubr.f32.mxu0 %v30510_v28  ;;  %24933 = vmatpush3.bf16.msra.mxu0 %v30427_v50 }
 0xda1   :  { %24935 = vmatprep.subr.bf16.mxu0 %v30428_v62 }
 0xda3   :  { %22408 = vmatmul.mubr.f32.gmra.mrb[62].mxu0 %v30511_v9 }
 0xda4   :  { %24937 = vmatpush3.bf16.msra.mxu0 %v30428_v62 }
 0xda5   :  { %24939 = vmatprep.subr.bf16.mxu0 %v30536_v26 }
 0xda8   :  { %24941 = vmatpush3.bf16.msra.mxu0 %v30536_v26 }
 0xda9   :  { %24943 = vmatprep.subr.bf16.mxu0 %v30537_v45 }
 0xdac   :  { %24945 = vmatpush3.bf16.msra.mxu0 %v30537_v45 }
 0xdad   :  { %24947 = vmatprep.subr.bf16.mxu0 %v30538_v63 }
 0xdb0   :  { %24949 = vmatpush3.bf16.msra.mxu0 %v30538_v63 }
 0xdb1   :  { %24951 = vmatprep.subr.bf16.mxu0 %v30539_v58 }
 0xdb4   :  { %24953 = vmatpush3.bf16.msra.mxu0 %v30539_v58 }
 0xdb5   :  { %24955 = vmatprep.subr.bf16.mxu0 %v30540_v20 }
 0xdb8   :  { %24957 = vmatpush3.bf16.msra.mxu0 %v30540_v20 }
 0xdb9   :  { %24959 = vmatprep.subr.bf16.mxu0 %v30541_v39 }
 0xdbc   :  { %24961 = vmatpush3.bf16.msra.mxu0 %v30541_v39 }
 0xdbd   :  { %24963 = vmatprep.subr.bf16.mxu0 %v30542_v54 }
 0xe42   :  { %v22322_v51 = vpop.f32.mrb[56].mxu0 }
 0xe43   :  { %v29173_v32 = vand.u32 4294901760, %v22322_v51  ;;  %v13884_v29 = vpop.f32.mrb[57].mxu0 }
 0xe44   :  { %v29175_v17 = vand.u32 4294901760, %v13884_v29 }
 0xe45   :  { %v29178_v28 = vsub.f32 %v22322_v51, %v29173_v32 }
 0xe46   :  { %v29181_v9 = vsub.f32 %v13884_v29, %v29175_v17  ;;  %v22325_v47 = vpop.f32.mrb[58].mxu0 }
 0xe47   :  { %v14613_v0 = vand.u32 4294901760, %v29178_v28  ;;  %v29184_v15 = vand.u32 4294901760, %v22325_v47  ;;  %v13896_v10 = vpop.f32.mrb[59].mxu0 }
 0xe48   :  { %v14603_v38 = vand.u32 4294901760, %v29181_v9  ;;  %v29187_v49 = vand.u32 4294901760, %v13896_v10 }
 0xe49   :  { %v14614_v12 = vsub.f32 %v29178_v28, %v14613_v0  ;;  %v29193_v1 = vsub.f32 %v22325_v47, %v29184_v15 }
 0xe4a   :  { %v29196_v18 = vsub.f32 %v13896_v10, %v29187_v49  ;;  %v14604_v53 = vsub.f32 %v29181_v9, %v14603_v38 }
 0xe4b   :  { %v14633_v24 = vand.u32 4294901760, %v29193_v1  ;;  %v14615_v14 = vand.u32 4294901760, %v14614_v12 }
 0xe4c   :  { %v14623_v44 = vand.u32 4294901760, %v29196_v18  ;;  %v14605_v60 = vand.u32 4294901760, %v14604_v53 }
 0xe4d   :  { %v14634_v21 = vsub.f32 %v29193_v1, %v14633_v24 }
 0xe4e   :  { %22442 = vmatprep.mubr.f32.mxu0 %v14605_v60  ;;  %v14624_v57 = vsub.f32 %v29196_v18, %v14623_v44 }
 0xe4f   :  { %22443 = vmatmul.mubr.f32.vlgmr.msra.gmra.mrb[64].mxu0 %v14615_v14  ;;  %v14635_v31 = vand.u32 4294901760, %v14634_v21 }
 0xe50   :  { %v14625_v42 = vand.u32 4294901760, %v14624_v57  ;;  %24965 = vmatpush3.bf16.msra.mxu0 %v30542_v54 }
 0xe51   :  { %24967 = vmatprep.subr.bf16.mxu0 %v30543_v3 }
 0xe52   :  { %22445 = vmatprep.mubr.f32.mxu0 %v14625_v42 }
 0xe53   :  { %22446 = vmatmul.mubr.f32.gmra.mrb[66].mxu0 %v14635_v31 }
 0xe54   :  { %24969 = vmatpush3.bf16.msra.mxu0 %v30543_v3 }
 0xe55   :  { %24971 = vmatprep.subr.bf16.mxu0 %v30544_v33 }
 0xe58   :  { %24973 = vmatpush3.bf16.msra.mxu0 %v30544_v33 }
 0xe59   :  { %24975 = vmatprep.subr.bf16.mxu0 %v30545_v46 }
 0xe5c   :  { %24977 = vmatpush3.bf16.msra.mxu0 %v30545_v46 }
 0xe5d   :  { %24979 = vmatprep.subr.bf16.mxu0 %v30546_v2 }
 0xe60   :  { %24981 = vmatpush3.bf16.msra.mxu0 %v30546_v2 }
 0xe61   :  { %24983 = vmatprep.subr.bf16.mxu0 %v30547_v43 }
 0xe64   :  { %24985 = vmatpush3.bf16.msra.mxu0 %v30547_v43 }
 0xe65   :  { %24987 = vmatprep.subr.bf16.mxu0 %v30548_v16 }
 0xe68   :  { %24989 = vmatpush3.bf16.msra.mxu0 %v30548_v16 }
 0xe69   :  { %24991 = vmatprep.subr.bf16.mxu0 %v30549_v5 }
 0xe6c   :  { %24993 = vmatpush3.bf16.msra.mxu0 %v30549_v5 }
 0xe6d   :  { %24995 = vmatprep.subr.bf16.mxu0 %v30550_v25 }
 0xe72   :  { %v22406_v11 = vpop.f32.mrb[60].mxu0 }
 0xe73   :  { %v29225_v54 = vand.u32 4294901760, %v22406_v11  ;;  %v14498_v51 = vpop.f32.mrb[61].mxu0 }
 0xe74   :  { %v29227_v29 = vand.u32 4294901760, %v14498_v51 }
 0xe75   :  { %v29230_v47 = vsub.f32 %v22406_v11, %v29225_v54 }
 0xe76   :  { %v29233_v10 = vsub.f32 %v14498_v51, %v29227_v29  ;;  %v22409_v12 = vpop.f32.mrb[62].mxu0 }
 0xe77   :  { %v14653_v53 = vand.u32 4294901760, %v29230_v47  ;;  %v29236_v60 = vand.u32 4294901760, %v22409_v12  ;;  %v14510_v14 = vpop.f32.mrb[63].mxu0 }
 0xe78   :  { %v14643_v21 = vand.u32 4294901760, %v29233_v10  ;;  %v29239_v57 = vand.u32 4294901760, %v14510_v14 }
 0xe79   :  { %v29242_v42 = vsub.f32 %v22409_v12, %v29236_v60  ;;  %v14654_v31 = vsub.f32 %v29230_v47, %v14653_v53 }
 0xe7a   :  { %v29248_v3 = vsub.f32 %v14510_v14, %v29239_v57  ;;  %v14644_v33 = vsub.f32 %v29233_v10, %v14643_v21  ;;  %v30551_v14 = vld [vmem:[#allocation60_spill] sm:$0xff] }
 0xe7b   :  { %v14673_v46 = vand.u32 4294901760, %v29242_v42  ;;  %v14655_v16 = vand.u32 4294901760, %v14654_v31  ;;  %v30552_v31 = vld [vmem:[#allocation61_spill] sm:$0xff] }
 0xe7c   :  { %v14663_v2 = vand.u32 4294901760, %v29248_v3  ;;  %v14645_v43 = vand.u32 4294901760, %v14644_v33  ;;  %v30553_v33 = vld [vmem:[#allocation62_spill] sm:$0xff] }
 0xe7d   :  { %v14674_v5 = vsub.f32 %v29242_v42, %v14673_v46 }
 0xe7e   :  { %22448 = vmatprep.mubr.f32.mxu0 %v14645_v43  ;;  %v14664_v11 = vsub.f32 %v29248_v3, %v14663_v2  ;;  %v30555_v43 = vld [vmem:[#allocation51_spill] sm:$0xff] }
 0xe7f   :  { %22449 = vmatmul.mubr.f32.gmra.mrb[68].mxu0 %v14655_v16  ;;  %v14675_v12 = vand.u32 4294901760, %v14674_v5  ;;  %v30556_v16 = vld [vmem:[#allocation52_spill] sm:$0xff]  ;;  %v30557_v5 = vld [vmem:[#allocation53_spill] sm:$0xff] }
 0xe80   :  { %v14665_v51 = vand.u32 4294901760, %v14664_v11  ;;  %v30558_v11 = vld [vmem:[#allocation83_spill] sm:$0xff] }
 0xe82   :  { %22451 = vmatprep.mubr.f32.mxu0 %v14665_v51 }
 0xe83   :  { %22452 = vmatmul.mubr.f32.gmra.mrb[70].mxu0 %v14675_v12 }
 0xe84   :  { %22486 = vmatprep.mubr.f32.mxu0 %v29175_v17 }
 0xe87   :  { %22487 = vmatmul.mubr.f32.vlgmr.msra.gmra.mrb[64].mxu0 %v29173_v32 }
 0xe88   :  { %24997 = vmatpush3.bf16.msra.mxu0 %v30550_v25  ;;  %22489 = vmatprep.mubr.f32.mxu0 %v29187_v49  ;;  %v30554_v25 = vld [vmem:[#allocation63_spill] sm:$0xff] }
 0xe89   :  { %24999 = vmatprep.subr.bf16.mxu0 %v30551_v14 }
 0xe8b   :  { %22490 = vmatmul.mubr.f32.gmra.mrb[66].mxu0 %v29184_v15 }
 0xe8c   :  { %25001 = vmatpush3.bf16.msra.mxu0 %v30551_v14  ;;  %22492 = vmatprep.mubr.f32.mxu0 %v29227_v29 }
 0xe8d   :  { %25003 = vmatprep.subr.bf16.mxu0 %v30552_v31 }
 0xe8f   :  { %22493 = vmatmul.mubr.f32.gmra.mrb[68].mxu0 %v29225_v54 }
 0xe90   :  { %25005 = vmatpush3.bf16.msra.mxu0 %v30552_v31  ;;  %22495 = vmatprep.mubr.f32.mxu0 %v29239_v57 }
 0xe91   :  { %25007 = vmatprep.subr.bf16.mxu0 %v30553_v33 }
 0xe93   :  { %22496 = vmatmul.mubr.f32.gmra.mrb[70].mxu0 %v29236_v60 }
 0xe94   :  { %25009 = vmatpush3.bf16.msra.mxu0 %v30553_v33  ;;  %22530 = vmatprep.mubr.f32.mxu0 %v29181_v9  ;;  %v30559_v9 = vld [vmem:[#allocation84_spill] sm:$0xff] }
 0xe95   :  { %25011 = vmatprep.subr.bf16.mxu0 %v30554_v25 }
 0xe98   :  { %25013 = vmatpush3.bf16.msra.mxu0 %v30554_v25 }
 0xe99   :  { %25015 = vmatprep.subr.bf16.mxu0 %v30555_v43 }
 0xe9c   :  { %25017 = vmatpush3.bf16.msra.mxu0 %v30555_v43 }
 0xe9d   :  { %25019 = vmatprep.subr.bf16.mxu0 %v30556_v16 }
 0xea0   :  { %25021 = vmatpush3.bf16.msra.mxu0 %v30556_v16 }
 0xea1   :  { %25023 = vmatprep.subr.bf16.mxu0 %v30557_v5 }
 0xea4   :  { %25025 = vmatpush3.bf16.msra.mxu0 %v30557_v5 }
 0xea5   :  { %25027 = vmatprep.subr.bf16.mxu0 %v30427_v50 }
 0xea7   :  { %22531 = vmatmul.mubr.f32.vlgmr.msra.gmra.mrb[64].mxu0 %v29178_v28  ;;  %v30561_v28 = vld [vmem:[#allocation86_spill] sm:$0xff] }
 0xea8   :  { %22533 = vmatprep.mubr.f32.mxu0 %v29196_v18  ;;  %25029 = vmatpush3.bf16.msra.mxu0 %v30427_v50  ;;  %v30564_v18 = vld [vmem:[#allocation89_spill] sm:$0xff] }
 0xea9   :  { %25031 = vmatprep.subr.bf16.mxu0 %v30428_v62 }
 0xeab   :  { %22534 = vmatmul.mubr.f32.gmra.mrb[66].mxu0 %v29193_v1  ;;  %v30563_v1 = vld [vmem:[#allocation88_spill] sm:$0xff] }
 0xeac   :  { %22536 = vmatprep.mubr.f32.mxu0 %v29233_v10  ;;  %25033 = vmatpush3.bf16.msra.mxu0 %v30428_v62 }
 0xead   :  { %25035 = vmatprep.subr.bf16.mxu0 %v30536_v26 }
 0xeaf   :  { %22537 = vmatmul.mubr.f32.gmra.mrb[68].mxu0 %v29230_v47 }
 0xeb0   :  { %22539 = vmatprep.mubr.f32.mxu0 %v29248_v3  ;;  %25037 = vmatpush3.bf16.msra.mxu0 %v30536_v26 }
 0xeb1   :  { %25039 = vmatprep.subr.bf16.mxu0 %v30537_v45 }
 0xeb3   :  { %22540 = vmatmul.mubr.f32.gmra.mrb[70].mxu0 %v29242_v42 }
 0xeb4   :  { %25041 = vmatpush3.bf16.msra.mxu0 %v30537_v45  ;;  %22574 = vmatprep.mubr.f32.mxu0 %v14603_v38  ;;  %v30560_v38 = vld [vmem:[#allocation85_spill] sm:$0xff] }
 0xeb5   :  { %25043 = vmatprep.subr.bf16.mxu0 %v30538_v63 }
 0xeb8   :  { %25045 = vmatpush3.bf16.msra.mxu0 %v30538_v63 }
 0xeb9   :  { %25047 = vmatprep.subr.bf16.mxu0 %v30539_v58 }
 0xebc   :  { %25049 = vmatpush3.bf16.msra.mxu0 %v30539_v58 }
 0xebd   :  { %25051 = vmatprep.subr.bf16.mxu0 %v30540_v20 }
 0xec0   :  { %25053 = vmatpush3.bf16.msra.mxu0 %v30540_v20 }
 0xec1   :  { %25055 = vmatprep.subr.bf16.mxu0 %v30541_v39 }
 0xec4   :  { %25057 = vmatpush3.bf16.msra.mxu0 %v30541_v39 }
 0xec5   :  { %25059 = vmatprep.subr.bf16.mxu0 %v30558_v11 }
 0xec7   :  { %22575 = vmatmul.mubr.f32.vlgmr.msra.gmra.mrb[64].mxu0 %v14613_v0  ;;  %v30562_v0 = vld [vmem:[#allocation87_spill] sm:$0xff] }
 0xec8   :  { %22577 = vmatprep.mubr.f32.mxu0 %v14623_v44  ;;  %25061 = vmatpush3.bf16.msra.mxu0 %v30558_v11 }
 0xec9   :  { %25063 = vmatprep.subr.bf16.mxu0 %v30559_v9 }
 0xecb   :  { %22578 = vmatmul.mubr.f32.gmra.mrb[66].mxu0 %v14633_v24  ;;  %v30565_v24 = vld [vmem:[#allocation90_spill] sm:$0xff] }
 0xecc   :  { %22580 = vmatprep.mubr.f32.mxu0 %v14643_v21  ;;  %25065 = vmatpush3.bf16.msra.mxu0 %v30559_v9 }
 0xecd   :  { %25067 = vmatprep.subr.bf16.mxu0 %v30560_v38 }
 0xecf   :  { %22581 = vmatmul.mubr.f32.gmra.mrb[68].mxu0 %v14653_v53 }
 0xed0   :  { %22583 = vmatprep.mubr.f32.mxu0 %v14663_v2  ;;  %25069 = vmatpush3.bf16.msra.mxu0 %v30560_v38 }
 0xed1   :  { %25071 = vmatprep.subr.bf16.mxu0 %v30561_v28 }
 0xed3   :  { %22584 = vmatmul.mubr.f32.gmra.mrb[70].mxu0 %v14673_v46 }
 0xed4   :  { %25073 = vmatpush3.bf16.msra.mxu0 %v30561_v28  ;;  %22618 = vmatprep.mubr.f32.mxu0 %v29175_v17 }
 0xed5   :  { %25075 = vmatprep.subr.bf16.mxu0 %v30562_v0 }
 0xed8   :  { %25077 = vmatpush3.bf16.msra.mxu0 %v30562_v0  ;;  %v30566_v0 = vld [vmem:[#allocation76_spill] sm:$0xff] }
 0xed9   :  { %25079 = vmatprep.subr.bf16.mxu0 %v30563_v1 }
 0xedc   :  { %25081 = vmatpush3.bf16.msra.mxu0 %v30563_v1 }
 0xedd   :  { %25083 = vmatprep.subr.bf16.mxu0 %v30564_v18 }
 0xee0   :  { %25085 = vmatpush3.bf16.msra.mxu0 %v30564_v18 }
 0xee1   :  { %25087 = vmatprep.subr.bf16.mxu0 %v30565_v24 }
 0xee4   :  { %25089 = vmatpush3.bf16.msra.mxu0 %v30565_v24 }
 0xee5   :  { %25091 = vmatprep.subr.bf16.mxu0 %v30427_v50 }
 0xee7   :  { %22619 = vmatmul.mubr.f32.vlgmr.msra.gmra.mrb[64].mxu0 %v29173_v32 }
 0xee8   :  { %22621 = vmatprep.mubr.f32.mxu0 %v29187_v49  ;;  %25093 = vmatpush3.bf16.msra.mxu0 %v30427_v50 }
 0xee9   :  { %25095 = vmatprep.subr.bf16.mxu0 %v30428_v62 }
 0xeeb   :  { %22622 = vmatmul.mubr.f32.gmra.mrb[66].mxu0 %v29184_v15 }
 0xeec   :  { %22624 = vmatprep.mubr.f32.mxu0 %v29227_v29  ;;  %25097 = vmatpush3.bf16.msra.mxu0 %v30428_v62 }
 0xeed   :  { %25099 = vmatprep.subr.bf16.mxu0 %v30536_v26 }
 0xeef   :  { %22625 = vmatmul.mubr.f32.gmra.mrb[68].mxu0 %v29225_v54 }
 0xef0   :  { %22627 = vmatprep.mubr.f32.mxu0 %v29239_v57  ;;  %25101 = vmatpush3.bf16.msra.mxu0 %v30536_v26 }
 0xef1   :  { %25103 = vmatprep.subr.bf16.mxu0 %v30537_v45 }
 0xef3   :  { %22628 = vmatmul.mubr.f32.gmra.mrb[70].mxu0 %v29236_v60 }
 0xef4   :  { %25105 = vmatpush3.bf16.msra.mxu0 %v30537_v45  ;;  %22662 = vmatprep.mubr.f32.mxu0 %v29175_v17 }
 0xef5   :  { %25107 = vmatprep.subr.bf16.mxu0 %v30538_v63 }
 0xef8   :  { %25109 = vmatpush3.bf16.msra.mxu0 %v30538_v63 }
 0xef9   :  { %25111 = vmatprep.subr.bf16.mxu0 %v30539_v58 }
 0xefc   :  { %25113 = vmatpush3.bf16.msra.mxu0 %v30539_v58 }
 0xefd   :  { %25115 = vmatprep.subr.bf16.mxu0 %v30540_v20 }
 0xf00   :  { %25117 = vmatpush3.bf16.msra.mxu0 %v30540_v20 }
 0xf01   :  { %25119 = vmatprep.subr.bf16.mxu0 %v30541_v39 }
 0xf04   :  { %25121 = vmatpush3.bf16.msra.mxu0 %v30541_v39 }
 0xf07   :  { %22663 = vmatmul.mubr.f32.vlgmr.msra.gmra.mrb[64].mxu0 %v29173_v32 }
 0xf08   :  { %22665 = vmatprep.mubr.f32.mxu0 %v29187_v49 }
 0xf0b   :  { %22666 = vmatmul.mubr.f32.gmra.mrb[66].mxu0 %v29184_v15 }
 0xf0c   :  { %22668 = vmatprep.mubr.f32.mxu0 %v29227_v29 }
 0xf0f   :  { %22669 = vmatmul.mubr.f32.gmra.mrb[68].mxu0 %v29225_v54 }
 0xf10   :  { %22671 = vmatprep.mubr.f32.mxu0 %v29239_v57 }
 0xf13   :  { %22672 = vmatmul.mubr.f32.gmra.mrb[70].mxu0 %v29236_v60 }
 0xfda   :  { %v22664_v50 = vpop.f32.mrb[64].mxu0 }
 0xfdb   :  { %v29372_v62 = vand.u32 4294901760, %v22664_v50  ;;  %v15416_v26 = vpop.f32.mrb[65].mxu0 }
 0xfdc   :  { %v29374_v45 = vand.u32 4294901760, %v15416_v26 }
 0xfdd   :  { %v29377_v63 = vsub.f32 %v22664_v50, %v29372_v62 }
 0xfde   :  { %v29380_v58 = vsub.f32 %v15416_v26, %v29374_v45  ;;  %v22667_v20 = vpop.f32.mrb[66].mxu0 }
 0xfdf   :  { %v29383_v39 = vand.u32 4294901760, %v29377_v63  ;;  %v29385_v32 = vand.u32 4294901760, %v22667_v20  ;;  %v15428_v17 = vpop.f32.mrb[67].mxu0 }
 0xfe0   :  { %v29387_v15 = vand.u32 4294901760, %v15428_v17  ;;  %v29390_v49 = vand.u32 4294901760, %v29380_v58 }
 0xfe1   :  { %v15556_v44 = vsub.f32 %v29377_v63, %v29383_v39  ;;  %v29395_v54 = vsub.f32 %v22667_v20, %v29385_v32 }
 0xfe2   :  { %v29398_v29 = vsub.f32 %v15428_v17, %v29387_v15  ;;  %v22670_v47 = vpop.f32.mrb[68].mxu0  ;;  %v15546_v10 = vsub.f32 %v29380_v58, %v29390_v49 }
 0xfe3   :  { %v15557_v53 = vand.u32 4294901760, %v15556_v44  ;;  %v29402_v60 = vand.u32 4294901760, %v22670_v47  ;;  %v15440_v21 = vpop.f32.mrb[69].mxu0  ;;  %v29405_v57 = vand.u32 4294901760, %v29395_v54 }
 0xfe4   :  { %v29407_v42 = vand.u32 4294901760, %v15440_v21  ;;  %v15547_v3 = vand.u32 4294901760, %v15546_v10  ;;  %v29410_v46 = vand.u32 4294901760, %v29398_v29 }
 0xfe5   :  { %v29413_v2 = vsub.f32 %v22670_v47, %v29402_v60  ;;  %v15576_v51 = vsub.f32 %v29395_v54, %v29405_v57 }
 0xfe6   :  { %v29418_v12 = vsub.f32 %v15440_v21, %v29407_v42  ;;  %v22673_v14 = vpop.f32.mrb[70].mxu0  ;;  %22706 = vmatprep.mubr.f32.mxu1 %v15547_v3  ;;  %v15566_v31 = vsub.f32 %v29398_v29, %v29410_v46  ;;  %v29422_v33 = vpack.c.bf16 %v15557_v53, %v15547_v3 }
 0xfe7   :  { %v29424_v25 = vand.u32 4294901760, %v22673_v14  ;;  %v15452_v43 = vpop.f32.mrb[71].mxu0  ;;  %22707 = vmatmul.mubr.f32.vlgmr.msra.gmra.mrb[28].mxu1 %v15557_v53  ;;  %v15577_v16 = vand.u32 4294901760, %v15576_v51  ;;  %v29427_v5 = vand.u32 4294901760, %v29413_v2  ;;  %v30589_v51 = vld [vmem:[#allocation112_spill] sm:$0xff] }
 0xfe8   :  { %v29429_v11 = vand.u32 4294901760, %v15452_v43  ;;  %25157 = vmatpush3.bf16.msra.mxu1 %v30308_v4  ;;  %v15567_v9 = vand.u32 4294901760, %v15566_v31  ;;  %v29433_v38 = vand.u32 4294901760, %v29418_v12  ;;  %v30590_v31 = vld [vmem:[#allocation114_spill] sm:$0xff] }
 0xfe9   :  { %v29436_v28 = vsub.f32 %v22673_v14, %v29424_v25  ;;  %25159 = vmatprep.subr.bf16.mxu1 %v30566_v0  ;;  %v15596_v1 = vsub.f32 %v29413_v2, %v29427_v5  ;;  %v25350_v14 = vpack.c.bf16 %v29405_v57, %v29410_v46 }
 0xfea   :  { %v29442_v18 = vsub.f32 %v15452_v43, %v29429_v11  ;;  %22709 = vmatprep.mubr.f32.mxu1 %v15567_v9  ;;  %v15586_v24 = vsub.f32 %v29418_v12, %v29433_v38  ;;  %v29446_v4 = vpack.c.bf16 %v15577_v16, %v15567_v9 }
 0xfeb   :  { %22710 = vmatmul.mubr.f32.gmra.mrb[30].mxu1 %v15577_v16  ;;  %v15597_v50 = vand.u32 4294901760, %v15596_v1  ;;  %v29449_v26 = vand.u32 4294901760, %v29436_v28 }
 0xfec   :  { %v29452_v20 = vand.u32 4294901760, %v29442_v18  ;;  %25161 = vmatpush3.bf16.msra.mxu1 %v30566_v0  ;;  %v15587_v17 = vand.u32 4294901760, %v15586_v24 }
 0xfed   :  { %25163 = vmatprep.subr.bf16.mxu1 %v30382_v48  ;;  %v15616_v44 = vsub.f32 %v29436_v28, %v29449_v26 }
 0xfee   :  { %22712 = vmatprep.mubr.f32.mxu1 %v15587_v17  ;;  %v15606_v47 = vsub.f32 %v29442_v18, %v29452_v20  ;;  %v29460_v10 = vpack.c.bf16 %v15597_v50, %v15587_v17 }
 0xfef   :  { %22713 = vmatmul.mubr.f32.gmra.mrb[32].mxu1 %v15597_v50  ;;  %v15617_v53 = vand.u32 4294901760, %v15616_v44 }
 0xff0   :  { %25165 = vmatpush3.bf16.msra.mxu1 %v30382_v48  ;;  %v15607_v21 = vand.u32 4294901760, %v15606_v47  ;;  %v30568_v48 = vld [vmem:[#allocation95_spill] sm:$0xff] }
 0xff1   :  { %25167 = vmatprep.subr.bf16.mxu1 %v30383_v41 }
 0xff2   :  { %22715 = vmatprep.mubr.f32.mxu1 %v15607_v21  ;;  %v29464_v3 = vpack.c.bf16 %v15617_v53, %v15607_v21 }
 0xff3   :  { %22716 = vmatmul.mubr.f32.gmra.mrb[34].mxu1 %v15617_v53 }
 0xff4   :  { %25169 = vmatpush3.bf16.msra.mxu1 %v30383_v41  ;;  %22750 = vmatprep.mubr.f32.mxu1 %v29374_v45  ;;  %v30569_v41 = vld [vmem:[#allocation64_spill] sm:$0xff] }
 0xff5   :  { %25171 = vmatprep.subr.bf16.mxu1 %v30384_v30 }
 0xff8   :  { %25173 = vmatpush3.bf16.msra.mxu1 %v30384_v30  ;;  %v30567_v30 = vld [vmem:[#allocation93_spill] sm:$0xff] }
 0xff9   :  { %25175 = vmatprep.subr.bf16.mxu1 %v30385_v23 }
 0xffc   :  { %25177 = vmatpush3.bf16.msra.mxu1 %v30385_v23  ;;  %v30571_v23 = vld [vmem:[#allocation97_spill] sm:$0xff] }
 0xffd   :  { %25179 = vmatprep.subr.bf16.mxu1 %v30386_v61 }
0x1000   :  { %25181 = vmatpush3.bf16.msra.mxu1 %v30386_v61  ;;  %v30572_v61 = vld [vmem:[#allocation98_spill] sm:$0xff] }
0x1001   :  { %25183 = vmatprep.subr.bf16.mxu1 %v30468_v13 }
0x1004   :  { %25185 = vmatpush3.bf16.msra.mxu1 %v30468_v13  ;;  %v30577_v13 = vld [vmem:[#allocation103_spill] sm:$0xff] }
0x1005   :  { %25187 = vmatprep.subr.bf16.mxu1 %v30388_v37 }
0x1007   :  { %22751 = vmatmul.mubr.f32.vlgmr.msra.gmra.mrb[28].mxu1 %v29372_v62 }
0x1008   :  { %22753 = vmatprep.mubr.f32.mxu1 %v29387_v15  ;;  %25189 = vmatpush3.bf16.msra.mxu1 %v30388_v37  ;;  %v30574_v37 = vld [vmem:[#allocation100_spill] sm:$0xff] }
0x1009   :  { %25191 = vmatprep.subr.bf16.mxu1 %v30389_v27 }
0x100b   :  { %22754 = vmatmul.mubr.f32.gmra.mrb[30].mxu1 %v29385_v32 }
0x100c   :  { %22756 = vmatprep.mubr.f32.mxu1 %v29407_v42  ;;  %25193 = vmatpush3.bf16.msra.mxu1 %v30389_v27  ;;  %v30575_v27 = vld [vmem:[#allocation101_spill] sm:$0xff] }
0x100d   :  { %25195 = vmatprep.subr.bf16.mxu1 %v30390_v35 }
0x100f   :  { %22757 = vmatmul.mubr.f32.gmra.mrb[32].mxu1 %v29402_v60 }
0x1010   :  { %22759 = vmatprep.mubr.f32.mxu1 %v29429_v11  ;;  %25197 = vmatpush3.bf16.msra.mxu1 %v30390_v35  ;;  %v30576_v35 = vld [vmem:[#allocation102_spill] sm:$0xff] }
0x1011   :  { %25199 = vmatprep.subr.bf16.mxu1 %v30391_v56 }
0x1013   :  { %22760 = vmatmul.mubr.f32.gmra.mrb[34].mxu1 %v29424_v25 }
0x1014   :  { %25201 = vmatpush3.bf16.msra.mxu1 %v30391_v56  ;;  %22794 = vmatprep.mubr.f32.mxu1 %v29380_v58  ;;  %v30573_v56 = vld [vmem:[#allocation99_spill] sm:$0xff] }
0x1015   :  { %25203 = vmatprep.subr.bf16.mxu1 %v27395_v19 }
0x1018   :  { %25205 = vmatpush3.bf16.msra.mxu1 %v27395_v19  ;;  %v30570_v19 = vld [vmem:[#allocation96_spill] sm:$0xff] }
0x1019   :  { %25207 = vmatprep.subr.bf16.mxu1 %v30567_v30 }
0x101c   :  { %25209 = vmatpush3.bf16.msra.mxu1 %v30567_v30 }
0x101d   :  { %25211 = vmatprep.subr.bf16.mxu1 %v30568_v48 }
0x1020   :  { %25213 = vmatpush3.bf16.msra.mxu1 %v30568_v48 }
0x1021   :  { %25215 = vmatprep.subr.bf16.mxu1 %v30569_v41 }
0x1024   :  { %25217 = vmatpush3.bf16.msra.mxu1 %v30569_v41 }
0x1025   :  { %25219 = vmatprep.subr.bf16.mxu1 %v30234_v34 }
0x1027   :  { %22795 = vmatmul.mubr.f32.vlgmr.msra.gmra.mrb[28].mxu1 %v29377_v63 }
0x1028   :  { %22797 = vmatprep.mubr.f32.mxu1 %v29398_v29  ;;  %25221 = vmatpush3.bf16.msra.mxu1 %v30234_v34 }
0x1029   :  { %25223 = vmatprep.subr.bf16.mxu1 %v30235_v36 }
0x102b   :  { %22798 = vmatmul.mubr.f32.gmra.mrb[30].mxu1 %v29395_v54 }
0x102c   :  { %22800 = vmatprep.mubr.f32.mxu1 %v29418_v12  ;;  %25225 = vmatpush3.bf16.msra.mxu1 %v30235_v36 }
0x102d   :  { %25227 = vmatprep.subr.bf16.mxu1 %v30236_v55 }
0x102f   :  { %22801 = vmatmul.mubr.f32.gmra.mrb[32].mxu1 %v29413_v2 }
0x1030   :  { %22803 = vmatprep.mubr.f32.mxu1 %v29442_v18  ;;  %25229 = vmatpush3.bf16.msra.mxu1 %v30236_v55 }
0x1031   :  { %25231 = vmatprep.subr.bf16.mxu1 %v30237_v8 }
0x1033   :  { %22804 = vmatmul.mubr.f32.gmra.mrb[34].mxu1 %v29436_v28 }
0x1034   :  { %25233 = vmatpush3.bf16.msra.mxu1 %v30237_v8  ;;  %22838 = vmatprep.mubr.f32.mxu1 %v29390_v49 }
0x1035   :  { %25235 = vmatprep.subr.bf16.mxu1 %v30238_v6 }
0x1038   :  { %25237 = vmatpush3.bf16.msra.mxu1 %v30238_v6 }
0x1039   :  { %25239 = vmatprep.subr.bf16.mxu1 %v27029_v52 }
0x103c   :  { %25241 = vmatpush3.bf16.msra.mxu1 %v27029_v52 }
0x103d   :  { %25243 = vmatprep.subr.bf16.mxu1 %v27056_v7 }
0x1040   :  { %25245 = vmatpush3.bf16.msra.mxu1 %v27056_v7 }
0x1041   :  { %25247 = vmatprep.subr.bf16.mxu1 %v27246_v22 }
0x1044   :  { %25249 = vmatpush3.bf16.msra.mxu1 %v27246_v22 }
0x1045   :  { %25251 = vmatprep.subr.bf16.mxu1 %v30570_v19 }
0x1047   :  { %22839 = vmatmul.mubr.f32.vlgmr.msra.gmra.mrb[28].mxu1 %v29383_v39 }
0x1048   :  { %22841 = vmatprep.mubr.f32.mxu1 %v29410_v46  ;;  %25253 = vmatpush3.bf16.msra.mxu1 %v30570_v19 }
0x1049   :  { %25255 = vmatprep.subr.bf16.mxu1 %v30571_v23 }
0x104b   :  { %22842 = vmatmul.mubr.f32.gmra.mrb[30].mxu1 %v29405_v57  ;;  %v25398_v57 = vpack.c.bf16 %v29449_v26, %v29452_v20 }
0x104c   :  { %22844 = vmatprep.mubr.f32.mxu1 %v29433_v38  ;;  %25257 = vmatpush3.bf16.msra.mxu1 %v30571_v23 }
0x104d   :  { %25259 = vmatprep.subr.bf16.mxu1 %v30572_v61 }
0x104f   :  { %22845 = vmatmul.mubr.f32.gmra.mrb[32].mxu1 %v29427_v5 }
0x1050   :  { %22847 = vmatprep.mubr.f32.mxu1 %v29452_v20  ;;  %25261 = vmatpush3.bf16.msra.mxu1 %v30572_v61 }
0x1051   :  { %25263 = vmatprep.subr.bf16.mxu1 %v30573_v56 }
0x1053   :  { %22848 = vmatmul.mubr.f32.gmra.mrb[34].mxu1 %v29449_v26 }
0x1054   :  { %25265 = vmatpush3.bf16.msra.mxu1 %v30573_v56  ;;  %22882 = vmatprep.mubr.f32.mxu1 %v29374_v45 }
0x1055   :  { %25267 = vmatprep.subr.bf16.mxu1 %v30574_v37 }
0x1058   :  { %25269 = vmatpush3.bf16.msra.mxu1 %v30574_v37 }
0x1059   :  { %25271 = vmatprep.subr.bf16.mxu1 %v30575_v27 }
0x105c   :  { %25273 = vmatpush3.bf16.msra.mxu1 %v30575_v27 }
0x105d   :  { %25275 = vmatprep.subr.bf16.mxu1 %v30576_v35 }
0x1060   :  { %25277 = vmatpush3.bf16.msra.mxu1 %v30576_v35 }
0x1061   :  { %25279 = vmatprep.subr.bf16.mxu1 %v30577_v13 }
0x1064   :  { %25281 = vmatpush3.bf16.msra.mxu1 %v30577_v13 }
0x1065   :  { %25283 = vmatprep.subr.bf16.mxu1 %v30234_v34 }
0x1067   :  { %22883 = vmatmul.mubr.f32.vlgmr.msra.gmra.mrb[28].mxu1 %v29372_v62 }
0x1068   :  { %22885 = vmatprep.mubr.f32.mxu1 %v29387_v15  ;;  %25285 = vmatpush3.bf16.msra.mxu1 %v30234_v34  ;;  %v25314_v34 = vpack.c.bf16 %v29372_v62, %v29374_v45 }
0x1069   :  { %25287 = vmatprep.subr.bf16.mxu1 %v30235_v36 }
0x106b   :  { %22886 = vmatmul.mubr.f32.gmra.mrb[30].mxu1 %v29385_v32 }
0x106c   :  { %22888 = vmatprep.mubr.f32.mxu1 %v29407_v42  ;;  %25289 = vmatpush3.bf16.msra.mxu1 %v30235_v36  ;;  %v25318_v36 = vpack.c.bf16 %v29385_v32, %v29387_v15 }
0x106d   :  { %25291 = vmatprep.subr.bf16.mxu1 %v30236_v55 }
0x106f   :  { %22889 = vmatmul.mubr.f32.gmra.mrb[32].mxu1 %v29402_v60 }
0x1070   :  { %22891 = vmatprep.mubr.f32.mxu1 %v29429_v11  ;;  %25293 = vmatpush3.bf16.msra.mxu1 %v30236_v55  ;;  %v25330_v55 = vpack.c.bf16 %v29377_v63, %v29380_v58  ;;  %v30585_v63 = vld [vmem:[#allocation108_spill] sm:$0xff]  ;;  %v30586_v58 = vld [vmem:[#allocation111_spill] sm:$0xff] }
0x1071   :  { %25295 = vmatprep.subr.bf16.mxu1 %v30237_v8 }
0x1073   :  { %22892 = vmatmul.mubr.f32.gmra.mrb[34].mxu1 %v29424_v25 }
0x1074   :  { %25297 = vmatpush3.bf16.msra.mxu1 %v30237_v8  ;;  %22926 = vmatprep.mubr.f32.mxu1 %v29374_v45  ;;  %v30580_v8 = vld [vmem:[#allocation104_spill] sm:$0xff]  ;;  %v30583_v45 = vld [vmem:[#allocation109_spill] sm:$0xff] }
0x1075   :  { %25299 = vmatprep.subr.bf16.mxu1 %v30238_v6 }
0x1078   :  { %25301 = vmatpush3.bf16.msra.mxu1 %v30238_v6  ;;  %v30581_v6 = vld [vmem:[#allocation105_spill] sm:$0xff] }
0x1079   :  { %25303 = vmatprep.subr.bf16.mxu1 %v27029_v52 }
0x107c   :  { %25305 = vmatpush3.bf16.msra.mxu1 %v27029_v52  ;;  %v30579_v52 = vld [vmem:[#allocation118_spill] sm:$0xff] }
0x107d   :  { %25307 = vmatprep.subr.bf16.mxu1 %v27056_v7 }
0x1080   :  { %25309 = vmatpush3.bf16.msra.mxu1 %v27056_v7  ;;  %v30578_v7 = vld [vmem:[#allocation117_spill] sm:$0xff] }
0x1081   :  { %25311 = vmatprep.subr.bf16.mxu1 %v27246_v22 }
0x1084   :  { %25313 = vmatpush3.bf16.msra.mxu1 %v27246_v22  ;;  %v25334_v22 = vpack.c.bf16 %v29395_v54, %v29398_v29  ;;  %v25346_v54 = vpack.c.bf16 %v29383_v39, %v29390_v49  ;;  %v30588_v29 = vld [vmem:[#allocation110_spill] sm:$0xff]  ;;  %v25362_v39 = vpack.c.bf16 %v29402_v60, %v29407_v42  ;;  %v25366_v49 = vpack.c.bf16 %v29424_v25, %v29429_v11 }
0x1085   :  { %25315 = vmatprep.subr.bf16.mxu1 %v25314_v34 }
0x1087   :  { %22927 = vmatmul.mubr.f32.vlgmr.msra.gmra.mrb[28].mxu1 %v29372_v62  ;;  %v30582_v62 = vld [vmem:[#allocation107_spill] sm:$0xff] }
0x1088   :  { %22929 = vmatprep.mubr.f32.mxu1 %v29387_v15  ;;  %25317 = vmatpush3.bf16.msra.mxu1 %v25314_v34  ;;  %v30587_v15 = vld [vmem:[#allocation113_spill] sm:$0xff] }
0x1089   :  { %25319 = vmatprep.subr.bf16.mxu1 %v25318_v36 }
0x108b   :  { %22930 = vmatmul.mubr.f32.gmra.mrb[30].mxu1 %v29385_v32  ;;  %v30584_v32 = vld [vmem:[#allocation106_spill] sm:$0xff] }
0x108c   :  { %22932 = vmatprep.mubr.f32.mxu1 %v29407_v42  ;;  %25321 = vmatpush3.bf16.msra.mxu1 %v25318_v36 }
0x108d   :  { %25323 = vmatprep.subr.bf16.mxu1 %v29422_v33 }
0x108f   :  { %22933 = vmatmul.mubr.f32.gmra.mrb[32].mxu1 %v29402_v60  ;;  %v25378_v60 = vpack.c.bf16 %v29413_v2, %v29418_v12 }
0x1090   :  { %22935 = vmatprep.mubr.f32.mxu1 %v29429_v11 }
0x1093   :  { %22936 = vmatmul.mubr.f32.gmra.mrb[34].mxu1 %v29424_v25 }
0x1094   :  { %22946 = vmatprep.mubr.f32.mxu1 %v27630_v59 }
0x1097   :  { %22947 = vmatmul.mubr.f32.vlgmr.msra.gmra.mrb[28].mxu1 %v30476_v40 }
0x1098   :  { %25325 = vmatpush3.bf16.msra.mxu1 %v29422_v33  ;;  %22949 = vmatprep.mubr.f32.mxu1 %v30578_v7  ;;  %v30591_v33 = vld [vmem:[#allocation115_spill] sm:$0xff] }
0x1099   :  { %25327 = vmatprep.subr.bf16.mxu1 %v29446_v4 }
0x109b   :  { %22950 = vmatmul.mubr.f32.gmra.mrb[30].mxu1 %v30579_v52 }
0x109c   :  { %25329 = vmatpush3.bf16.msra.mxu1 %v29446_v4  ;;  %22960 = vmatprep.mubr.f32.mxu1 %v30580_v8 }
0x109d   :  { %25331 = vmatprep.subr.bf16.mxu1 %v25330_v55 }
0x109f   :  { %22961 = vmatmul.mubr.f32.vlgmr.msra.gmra.mrb[28].mxu1 %v30581_v6 }
0x10a0   :  { %25333 = vmatpush3.bf16.msra.mxu1 %v25330_v55  ;;  %22963 = vmatprep.mubr.f32.mxu1 %v30582_v62 }
0x10a1   :  { %25335 = vmatprep.subr.bf16.mxu1 %v25334_v22 }
0x10a3   :  { %22964 = vmatmul.mubr.f32.gmra.mrb[30].mxu1 %v30583_v45 }
0x10a4   :  { %25337 = vmatpush3.bf16.msra.mxu1 %v25334_v22  ;;  %22974 = vmatprep.mubr.f32.mxu1 %v30584_v32 }
0x10a5   :  { %25339 = vmatprep.subr.bf16.mxu1 %v25314_v34 }
0x10a7   :  { %22975 = vmatmul.mubr.f32.vlgmr.msra.gmra.mrb[28].mxu1 %v30585_v63 }
0x10a8   :  { %25341 = vmatpush3.bf16.msra.mxu1 %v25314_v34  ;;  %22977 = vmatprep.mubr.f32.mxu1 %v30586_v58 }
0x10a9   :  { %25343 = vmatprep.subr.bf16.mxu1 %v25318_v36 }
0x10ab   :  { %22978 = vmatmul.mubr.f32.gmra.mrb[30].mxu1 %v30587_v15 }
0x10ac   :  { %25345 = vmatpush3.bf16.msra.mxu1 %v25318_v36  ;;  %22988 = vmatprep.mubr.f32.mxu1 %v30588_v29 }
0x10ad   :  { %25347 = vmatprep.subr.bf16.mxu1 %v25346_v54 }
0x10af   :  { %22989 = vmatmul.mubr.f32.vlgmr.msra.gmra.mrb[28].mxu1 %v30589_v51 }
0x10b0   :  { %25349 = vmatpush3.bf16.msra.mxu1 %v25346_v54  ;;  %22991 = vmatprep.mubr.f32.mxu1 %v30590_v31 }
0x10b1   :  { %25351 = vmatprep.subr.bf16.mxu1 %v25350_v14 }
0x10b3   :  { %22992 = vmatmul.mubr.f32.gmra.mrb[30].mxu1 %v30591_v33 }
0x10b4   :  { %25353 = vmatpush3.bf16.msra.mxu1 %v25350_v14  ;;  %23002 = vmatprep.mubr.f32.mxu1 %v30580_v8 }
0x10b5   :  { %25355 = vmatprep.subr.bf16.mxu1 %v25314_v34 }
0x10b7   :  { %23003 = vmatmul.mubr.f32.vlgmr.msra.gmra.mrb[28].mxu1 %v30581_v6 }
0x10b8   :  { %25357 = vmatpush3.bf16.msra.mxu1 %v25314_v34  ;;  %23005 = vmatprep.mubr.f32.mxu1 %v30582_v62 }
0x10b9   :  { %25359 = vmatprep.subr.bf16.mxu1 %v25318_v36 }
0x10bb   :  { %23006 = vmatmul.mubr.f32.gmra.mrb[30].mxu1 %v30583_v45 }
0x10bc   :  { %25361 = vmatpush3.bf16.msra.mxu1 %v25318_v36  ;;  %23016 = vmatprep.mubr.f32.mxu1 %v30580_v8 }
0x10bd   :  { %25363 = vmatprep.subr.bf16.mxu1 %v25362_v39 }
0x10bf   :  { %23017 = vmatmul.mubr.f32.vlgmr.msra.gmra.mrb[28].mxu1 %v30581_v6 }
0x10c0   :  { %25365 = vmatpush3.bf16.msra.mxu1 %v25362_v39  ;;  %23019 = vmatprep.mubr.f32.mxu1 %v30582_v62 }
0x10c1   :  { %25367 = vmatprep.subr.bf16.mxu1 %v25366_v49 }
0x10c3   :  { %23020 = vmatmul.mubr.f32.gmra.mrb[30].mxu1 %v30583_v45 }
0x10c4   :  { %25369 = vmatpush3.bf16.msra.mxu1 %v25366_v49  ;;  %23030 = vmatprep.mubr.f32.mxu1 %v27630_v59  ;;  %v25382_v59 = vpack.c.bf16 %v29436_v28, %v29442_v18 }
0x10c5   :  { %25371 = vmatprep.subr.bf16.mxu1 %v29460_v10 }
0x10c7   :  { %23031 = vmatmul.mubr.f32.vlgmr.msra.gmra.mrb[32].mxu1 %v30476_v40  ;;  %v25394_v40 = vpack.c.bf16 %v29427_v5, %v29433_v38 }
0x10c8   :  { %25373 = vmatpush3.bf16.msra.mxu1 %v29460_v10  ;;  %23033 = vmatprep.mubr.f32.mxu1 %v30578_v7 }
0x10c9   :  { %25375 = vmatprep.subr.bf16.mxu1 %v29464_v3 }
0x10cb   :  { %23034 = vmatmul.mubr.f32.gmra.mrb[34].mxu1 %v30579_v52 }
0x10cc   :  { %25377 = vmatpush3.bf16.msra.mxu1 %v29464_v3  ;;  %23044 = vmatprep.mubr.f32.mxu1 %v30580_v8 }
0x10cd   :  { %25379 = vmatprep.subr.bf16.mxu1 %v25378_v60 }
0x10cf   :  { %23045 = vmatmul.mubr.f32.vlgmr.msra.gmra.mrb[32].mxu1 %v30581_v6 }
0x10d0   :  { %25381 = vmatpush3.bf16.msra.mxu1 %v25378_v60  ;;  %23047 = vmatprep.mubr.f32.mxu1 %v30582_v62 }
0x10d1   :  { %25383 = vmatprep.subr.bf16.mxu1 %v25382_v59 }
0x10d3   :  { %23048 = vmatmul.mubr.f32.gmra.mrb[34].mxu1 %v30583_v45 }
0x10d4   :  { %25385 = vmatpush3.bf16.msra.mxu1 %v25382_v59  ;;  %23058 = vmatprep.mubr.f32.mxu1 %v30584_v32 }
0x10d5   :  { %25387 = vmatprep.subr.bf16.mxu1 %v25362_v39 }
0x10d7   :  { %23059 = vmatmul.mubr.f32.vlgmr.msra.gmra.mrb[32].mxu1 %v30585_v63 }
0x10d8   :  { %25389 = vmatpush3.bf16.msra.mxu1 %v25362_v39  ;;  %23061 = vmatprep.mubr.f32.mxu1 %v30586_v58 }
0x10d9   :  { %25391 = vmatprep.subr.bf16.mxu1 %v25366_v49 }
0x10db   :  { %23062 = vmatmul.mubr.f32.gmra.mrb[34].mxu1 %v30587_v15 }
0x10dc   :  { %25393 = vmatpush3.bf16.msra.mxu1 %v25366_v49  ;;  %23072 = vmatprep.mubr.f32.mxu1 %v30588_v29 }
0x10dd   :  { %25395 = vmatprep.subr.bf16.mxu1 %v25394_v40 }
0x10df   :  { %23073 = vmatmul.mubr.f32.vlgmr.msra.gmra.mrb[32].mxu1 %v30589_v51 }
0x10e0   :  { %25397 = vmatpush3.bf16.msra.mxu1 %v25394_v40  ;;  %23075 = vmatprep.mubr.f32.mxu1 %v30590_v31 }
0x10e1   :  { %25399 = vmatprep.subr.bf16.mxu1 %v25398_v57 }
0x10e3   :  { %23076 = vmatmul.mubr.f32.gmra.mrb[34].mxu1 %v30591_v33 }
0x10e4   :  { %25401 = vmatpush3.bf16.msra.mxu1 %v25398_v57  ;;  %23086 = vmatprep.mubr.f32.mxu1 %v30580_v8 }
0x10e5   :  { %25403 = vmatprep.subr.bf16.mxu1 %v25362_v39 }
0x10e7   :  { %23087 = vmatmul.mubr.f32.vlgmr.msra.gmra.mrb[32].mxu1 %v30581_v6 }
0x10e8   :  { %25405 = vmatpush3.bf16.msra.mxu1 %v25362_v39  ;;  %23089 = vmatprep.mubr.f32.mxu1 %v30582_v62 }
0x10e9   :  { %25407 = vmatprep.subr.bf16.mxu1 %v25366_v49 }
0x10eb   :  { %23090 = vmatmul.mubr.f32.gmra.mrb[34].mxu1 %v30583_v45 }
0x10ec   :  { %25409 = vmatpush3.bf16.msra.mxu1 %v25366_v49  ;;  %23100 = vmatprep.mubr.f32.mxu1 %v30580_v8 }
0x10ef   :  { %23101 = vmatmul.mubr.f32.vlgmr.msra.gmra.mrb[32].mxu1 %v30581_v6 }
0x10f0   :  { %23103 = vmatprep.mubr.f32.mxu1 %v30582_v62 }
0x10f3   :  { %23104 = vmatmul.mubr.f32.gmra.mrb[34].mxu1 %v30583_v45 }
0x10f4   :  { %26228 = shalt.err (!%p26225_p2)
}
0x10f5   :  { %s26229_s24 = scalar_lea.hbm %s29719_s6, 1024 }
0x10f6   :  { %p26230_p3 = scmp.ne.s32.totalorder %s29719_s6, %s26229_s24  ;;  %p26233_p4 = scmp.lt.u32.totalorder %s26229_s24, %s29719_s6 }
0x10f8   :  { %p26235_p5 = pnand %p26233_p4, %p26230_p3 }
0x10fa   :  { %26238 = shalt.err (!%p26235_p5)
}
0x10fb   :  { %17706 = dma.vmem_to_hbm [thread:$0]  %s17701_s20, 1024, %s29719_s6, [#allocation7], %s26273_s13, %s26273_s13, %s26274_s14   ;;  %v30592_v46 = vld [vmem:[#allocation74_spill] sm:$0xff]  ;;  %v30593_v43 = vld [vmem:[#allocation81_spill] sm:$0xff]  ;;  %v30598_v20 = vld [vmem:[#allocation72_spill] sm:$0xff] }
0x10fc   :  { %v30594_v5 = vld [vmem:[#allocation82_spill] sm:$0xff]  ;;  %v30595_v38 = vld [vmem:[#allocation57_spill] sm:$0xff]  ;;  %v30601_v41 = vld [vmem:[#allocation39_spill] sm:$0xff]  ;;  %s26279_s6 = smov [#allocation15]  }
0x10fd   :  { %v30596_v18 = vld [vmem:[#allocation73_spill] sm:$0xff]  ;;  %v30597_v50 = vld [vmem:[#allocation66_spill] sm:$0xff]  ;;  %v30602_v23 = vld [vmem:[#allocation59_spill] sm:$0xff]  ;;  %s17712_s8 = sshll.u32 %s26279_s6, 4  ;;  %s17713_s8 = int_to_ptr.vmem [resolvable:$true] %s17712_s8 }
0x10fe   :  { %v30599_v44 = vld [vmem:[#allocation34_spill] sm:$0xff]  ;;  %v30603_v37 = vld [vmem:[#allocation116_spill] sm:$0xff]  ;;  %v30604_v34 = vld [vmem:[#allocation69_spill] sm:$0xff]  ;;  %s26239_s9 = scalar_lea.vmem %s17713_s8, 1024  ;;  %p26244_p7 = scmp.lt.s32.totalorder %s17713_s8, %s17713_s8 }
0x10ff   :  { %v30600_v10 = vld [vmem:[#allocation38_spill] sm:$0xff]  ;;  %v30605_v52 = vld [vmem:[#allocation37_spill] sm:$0xff]  ;;  %v30606_v8 = vld [vmem:[#allocation36_spill] sm:$0xff]  ;;  %p26240_p6 = scmp.ne.s32.totalorder %s17713_s8, %s26239_s9  ;;  %p26245_p8 = scmp.lt.s32.totalorder %s26239_s9, %s26239_s9 }
0x1100   :  { %v30607_v22 = vld [vmem:[#allocation94_spill] sm:$0xff]  ;;  %v30608_v45 = vld [vmem:[#allocation67_spill] sm:$0xff] }
0x1101   :  { %p26246_p9 = por %p26245_p8, %p26244_p7 }
0x1103   :  { %p26247_p10 = pnand %p26246_p9, %p26240_p6 }
0x1192   :  { %v23018_v42 = vpop.f32.mrb[28].mxu1 }
0x1193   :  { %v17633_v2 = vmul.f32 %v23018_v42, %v30592_v46  ;;  %v16996_v12 = vpop.f32.mrb[29].mxu1 }
0x1194   :  { %v17632_v25 = vmul.f32 %v16996_v12, %v30592_v46 }
0x1195   :  { %v17657_v16 = vadd.f32 %v30593_v43, %v17633_v2 }
0x1196   :  { %v17656_v11 = vadd.f32 %v30594_v5, %v17632_v25  ;;  %v23021_v9 = vpop.f32.mrb[30].mxu1 }
0x1197   :  { %v17665_v28 = vadd.f32 %v30595_v38, %v17657_v16  ;;  %v17635_v0 = vmul.f32 %v23021_v9, %v30592_v46  ;;  %v17008_v1 = vpop.f32.mrb[31].mxu1 }
0x1198   :  { %v17664_v24 = vadd.f32 %v30596_v18, %v17656_v11  ;;  %v17634_v4 = vmul.f32 %v17008_v1, %v30592_v46 }
0x1199   :  { %17688 = vst [vmem:[#allocation15 + $0x8] sm:$0xff] %v17665_v28  ;;  %v17659_v26 = vadd.f32 %v30597_v50, %v17635_v0 }
0x119a   :  { %17687 = vst [vmem:[#allocation15] sm:$0xff] %v17664_v24  ;;  %v17658_v17 = vadd.f32 %v30598_v20, %v17634_v4 }
0x119b   :  { %v17667_v47 = vadd.f32 %v30599_v44, %v17659_v26 }
0x119c   :  { %v17666_v53 = vadd.f32 %v30600_v10, %v17658_v17 }
0x119d   :  { %17690 = vst [vmem:[#allocation15 + $0x18] sm:$0xff] %v17667_v47 }
0x119e   :  { %17689 = vst [vmem:[#allocation15 + $0x10] sm:$0xff] %v17666_v53 }
0x11c2   :  { %v23102_v21 = vpop.f32.mrb[32].mxu1 }
0x11c3   :  { %v17637_v3 = vmul.f32 %v23102_v21, %v30592_v46  ;;  %v17610_v30 = vpop.f32.mrb[33].mxu1 }
0x11c4   :  { %v17636_v48 = vmul.f32 %v17610_v30, %v30592_v46 }
0x11c5   :  { %v17661_v19 = vadd.f32 %v30601_v41, %v17637_v3 }
0x11c6   :  { %v17660_v61 = vadd.f32 %v30602_v23, %v17636_v48  ;;  %v23105_v56 = vpop.f32.mrb[34].mxu1 }
0x11c7   :  { %v17669_v27 = vadd.f32 %v30603_v37, %v17661_v19  ;;  %v17639_v35 = vmul.f32 %v23105_v56, %v30592_v46  ;;  %v17622_v13 = vpop.f32.mrb[35].mxu1 }
0x11c8   :  { %v17668_v36 = vadd.f32 %v30604_v34, %v17660_v61  ;;  %v17638_v7 = vmul.f32 %v17622_v13, %v30592_v46 }
0x11c9   :  { %17692 = vst [vmem:[#allocation15 + $0x28] sm:$0xff] %v17669_v27  ;;  %v17663_v55 = vadd.f32 %v30605_v52, %v17639_v35 }
0x11ca   :  { %17691 = vst [vmem:[#allocation15 + $0x20] sm:$0xff] %v17668_v36  ;;  %v17662_v6 = vadd.f32 %v30606_v8, %v17638_v7 }
0x11cb   :  { %v17671_v62 = vadd.f32 %v30607_v22, %v17663_v55 }
0x11cc   :  { %v17670_v32 = vadd.f32 %v30608_v45, %v17662_v6 }
0x11cd   :  { %17694 = vst [vmem:[#allocation15 + $0x38] sm:$0xff] %v17671_v62 }
0x11ce   :  { %17693 = vst [vmem:[#allocation15 + $0x30] sm:$0xff] %v17670_v32 }
0x11cf   :  { %26250 = shalt.err (!%p26247_p10)
}
0x11d0   :  { %s26251_s12 = scalar_lea.hbm %s29720_s7, 1024 }
0x11d1   :  { %p26252_p11 = scmp.ne.s32.totalorder %s29720_s7, %s26251_s12  ;;  %p26255_p12 = scmp.lt.u32.totalorder %s26251_s12, %s29720_s7 }
0x11d3   :  { %p26257_p13 = pnand %p26255_p12, %p26252_p11 }
0x11d5   :  { %26260 = shalt.err (!%p26257_p13)
}
0x11d6   :  { %17718 = dma.vmem_to_hbm [thread:$0]  %s17713_s8, 1024, %s29720_s7, [#allocation16], %s26273_s13, %s26273_s13, %s26274_s14  }
0x11d7   :  { %26267 = dma.done.wait [#allocation7], 1024  }
0x11d8   :  { %26268 = vsyncadd [#allocation7], 4294966272 }
0x11d9   :  { %26269 = dma.done.wait [#allocation16], 1024  }
0x11da   :  { %26270 = vsyncadd [#allocation16], 4294966272 }
0x11db   :  { %17725 = vsyncpa [#allocation6], 1 }
0x11dc   :  { %17726 = vsyncpa [#allocation9], 1 }
0x11dd   :  { %17727 = vsyncpa [#allocation12], 1 }
0x11de   :  { %17728 = vsyncpa [#allocation7], 1 }
0x11df   :  { %17729 = vsyncpa [#allocation16], 1 }

</bundles_post_ra>
